<compile_context>
chip_gen: v5e
topology: v5e:2x2
jax: 0.10.0
libtpu: 0.0.40
codegen_flags: <defaults>
</compile_context>

<pallas_src>
import numpy as np
import jax
import jax.numpy as jnp
from jax.experimental import pallas as pl
from jax.experimental.pallas import tpu as pltpu

# ---- module constants (from the PyTorch source) ----
DIM_CAPSULE = 5        # Dim_capsule
NUM_CAPSULE = 5        # Num_capsule
ROUTINGS = 4           # Routings
T_EPSILON = 1e-07
HIDDEN_SIZE = 60       # hidden_size / gru_len
INPUT_DIM_CAPSULE = HIDDEN_SIZE * 2   # = 120
PACK = 5               # batch elements packed per 128-lane row (5*NC*DC = 125)


def _caps_kernel(x_ref, w_ref, e_ref, et_ref, g_ref, s_ref, out_ref):
    # x_ref  : (BG*T, P*D)      packed batch tile of GRU outputs
    # w_ref  : (P*D, P*NC*DC)   block-diagonal capsule weights
    # e_ref  : (P*NC, P*NC*DC)  capsule -> lane expansion (0/1)
    # et_ref : (P*NC*DC, P*NC)  lane -> capsule reduction (0/1)
    # g_ref  : (P*NC*DC, P*NC*DC) per-capsule sum-of-squares broadcast (0/1)
    # s_ref  : (P*NC, P*NC)     per-packed-batch-element sum over NC (0/1)
    # out_ref: (BG, P*NC*DC)    squashed capsule outputs, lane-packed
    rows = x_ref.shape[0]
    BG = out_ref.shape[0]
    T = rows // BG
    W = out_ref.shape[1]          # P * NC * DC = 125

    x = x_ref[...]
    w = w_ref[...]
    E = e_ref[...]
    E_T = et_ref[...]
    G = g_ref[...]
    S = s_ref[...]

    # One large MXU matmul per grid step; 125/128 output lanes live.
    u_flat = jnp.dot(x, w, preferred_element_type=jnp.float32)      # (rows, 125)
    u3 = u_flat.reshape(BG, T, W)    # pure relabel: T % 8 == 0

    # Routing iteration 0 peeled: b == 0 -> softmax over NC is exactly uniform.
    s = jnp.sum(u3, axis=1) * (1.0 / NUM_CAPSULE)                    # (BG, 125)
    ssq = jnp.dot(s * s, G, preferred_element_type=jnp.float32)      # (BG, 125)
    outputs = s / jnp.sqrt(ssq + T_EPSILON)                          # squash

    for _ in range(1, ROUTINGS):
        # b[row, p*NC+i] = sum_k u_hat[row, p, i, k] * outputs[group(row), p, i, k]
        prod = (u3 * outputs[:, None, :]).reshape(rows, W)           # (rows, 125)
        b = jnp.dot(prod, E_T, preferred_element_type=jnp.float32)   # (rows, 25)

        # Softmax over the NC output capsules of each packed batch element.
        # b stays O(1) so the max-subtract is dropped (shift-invariant); the
        # NC-sum denominator goes through a constant matmul (MXU, not XLU).
        e = jnp.exp(b)
        denom = jnp.dot(e, S, preferred_element_type=jnp.float32)    # (rows, 25)
        c = e / denom

        # Expand c over each capsule's DC lanes, weight u_hat, reduce over T
        # (sublane axis) per batch group.
        c_exp = jnp.dot(c, E, preferred_element_type=jnp.float32)    # (rows, 125)
        s = jnp.sum((c_exp * u_flat).reshape(BG, T, W), axis=1)      # (BG, 125)

        # squash exactly as the module: x / sqrt(sum_k x^2 + eps).
        ssq = jnp.dot(s * s, G, preferred_element_type=jnp.float32)
        outputs = s / jnp.sqrt(ssq + T_EPSILON)

    out_ref[...] = outputs.astype(out_ref.dtype)


def caps_layer(x, w, *, block_batch=320):
    """x: (B, T, D) float32, w: (D, NC*DC) float32 -> (B, NC, DC) float32."""
    B, T, D = x.shape
    NC, DC = NUM_CAPSULE, DIM_CAPSULE
    NCDC = NC * DC
    P = PACK
    assert w.shape == (D, NCDC)

    x = x.astype(jnp.float32)
    w = w.astype(jnp.float32)

    # Pad T to a multiple of 8 so the (rows, 125) <-> (BG, T, 125) reshapes are
    # pure relabels of the f32 (8, 128) tiling.  Zero rows give zero u_hat and
    # do not perturb the routing result.
    T_pad = pl.cdiv(T, 8) * 8
    if T_pad != T:
        x = jnp.pad(x, ((0, 0), (0, T_pad - T), (0, 0)))

    # Group batch elements in fives (lane packing).  BG = batch groups per grid
    # step; multiple of 8, capped so we never pad far beyond the real batch.
    G_total = pl.cdiv(B, P)
    BG = max(8, (max(block_batch // P, 1) // 8) * 8)
    BG = min(BG, pl.cdiv(G_total, 8) * 8)
    G_pad = pl.cdiv(G_total, BG) * BG
    B_pad = G_pad * P
    if B_pad != B:
        x = jnp.pad(x, ((0, B_pad - B), (0, 0), (0, 0)))

    # Pack: (G, P, T, D) -> (G, T, P, D) -> (G*T, P*D); each row now carries
    # P batch elements side by side along the lane axis.
    x_packed = (x.reshape(G_pad, P, T_pad, D)
                 .transpose(0, 2, 1, 3)
                 .reshape(G_pad * T_pad, P * D))

    # Block-diagonal weight and constant 0/1 routing matrices (all 125-wide).
    eyeP = np.eye(P, dtype=np.float32)
    w5 = jnp.kron(jnp.asarray(eyeP), w)                               # (P*D, P*NCDC)
    e_small = np.repeat(np.eye(NC, dtype=np.float32), DC, axis=1)     # (NC, NCDC)
    E_np = np.kron(eyeP, e_small)                                     # (P*NC, P*NCDC)
    E = jnp.asarray(E_np)
    E_T = jnp.asarray(E_np.T)                                         # (P*NCDC, P*NC)
    Gm = jnp.asarray(np.kron(np.eye(P * NC, dtype=np.float32),
                             np.ones((DC, DC), np.float32)))          # (125, 125)
    Sm = jnp.asarray(np.kron(eyeP, np.ones((NC, NC), np.float32)))    # (25, 25)

    PNC = P * NC
    PNCDC = P * NCDC
    rows = BG * T_pad

    # VMEM budget estimate -> raise the scoped limit (matters on v5e's 16 MiB
    # default once tiles get large); clamp to a v7x-safe ceiling.
    x_tile_bytes = rows * P * D * 4
    inter_bytes = rows * 128 * 4           # one (rows, 125) f32 value (lane tile)
    est = (2 * x_tile_bytes                # double-buffered x tile
           + 8 * inter_bytes               # u_flat / prod / e / c / c_exp ...
           + 8 * BG * 128 * 4              # s / ssq / outputs
           + P * D * 128 * 4               # W5 tile
           + (4 << 20))                    # constants + regalloc headroom
    vmem_limit = int(min(max(est, 32 << 20), 96 << 20))

    out_flat = pl.pallas_call(
        _caps_kernel,
        out_shape=jax.ShapeDtypeStruct((G_pad, PNCDC), jnp.float32),
        grid_spec=pltpu.PrefetchScalarGridSpec(
            num_scalar_prefetch=0,
            grid=(G_pad // BG,),
            in_specs=[
                pl.BlockSpec((rows, P * D), lambda i: (i, 0)),
                pl.BlockSpec((P * D, PNCDC), lambda i: (0, 0)),
                pl.BlockSpec((PNC, PNCDC), lambda i: (0, 0)),
                pl.BlockSpec((PNCDC, PNC), lambda i: (0, 0)),
                pl.BlockSpec((PNCDC, PNCDC), lambda i: (0, 0)),
                pl.BlockSpec((PNC, PNC), lambda i: (0, 0)),
            ],
            out_specs=pl.BlockSpec((BG, PNCDC), lambda i: (i, 0)),
        ),
        compiler_params=pltpu.CompilerParams(
            dimension_semantics=("parallel",),
            vmem_limit_bytes=vmem_limit),
    )(x_packed, w5, E, E_T, Gm, Sm)

    # (G_pad, P*NC*DC) -> (G_pad*P, NC, DC), slice off batch padding.
    return out_flat.reshape(G_pad * P, NC, DC)[:B]


def caps_layer_ref(x, w):
    """Pure-JAX reference mirroring the PyTorch forward exactly."""
    B, T, D = x.shape
    NC, DC = NUM_CAPSULE, DIM_CAPSULE
    u = jnp.matmul(x, w)                                # (B, T, NC*DC)
    u = u.reshape(B, T, NC, DC).transpose(0, 2, 1, 3)   # (B, NC, T, DC)
    b = jnp.zeros((B, NC, T), jnp.float32)
    outputs = None
    for i in range(ROUTINGS):
        c = jax.nn.softmax(b, axis=1)                   # softmax over capsules
        outputs = jnp.einsum('bij,bijk->bik', c, u)
        s = jnp.sum(outputs ** 2, axis=-1, keepdims=True)
        outputs = outputs / jnp.sqrt(s + T_EPSILON)
        if i < ROUTINGS - 1:
            b = jnp.einsum('bik,bijk->bij', outputs, u)
    return outputs


if __name__ == "__main__":
    key = jax.random.PRNGKey(0)
    kx, kw = jax.random.split(key)

    B = 83                        # exercises 5-way packing + batch-group padding
    T = 11                        # input_num_capsule (seq len); exercises T padding
    D = INPUT_DIM_CAPSULE         # 120 = gru_len * 2

    x = jax.random.normal(kx, (B, T, D), dtype=jnp.float32)

    # Xavier-normal init for W of (torch) shape (1, D, NC*DC).
    fan_in = D * NUM_CAPSULE * DIM_CAPSULE
    fan_out = NUM_CAPSULE * DIM_CAPSULE
    std = (2.0 / (fan_in + fan_out)) ** 0.5
    w = std * jax.random.normal(kw, (D, NUM_CAPSULE * DIM_CAPSULE),
                                dtype=jnp.float32)

    ref = jax.block_until_ready(caps_layer_ref(x, w))

    # Small tile -> grid of 3 steps (exercises batch-group padding + pipelining).
    out_small = jax.block_until_ready(caps_layer(x, w, block_batch=40))
    assert out_small.shape == (B, NUM_CAPSULE, DIM_CAPSULE)
    assert jnp.allclose(out_small, ref, rtol=1e-3, atol=1e-3), "mismatch (tiled)"

    # Default (large) tile path -> single grid step at this batch size.
    out_big = jax.block_until_ready(caps_layer(x, w))
    assert out_big.shape == (B, NUM_CAPSULE, DIM_CAPSULE)
    assert jnp.allclose(out_big, ref, rtol=1e-3, atol=1e-3), "mismatch (default)"

    print("KERNEL_OK")
</pallas_src>

<mosaic_0001>
module attributes {stable_mosaic.version = 11 : i64} {
  func.func @_caps_kernel(%arg0: i32, %arg1: memref<128x600xf32, #tpu.memory_space<vmem>>, %arg2: memref<600x125xf32, #tpu.memory_space<vmem>>, %arg3: memref<25x125xf32, #tpu.memory_space<vmem>>, %arg4: memref<125x25xf32, #tpu.memory_space<vmem>>, %arg5: memref<125x125xf32, #tpu.memory_space<vmem>>, %arg6: memref<25x25xf32, #tpu.memory_space<vmem>>, %arg7: memref<8x125xf32, #tpu.memory_space<vmem>>) attributes {dimension_semantics = [#tpu.dimension_semantics<parallel>], iteration_bounds = array<i64: 3>, scalar_prefetch = 0 : i64, scratch_operands = 0 : i64, tpu.core_type = #tpu.core_type<tc>, window_params = [{transform_indices = @transform_0, window_bounds = array<i64: 128, 600>}, {pipeline_mode = #tpu.pipeline_mode<synchronous>, transform_indices = @transform_1, window_bounds = array<i64: 600, 125>}, {pipeline_mode = #tpu.pipeline_mode<synchronous>, transform_indices = @transform_2, window_bounds = array<i64: 25, 125>}, {pipeline_mode = #tpu.pipeline_mode<synchronous>, transform_indices = @transform_3, window_bounds = array<i64: 125, 25>}, {pipeline_mode = #tpu.pipeline_mode<synchronous>, transform_indices = @transform_4, window_bounds = array<i64: 125, 125>}, {pipeline_mode = #tpu.pipeline_mode<synchronous>, transform_indices = @transform_5, window_bounds = array<i64: 25, 25>}, {transform_indices = @transform_6, window_bounds = array<i64: 8, 125>}]} {
    %c0 = arith.constant 0 : index
    %c0_0 = arith.constant 0 : index
    %0 = vector.load %arg1[%c0, %c0_0] : memref<128x600xf32, #tpu.memory_space<vmem>>, vector<128x600xf32>
    %c0_1 = arith.constant 0 : index
    %c0_2 = arith.constant 0 : index
    %1 = vector.load %arg2[%c0_1, %c0_2] : memref<600x125xf32, #tpu.memory_space<vmem>>, vector<600x125xf32>
    %c0_3 = arith.constant 0 : index
    %c0_4 = arith.constant 0 : index
    %2 = vector.load %arg3[%c0_3, %c0_4] : memref<25x125xf32, #tpu.memory_space<vmem>>, vector<25x125xf32>
    %c0_5 = arith.constant 0 : index
    %c0_6 = arith.constant 0 : index
    %3 = vector.load %arg4[%c0_5, %c0_6] : memref<125x25xf32, #tpu.memory_space<vmem>>, vector<125x25xf32>
    %c0_7 = arith.constant 0 : index
    %c0_8 = arith.constant 0 : index
    %4 = vector.load %arg5[%c0_7, %c0_8] : memref<125x125xf32, #tpu.memory_space<vmem>>, vector<125x125xf32>
    %c0_9 = arith.constant 0 : index
    %c0_10 = arith.constant 0 : index
    %5 = vector.load %arg6[%c0_9, %c0_10] : memref<25x25xf32, #tpu.memory_space<vmem>>, vector<25x25xf32>
    %cst = arith.constant dense<0.000000e+00> : vector<128x125xf32>
    %6 = tpu.matmul %0, %1, %cst {dimension_numbers = #tpu.dot_dimension_numbers<[1], [0], [0], [1], [0, 0, 1, 1], [], []>} : vector<128x600xf32>, vector<600x125xf32>, vector<128x125xf32> -> vector<128x125xf32>
    %7 = vector.shape_cast %6 : vector<128x125xf32> to vector<8x16x125xf32>
    %cst_11 = arith.constant dense<0.000000e+00> : vector<8x125xf32>
    %8 = vector.multi_reduction <add>, %7, %cst_11 [1] : vector<8x16x125xf32> to vector<8x125xf32>
    %cst_12 = arith.constant 2.000000e-01 : f32
    %9 = vector.broadcast %cst_12 : f32 to vector<8x125xf32>
    %10 = arith.mulf %8, %9 : vector<8x125xf32>
    %11 = arith.mulf %10, %10 : vector<8x125xf32>
    %cst_13 = arith.constant dense<0.000000e+00> : vector<8x125xf32>
    %12 = tpu.matmul %11, %4, %cst_13 {dimension_numbers = #tpu.dot_dimension_numbers<[1], [0], [0], [1], [0, 0, 1, 1], [], []>} : vector<8x125xf32>, vector<125x125xf32>, vector<8x125xf32> -> vector<8x125xf32>
    %cst_14 = arith.constant 1.000000e-07 : f32
    %13 = vector.broadcast %cst_14 : f32 to vector<8x125xf32>
    %14 = arith.addf %12, %13 : vector<8x125xf32>
    %15 = math.sqrt %14 : vector<8x125xf32>
    %16 = arith.divf %10, %15 : vector<8x125xf32>
    %17 = vector.shape_cast %16 : vector<8x125xf32> to vector<8x1x125xf32>
    %18 = vector.broadcast %17 : vector<8x1x125xf32> to vector<8x16x125xf32>
    %19 = arith.mulf %7, %18 : vector<8x16x125xf32>
    %20 = vector.shape_cast %19 : vector<8x16x125xf32> to vector<128x125xf32>
    %cst_15 = arith.constant dense<0.000000e+00> : vector<128x25xf32>
    %21 = tpu.matmul %20, %3, %cst_15 {dimension_numbers = #tpu.dot_dimension_numbers<[1], [0], [0], [1], [0, 0, 1, 1], [], []>} : vector<128x125xf32>, vector<125x25xf32>, vector<128x25xf32> -> vector<128x25xf32>
    %22 = math.exp %21 : vector<128x25xf32>
    %cst_16 = arith.constant dense<0.000000e+00> : vector<128x25xf32>
    %23 = tpu.matmul %22, %5, %cst_16 {dimension_numbers = #tpu.dot_dimension_numbers<[1], [0], [0], [1], [0, 0, 1, 1], [], []>} : vector<128x25xf32>, vector<25x25xf32>, vector<128x25xf32> -> vector<128x25xf32>
    %24 = arith.divf %22, %23 : vector<128x25xf32>
    %cst_17 = arith.constant dense<0.000000e+00> : vector<128x125xf32>
    %25 = tpu.matmul %24, %2, %cst_17 {dimension_numbers = #tpu.dot_dimension_numbers<[1], [0], [0], [1], [0, 0, 1, 1], [], []>} : vector<128x25xf32>, vector<25x125xf32>, vector<128x125xf32> -> vector<128x125xf32>
    %26 = arith.mulf %25, %6 : vector<128x125xf32>
    %27 = vector.shape_cast %26 : vector<128x125xf32> to vector<8x16x125xf32>
    %cst_18 = arith.constant dense<0.000000e+00> : vector<8x125xf32>
    %28 = vector.multi_reduction <add>, %27, %cst_18 [1] : vector<8x16x125xf32> to vector<8x125xf32>
    %29 = arith.mulf %28, %28 : vector<8x125xf32>
    %cst_19 = arith.constant dense<0.000000e+00> : vector<8x125xf32>
    %30 = tpu.matmul %29, %4, %cst_19 {dimension_numbers = #tpu.dot_dimension_numbers<[1], [0], [0], [1], [0, 0, 1, 1], [], []>} : vector<8x125xf32>, vector<125x125xf32>, vector<8x125xf32> -> vector<8x125xf32>
    %cst_20 = arith.constant 1.000000e-07 : f32
    %31 = vector.broadcast %cst_20 : f32 to vector<8x125xf32>
    %32 = arith.addf %30, %31 : vector<8x125xf32>
    %33 = math.sqrt %32 : vector<8x125xf32>
    %34 = arith.divf %28, %33 : vector<8x125xf32>
    %35 = vector.shape_cast %34 : vector<8x125xf32> to vector<8x1x125xf32>
    %36 = vector.broadcast %35 : vector<8x1x125xf32> to vector<8x16x125xf32>
    %37 = arith.mulf %7, %36 : vector<8x16x125xf32>
    %38 = vector.shape_cast %37 : vector<8x16x125xf32> to vector<128x125xf32>
    %cst_21 = arith.constant dense<0.000000e+00> : vector<128x25xf32>
    %39 = tpu.matmul %38, %3, %cst_21 {dimension_numbers = #tpu.dot_dimension_numbers<[1], [0], [0], [1], [0, 0, 1, 1], [], []>} : vector<128x125xf32>, vector<125x25xf32>, vector<128x25xf32> -> vector<128x25xf32>
    %40 = math.exp %39 : vector<128x25xf32>
    %cst_22 = arith.constant dense<0.000000e+00> : vector<128x25xf32>
    %41 = tpu.matmul %40, %5, %cst_22 {dimension_numbers = #tpu.dot_dimension_numbers<[1], [0], [0], [1], [0, 0, 1, 1], [], []>} : vector<128x25xf32>, vector<25x25xf32>, vector<128x25xf32> -> vector<128x25xf32>
    %42 = arith.divf %40, %41 : vector<128x25xf32>
    %cst_23 = arith.constant dense<0.000000e+00> : vector<128x125xf32>
    %43 = tpu.matmul %42, %2, %cst_23 {dimension_numbers = #tpu.dot_dimension_numbers<[1], [0], [0], [1], [0, 0, 1, 1], [], []>} : vector<128x25xf32>, vector<25x125xf32>, vector<128x125xf32> -> vector<128x125xf32>
    %44 = arith.mulf %43, %6 : vector<128x125xf32>
    %45 = vector.shape_cast %44 : vector<128x125xf32> to vector<8x16x125xf32>
    %cst_24 = arith.constant dense<0.000000e+00> : vector<8x125xf32>
    %46 = vector.multi_reduction <add>, %45, %cst_24 [1] : vector<8x16x125xf32> to vector<8x125xf32>
    %47 = arith.mulf %46, %46 : vector<8x125xf32>
    %cst_25 = arith.constant dense<0.000000e+00> : vector<8x125xf32>
    %48 = tpu.matmul %47, %4, %cst_25 {dimension_numbers = #tpu.dot_dimension_numbers<[1], [0], [0], [1], [0, 0, 1, 1], [], []>} : vector<8x125xf32>, vector<125x125xf32>, vector<8x125xf32> -> vector<8x125xf32>
    %cst_26 = arith.constant 1.000000e-07 : f32
    %49 = vector.broadcast %cst_26 : f32 to vector<8x125xf32>
    %50 = arith.addf %48, %49 : vector<8x125xf32>
    %51 = math.sqrt %50 : vector<8x125xf32>
    %52 = arith.divf %46, %51 : vector<8x125xf32>
    %53 = vector.shape_cast %52 : vector<8x125xf32> to vector<8x1x125xf32>
    %54 = vector.broadcast %53 : vector<8x1x125xf32> to vector<8x16x125xf32>
    %55 = arith.mulf %7, %54 : vector<8x16x125xf32>
    %56 = vector.shape_cast %55 : vector<8x16x125xf32> to vector<128x125xf32>
    %cst_27 = arith.constant dense<0.000000e+00> : vector<128x25xf32>
    %57 = tpu.matmul %56, %3, %cst_27 {dimension_numbers = #tpu.dot_dimension_numbers<[1], [0], [0], [1], [0, 0, 1, 1], [], []>} : vector<128x125xf32>, vector<125x25xf32>, vector<128x25xf32> -> vector<128x25xf32>
    %58 = math.exp %57 : vector<128x25xf32>
    %cst_28 = arith.constant dense<0.000000e+00> : vector<128x25xf32>
    %59 = tpu.matmul %58, %5, %cst_28 {dimension_numbers = #tpu.dot_dimension_numbers<[1], [0], [0], [1], [0, 0, 1, 1], [], []>} : vector<128x25xf32>, vector<25x25xf32>, vector<128x25xf32> -> vector<128x25xf32>
    %60 = arith.divf %58, %59 : vector<128x25xf32>
    %cst_29 = arith.constant dense<0.000000e+00> : vector<128x125xf32>
    %61 = tpu.matmul %60, %2, %cst_29 {dimension_numbers = #tpu.dot_dimension_numbers<[1], [0], [0], [1], [0, 0, 1, 1], [], []>} : vector<128x25xf32>, vector<25x125xf32>, vector<128x125xf32> -> vector<128x125xf32>
    %62 = arith.mulf %61, %6 : vector<128x125xf32>
    %63 = vector.shape_cast %62 : vector<128x125xf32> to vector<8x16x125xf32>
    %cst_30 = arith.constant dense<0.000000e+00> : vector<8x125xf32>
    %64 = vector.multi_reduction <add>, %63, %cst_30 [1] : vector<8x16x125xf32> to vector<8x125xf32>
    %65 = arith.mulf %64, %64 : vector<8x125xf32>
    %cst_31 = arith.constant dense<0.000000e+00> : vector<8x125xf32>
    %66 = tpu.matmul %65, %4, %cst_31 {dimension_numbers = #tpu.dot_dimension_numbers<[1], [0], [0], [1], [0, 0, 1, 1], [], []>} : vector<8x125xf32>, vector<125x125xf32>, vector<8x125xf32> -> vector<8x125xf32>
    %cst_32 = arith.constant 1.000000e-07 : f32
    %67 = vector.broadcast %cst_32 : f32 to vector<8x125xf32>
    %68 = arith.addf %66, %67 : vector<8x125xf32>
    %69 = math.sqrt %68 : vector<8x125xf32>
    %70 = arith.divf %64, %69 : vector<8x125xf32>
    %c0_33 = arith.constant 0 : index
    %c0_34 = arith.constant 0 : index
    %71 = vector.load %arg7[%c0_33, %c0_34] : memref<8x125xf32, #tpu.memory_space<vmem>>, vector<8x125xf32>
    tpu.vector_store %arg7[%c0_33, %c0_34], %70 {strides = array<i32>} : memref<8x125xf32, #tpu.memory_space<vmem>>, vector<8x125xf32>,
    return
  }
  func.func @transform_0(%arg0: i32) -> (i32, i32) {
    %c0_i32 = arith.constant 0 : i32
    %c0_i32_0 = arith.constant 0 : i32
    return %arg0, %c0_i32 : i32, i32
  }
  func.func @transform_1(%arg0: i32) -> (i32, i32) {
    %c0_i32 = arith.constant 0 : i32
    %c0_i32_0 = arith.constant 0 : i32
    %c0_i32_1 = arith.constant 0 : i32
    return %c0_i32, %c0_i32_0 : i32, i32
  }
  func.func @transform_2(%arg0: i32) -> (i32, i32) {
    %c0_i32 = arith.constant 0 : i32
    %c0_i32_0 = arith.constant 0 : i32
    %c0_i32_1 = arith.constant 0 : i32
    return %c0_i32, %c0_i32_0 : i32, i32
  }
  func.func @transform_3(%arg0: i32) -> (i32, i32) {
    %c0_i32 = arith.constant 0 : i32
    %c0_i32_0 = arith.constant 0 : i32
    %c0_i32_1 = arith.constant 0 : i32
    return %c0_i32, %c0_i32_0 : i32, i32
  }
  func.func @transform_4(%arg0: i32) -> (i32, i32) {
    %c0_i32 = arith.constant 0 : i32
    %c0_i32_0 = arith.constant 0 : i32
    %c0_i32_1 = arith.constant 0 : i32
    return %c0_i32, %c0_i32_0 : i32, i32
  }
  func.func @transform_5(%arg0: i32) -> (i32, i32) {
    %c0_i32 = arith.constant 0 : i32
    %c0_i32_0 = arith.constant 0 : i32
    %c0_i32_1 = arith.constant 0 : i32
    return %c0_i32, %c0_i32_0 : i32, i32
  }
  func.func @transform_6(%arg0: i32) -> (i32, i32) {
    %c0_i32 = arith.constant 0 : i32
    %c0_i32_0 = arith.constant 0 : i32
    return %arg0, %c0_i32 : i32, i32
  }
}

</mosaic_0001>

<bundles_post_ra>
// kernel: tpu_custom_call.1
= control target key start
LH: loop header
LB: loop body
LE: loop exit
PB: predicated region body
PF: predicated region fallthrough
CT: control target
= control target key end

     0   :  { %11 = vsyncpa [#allocation3], 0  ;;  %s6554_s0 = inlined_call_operand.vmem [shape: f32[384,600], index: 0, kind: input, shape index: {}]   ;;  %s6555_s1 = inlined_call_operand.vmem [shape: f32[600,125], index: 1, kind: input, shape index: {}]   ;;  %s6556_s2 = inlined_call_operand.vmem [shape: f32[25,125], index: 2, kind: input, shape index: {}]   ;;  %s6557_s3 = inlined_call_operand.vmem [shape: f32[125,25], index: 3, kind: input, shape index: {}]   ;;  %s6558_s4 = inlined_call_operand.vmem [shape: f32[125,125], index: 4, kind: input, shape index: {}]   ;;  %s6559_s5 = inlined_call_operand.vmem [shape: f32[25,25], index: 5, kind: input, shape index: {}]   ;;  %s6560_s6 = inlined_call_operand.hbm [shape: f32[24,125], index: 6, kind: output, shape index: {}]  }
   0x1   :  { %13 = vsyncpa [#allocation3 + $0x1], 0  ;;  %s4638_s21 = smov 0   ;;  %s4640_s22 = smov 0  }
   0x2   :  { %s4642_s23 = smov 0   ;;  %s4644_s24 = smov 0  }
   0x3 LB: > { %s4659_s25 = sadd.s32 4294967295, %s4601_s24   ;;  %s3967_s26 = sadd.s32 4294967294, %s4601_s24   ;;  %s4601_s24 = sphi %s4644_s24, %s6619_s24   ;;  %s4597_s23 = sphi %s4642_s23, %s6618_s23   ;;  %s4593_s22 = sphi %s4640_s22, %s6617_s22   ;;  %s4589_s21 = sphi %s4638_s21, %s6616_s21  }
   0x4   : > { %s4663_s27 = sadd.s32 1, %s4601_s24   ;;  %s157_s28 = sadd.s32 1, %s4597_s23 }
   0x5   : > { %s154_s29 = ssub.s32 %s4601_s24, %s4663_s27  ;;  %p167_p0 = scmp.ne.s32.totalorder %s4597_s23, %s4593_s22 }
   0x6   : > { %p155_p1 = scmp.eq.s32.totalorder %s154_s29, 0  ;;  %p168_p2 = scmp.eq.s32.totalorder %s4659_s25, 2 }
   0x7   : > { %p173_p3 = scmp.ne.s32.totalorder %s4593_s22, %s4589_s21  ;;  %p174_p4 = scmp.eq.s32.totalorder %s3967_s26, 2 }
   0x8   : > { %s4674_s30 = scalar_select %p155_p1, %s4597_s23, %s157_s28  }
   0x9   : > { %p4676_p5 = por %p168_p2, %p167_p0  ;;  %p4680_p6 = por %p174_p4, %p173_p3 }
   0xa   : > { %p3970_p7 = scmp.ge.s32.totalorder %s4601_s24, 1  ;;  %p217_p8 = scmp.lt.s32.totalorder %s4601_s24, 4 }
   0xc   : > { %p218_p9 = pnand %p3970_p7, %p217_p8 }
   0xe   : > { %221 = sbr.rel (%p218_p9) target bundleno = 2894 (0xb4e), region = 44 }
  0x13   : > { %v350_v0 = vld [vmem:[%s6555_s1 + $0x78] sm:$0xff]  ;;  %v349_v2 = vld [vmem:[%s6555_s1 + $0x70] sm:$0xff]  ;;  %v348_v4 = vld [vmem:[%s6555_s1 + $0x68] sm:$0xff]  ;;  %s3972_s9 = sshll.u32 %s4659_s25, 4  ;;  %vm450_vm0 = vcmask 719872   ;;  %vm6561_vm1 = vcmask 1044480  }
  0x14   : > { %v366_v1 = vld [vmem:[%s6555_s1 + $0xf8] sm:$0xff]  ;;  %499 = vmatpush.msra.mxu0 %v350_v0  ;;  %v365_v3 = vld [vmem:[%s6555_s1 + $0xf0] sm:$0xff]  ;;  %v364_v5 = vld [vmem:[%s6555_s1 + $0xe8] sm:$0xff]  ;;  %p4757_p10 = scmp.lt.s32.totalorder %s3972_s9, 47  ;;  %vm6563_vm2 = vcmask 1022976   ;;  %vm921_vm3 = vcmask 1041409  }
  0x15   : > { %564 = vmatpush.msra.mxu1 %v366_v1  ;;  %v347_v6 = vld [vmem:[%s6555_s1 + $0x60] sm:$0xff]  ;;  %v346_v8 = vld [vmem:[%s6555_s1 + $0x58] sm:$0xff]  ;;  %v345_v10 = vld [vmem:[%s6555_s1 + $0x50] sm:$0xff]  ;;  %vm923_vm4 = vcmask 1042434   ;;  %vm6567_vm5 = vcmask 1043459   ;;  %vm6566_vm6 = vcmask 1044484  }
  0x16   : > { %500 = vmatpush.msra.mxu0 %v349_v2  ;;  %v363_v7 = vld [vmem:[%s6555_s1 + $0xe0] sm:$0xff]  ;;  %v362_v9 = vld [vmem:[%s6555_s1 + $0xd8] sm:$0xff]  ;;  %v361_v11 = vld [vmem:[%s6555_s1 + $0xd0] sm:$0xff]  ;;  %s6621_s9 = smov (!%p4757_p10, %s3972_s9), 47  ;;  %vm6565_vm7 = vcmask 1045509   ;;  %vm6564_vm8 = vcmask 1046534  }
  0x17   : > { %565 = vmatpush.msra.mxu1 %v365_v3  ;;  %v344_v12 = vld [vmem:[%s6555_s1 + $0x48] sm:$0xff]  ;;  %v343_v14 = vld [vmem:[%s6555_s1 + $0x40] sm:$0xff]  ;;  %v4735_v15 = vld [vmem:[%s6555_s1 + $0x178] sm:$0xff]  ;;  %s4203_s14 = smul.u32 40, %s6621_s9  ;;  %vm6562_vm9 = vcmask 1047559   ;;  %s245_s16 = sand.u32 1, %s4593_s22  }
  0x18   : > { %501 = vmatpush.msra.mxu0 %v348_v4  ;;  %v360_v13 = vld [vmem:[%s6555_s1 + $0xc8] sm:$0xff]  ;;  %v359_v16 = vld [vmem:[%s6555_s1 + $0xc0] sm:$0xff]  ;;  %v4743_v17 = vld [vmem:[%s6555_s1 + $0x170] sm:$0xff]  ;;  %4155 = vmatpush.msra.mxu2 %v4735_v15  ;;  %s3971_s17 = sshll.u32 %s245_s16, 3  ;;  %s4152_s9 = sshll.u32 %s4659_s25, 3 }
  0x19   : > { %566 = vmatpush.msra.mxu1 %v364_v5  ;;  %v4749_v18 = vld [vmem:[%s6555_s1 + $0x1f8] sm:$0xff]  ;;  %v341_v21 = vld [vmem:[%s6555_s1 + $0x30] sm:$0xff]  ;;  %v4772_v23 = vld [vmem:[%s6555_s1 + $0x168] sm:$0xff]  ;;  %s4875_s18 = scalar_lea.vmem %s6554_s0, %s4203_s14  ;;  %s3903_s26 = scalar_lea.hbm %s6560_s6, %s4152_s9 }
  0x1a   : > { %502 = vmatpush.msra.mxu0 %v347_v6  ;;  %v342_v19 = vld [vmem:[%s6555_s1 + $0x38] sm:$0xff]  ;;  %4156 = vmatpush.msra.mxu2 %v4743_v17  ;;  %v357_v22 = vld [vmem:[%s6555_s1 + $0xb0] sm:$0xff]  ;;  %v4782_v25 = vld [vmem:[%s6555_s1 + $0x160] sm:$0xff]  ;;  %s247_s25 = scalar_lea.vmem [#allocation2], %s3971_s17  ;;  %s3907_s14 = sshll.u32 %s3903_s26, 4  ;;  %s3908_s14 = int_to_ptr.hbm [resolvable:$true] %s3907_s14 }
  0x1b   : > { %567 = vmatpush.msra.mxu1 %v363_v7  ;;  %v358_v20 = vld [vmem:[%s6555_s1 + $0xb8] sm:$0xff]  ;;  %4172 = vmatpush.msra.mxu3 %v4749_v18  ;;  %v4777_v24 = vld [vmem:[%s6555_s1 + $0x1f0] sm:$0xff]  ;;  %v4787_v26 = vld [vmem:[%s6555_s1 + $0x1e8] sm:$0xff]  ;;  %s3893_s29 = scalar_lea.sflag [#allocation3], %s245_s16  ;;  %s4553_s10 = sshra.s32 %s3908_s14, 4  ;;  %s4554_s10 = int_to_ptr.hbm [resolvable:$true] %s4553_s10 }
  0x1c   : > { %503 = vmatpush.msra.mxu0 %v346_v8  ;;  %v340_v27 = vld [vmem:[%s6555_s1 + $0x28] sm:$0xff]  ;;  %4157 = vmatpush.msra.mxu2 %v4772_v23  ;;  %v4804_v29 = vld [vmem:[%s6555_s1 + $0x158] sm:$0xff]  ;;  %v4809_v30 = vld [vmem:[%s6555_s1 + $0x1e0] sm:$0xff]  ;;  %s4555_s11 = scalar_lea.hbm %s4554_s10, 8  ;;  %s4559_s15 = scalar_lea.hbm %s6560_s6, 24 }
  0x1d   : > { %568 = vmatpush.msra.mxu1 %v362_v9  ;;  %v356_v28 = vld [vmem:[%s6555_s1 + $0xa8] sm:$0xff]  ;;  %4174 = vmatpush.msra.mxu3 %v4777_v24  ;;  %v339_v31 = vld [vmem:[%s6555_s1 + $0x20] sm:$0xff]  ;;  %v4822_v33 = vld [vmem:[%s6555_s1 + $0x150] sm:$0xff]  ;;  %p4556_p11 = scmp.ne.s32.totalorder %s4554_s10, %s4555_s11  ;;  %p4560_p0 = scmp.lt.s32.totalorder %s4554_s10, %s6560_s6 }
  0x1e   : > { %504 = vmatpush.msra.mxu0 %v345_v10  ;;  %v355_v32 = vld [vmem:[%s6555_s1 + $0xa0] sm:$0xff]  ;;  %4158 = vmatpush.msra.mxu2 %v4782_v25  ;;  %v4827_v34 = vld [vmem:[%s6555_s1 + $0x1d8] sm:$0xff]  ;;  %v337_v37 = vld [vmem:[%s6555_s1 + $0x10] sm:$0xff]  ;;  %p4561_p1 = scmp.lt.s32.totalorder %s4559_s15, %s4555_s11 }
  0x1f   : > { %569 = vmatpush.msra.mxu1 %v361_v11  ;;  %4176 = vmatpush.msra.mxu3 %v4787_v26  ;;  %v338_v35 = vld [vmem:[%s6555_s1 + $0x18] sm:$0xff]  ;;  %v353_v38 = vld [vmem:[%s6555_s1 + $0x90] sm:$0xff]  ;;  %v4849_v39 = vld [vmem:[%s6555_s1 + $0x148] sm:$0xff]  ;;  %p4557_p12 = pnand %p4556_p11, %p4676_p5 }
  0x20   : > { %505 = vmatpush.msra.mxu0 %v344_v12  ;;  %v354_v36 = vld [vmem:[%s6555_s1 + $0x98] sm:$0xff]  ;;  %4159 = vmatpush.msra.mxu2 %v4804_v29  ;;  %v4854_v40 = vld [vmem:[%s6555_s1 + $0x1d0] sm:$0xff]  ;;  %v4859_v41 = vld [vmem:[%s6555_s1 + $0x140] sm:$0xff]  ;;  %p4562_p2 = por %p4561_p1, %p4560_p0 }
  0x21   : > { %570 = vmatpush.msra.mxu1 %v360_v13  ;;  %4178 = vmatpush.msra.mxu3 %v4809_v30  ;;  %v4864_v42 = vld [vmem:[%s6555_s1 + $0x1c8] sm:$0xff]  ;;  %v4882_v45 = vld [vmem:[%s6555_s1 + $0x138] sm:$0xff]  ;;  %v4887_v46 = vld [vmem:[%s6555_s1 + $0x1c0] sm:$0xff]  ;;  %p4558_p13 = pneg %p4557_p12 }
  0x22   : > { %506 = vmatpush.msra.mxu0 %v343_v14  ;;  %4160 = vmatpush.msra.mxu2 %v4822_v33  ;;  %v336_v43 = vld [vmem:[%s6555_s1 + $0x8] sm:$0xff]  ;;  %v335_v47 = vld [vmem:[%s6555_s1] sm:$0xff]  ;;  %v4904_v51 = vld [vmem:[%s6555_s1 + $0x130] sm:$0xff] }
  0x23   : > { %571 = vmatpush.msra.mxu1 %v359_v16  ;;  %4180 = vmatpush.msra.mxu3 %v4827_v34  ;;  %v352_v44 = vld [vmem:[%s6555_s1 + $0x88] sm:$0xff]  ;;  %v351_v48 = vld [vmem:[%s6555_s1 + $0x80] sm:$0xff]  ;;  %v4909_v52 = vld [vmem:[%s6555_s1 + $0x1b8] sm:$0xff]  ;;  %p4563_p3 = pnand %p4562_p2, %p4558_p13 }
  0x24   : > { %507 = vmatpush.msra.mxu0 %v342_v19  ;;  %4161 = vmatpush.msra.mxu2 %v4849_v39  ;;  %v255_v49 = vld [vmem:[%s4875_s18] sm:$0xff]  ;;  %v256_v50 = vld [vmem:[%s4875_s18 + $0x8] sm:$0xff]  ;;  %v4921_v54 = vld [vmem:[%s6555_s1 + $0x1b0] sm:$0xff] }
  0x25   : > { %572 = vmatpush.msra.mxu1 %v358_v20  ;;  %4182 = vmatpush.msra.mxu3 %v4854_v40  ;;  %v4914_v53 = vld [vmem:[%s6555_s1 + $0x128] sm:$0xff]  ;;  %v371_v55 = vld [vmem:[%s6555_s1 + $0x120] sm:$0xff]  ;;  %v370_v57 = vld [vmem:[%s6555_s1 + $0x118] sm:$0xff] }
  0x26   : > { %508 = vmatpush.msra.mxu0 %v341_v21  ;;  %4162 = vmatpush.msra.mxu2 %v4859_v41  ;;  %v4933_v56 = vld [vmem:[%s6555_s1 + $0x1a8] sm:$0xff]  ;;  %v261_v59 = vld [vmem:[%s4875_s18 + $0x30] sm:$0xff]  ;;  %v4947_v60 = vld [vmem:[%s6555_s1 + $0x1a0] sm:$0xff] }
  0x27   : > { %573 = vmatpush.msra.mxu1 %v357_v22  ;;  %4184 = vmatpush.msra.mxu3 %v4864_v42  ;;  %v260_v58 = vld [vmem:[%s4875_s18 + $0x28] sm:$0xff]  ;;  %v369_v61 = vld [vmem:[%s6555_s1 + $0x110] sm:$0xff]  ;;  %v4957_v62 = vld [vmem:[%s6555_s1 + $0x198] sm:$0xff] }
  0x28   : > { %509 = vmatpush.msra.mxu0 %v340_v27  ;;  %4163 = vmatpush.msra.mxu2 %v4882_v45  ;;  %v368_v63 = vld [vmem:[%s6555_s1 + $0x108] sm:$0xff]  ;;  %v4967_v0 = vld [vmem:[%s6555_s1 + $0x190] sm:$0xff]  ;;  %v367_v1 = vld [vmem:[%s6555_s1 + $0x100] sm:$0xff] }
  0x29   : > { %574 = vmatpush.msra.mxu1 %v356_v28  ;;  %4186 = vmatpush.msra.mxu3 %v4887_v46  ;;  %v4978_v2 = vld [vmem:[%s6555_s1 + $0x188] sm:$0xff]  ;;  %v287_v3 = vld [vmem:[%s4875_s18 + $0x100] sm:$0xff]  ;;  %v265_v4 = vld [vmem:[%s4875_s18 + $0x50] sm:$0xff] }
  0x2a   : > { %510 = vmatpush.msra.mxu0 %v339_v31  ;;  %4164 = vmatpush.msra.mxu2 %v4904_v51  ;;  %v266_v5 = vld [vmem:[%s4875_s18 + $0x58] sm:$0xff]  ;;  %v4989_v6 = vld [vmem:[%s6555_s1 + $0x180] sm:$0xff]  ;;  %v288_v7 = vld [vmem:[%s4875_s18 + $0x108] sm:$0xff] }
  0x2b   : > { %575 = vmatpush.msra.mxu1 %v355_v32  ;;  %4188 = vmatpush.msra.mxu3 %v4909_v52  ;;  %v292_v8 = vld [vmem:[%s4875_s18 + $0x128] sm:$0xff]  ;;  %v270_v9 = vld [vmem:[%s4875_s18 + $0x78] sm:$0xff]  ;;  %v271_v10 = vld [vmem:[%s4875_s18 + $0x80] sm:$0xff] }
  0x2c   : > { %511 = vmatpush.msra.mxu0 %v338_v35  ;;  %4165 = vmatpush.msra.mxu2 %v4914_v53  ;;  %v293_v11 = vld [vmem:[%s4875_s18 + $0x130] sm:$0xff]  ;;  %v275_v13 = vld [vmem:[%s4875_s18 + $0xa0] sm:$0xff]  ;;  %v276_v14 = vld [vmem:[%s4875_s18 + $0xa8] sm:$0xff] }
  0x2d   : > { %576 = vmatpush.msra.mxu1 %v354_v36  ;;  %4190 = vmatpush.msra.mxu3 %v4921_v54  ;;  %v297_v12 = vld [vmem:[%s4875_s18 + $0x150] sm:$0xff]  ;;  %v302_v16 = vld [vmem:[%s4875_s18 + $0x178] sm:$0xff]  ;;  %v303_v20 = vld [vmem:[%s4875_s18 + $0x180] sm:$0xff] }
  0x2e   : > { %512 = vmatpush.msra.mxu0 %v337_v37  ;;  %4166 = vmatpush.msra.mxu2 %v371_v55  ;;  %v281_v19 = vld [vmem:[%s4875_s18 + $0xd0] sm:$0xff]  ;;  %v286_v22 = vld [vmem:[%s4875_s18 + $0xf8] sm:$0xff]  ;;  %v323_v35 = vld [vmem:[%s4875_s18 + $0x220] sm:$0xff] }
  0x2f   : > { %577 = vmatpush.msra.mxu1 %v353_v38  ;;  %4192 = vmatpush.msra.mxu3 %v4933_v56  ;;  %v285_v21 = vld [vmem:[%s4875_s18 + $0xf0] sm:$0xff]  ;;  %v318_v31 = vld [vmem:[%s4875_s18 + $0x1f8] sm:$0xff]  ;;  %v327_v36 = vld [vmem:[%s4875_s18 + $0x240] sm:$0xff] }
  0x30   : > { %513 = vmatpush.msra.mxu0 %v336_v43  ;;  %4167 = vmatpush.msra.mxu2 %v370_v57  ;;  %v313_v27 = vld [vmem:[%s4875_s18 + $0x1d0] sm:$0xff]  ;;  %v322_v32 = vld [vmem:[%s4875_s18 + $0x218] sm:$0xff] }
  0x31   : > { %578 = vmatpush.msra.mxu1 %v352_v44  ;;  %4194 = vmatpush.msra.mxu3 %v4947_v60  ;;  %v317_v28 = vld [vmem:[%s4875_s18 + $0x1f0] sm:$0xff]  ;;  %v306_v38 = vld [vmem:[%s4875_s18 + $0x198] sm:$0xff]  ;;  %v315_v44 = vld [vmem:[%s4875_s18 + $0x1e0] sm:$0xff] }
  0x32   : > { %514 = vmatpush.msra.mxu0 %v335_v47  ;;  %4168 = vmatpush.msra.mxu2 %v369_v61  ;;  %v305_v37 = vld [vmem:[%s4875_s18 + $0x190] sm:$0xff] }
  0x33   : > { %579 = vmatpush.msra.mxu1 %v351_v48  ;;  %515 = vmatmul.f32.vlgmr.msra.gmra.mxu0 %v255_v49  ;;  %v333_v43 = vld [vmem:[%s4875_s18 + $0x270] sm:$0xff]  ;;  %v326_v49 = vld [vmem:[%s4875_s18 + $0x238] sm:$0xff] }
  0x34   : > { %580 = vmatmul.f32.vlgmr.msra.gmra.mxu1 %v256_v50  ;;  %629 = vmatpush.msrb.mxu0 %v4735_v15  ;;  %v298_v15 = vld [vmem:[%s4875_s18 + $0x158] sm:$0xff]  ;;  %v321_v47 = vld [vmem:[%s4875_s18 + $0x210] sm:$0xff] }
  0x35   : > { %4171 = vmatpush.msrb.mxu1 %v4749_v18  ;;  %4196 = vmatpush.msra.mxu3 %v4957_v62  ;;  %v325_v48 = vld [vmem:[%s4875_s18 + $0x230] sm:$0xff]  ;;  %v330_v50 = vld [vmem:[%s4875_s18 + $0x258] sm:$0xff] }
  0x36   : > { %630 = vmatpush.msrb.mxu0 %v4743_v17  ;;  %4169 = vmatpush.msra.mxu2 %v368_v63  ;;  %v280_v17 = vld [vmem:[%s4875_s18 + $0xc8] sm:$0xff] }
  0x37   : > { %4173 = vmatpush.msrb.mxu1 %v4777_v24  ;;  %4198 = vmatpush.msra.mxu3 %v4967_v0 }
  0x38   : > { %631 = vmatpush.msrb.mxu0 %v4772_v23  ;;  %4170 = vmatpush.msra.mxu2 %v367_v1  ;;  %v308_v23 = vld [vmem:[%s4875_s18 + $0x1a8] sm:$0xff] }
  0x39   : > { %4175 = vmatpush.msrb.mxu1 %v4787_v26  ;;  %4200 = vmatpush.msra.mxu3 %v4978_v2 }
  0x3a   : > { %632 = vmatpush.msrb.mxu0 %v4782_v25  ;;  %663 = vmatmul.f32.vlgmr.msra.gmra.mxu2 %v287_v3  ;;  %v290_v25 = vld [vmem:[%s4875_s18 + $0x118] sm:$0xff] }
  0x3b   : > { %518 = vmatmul.f32.gmra.mxu0 %v260_v58  ;;  %4177 = vmatpush.msrb.mxu1 %v4809_v30  ;;  %v409_v58 = vld [vmem:[%s6555_s1 + $0x250] sm:$0xff] }
  0x3c   : > { %583 = vmatmul.f32.gmra.mxu1 %v261_v59  ;;  %633 = vmatpush.msrb.mxu0 %v4804_v29  ;;  %v295_v29 = vld [vmem:[%s4875_s18 + $0x140] sm:$0xff]  ;;  %v408_v59 = vld [vmem:[%s6555_s1 + $0x248] sm:$0xff] }
  0x3d   : > { %4179 = vmatpush.msrb.mxu1 %v4827_v34  ;;  %4202 = vmatpush.msra.mxu3 %v4989_v6 }
  0x3e   : > { %634 = vmatpush.msrb.mxu0 %v4822_v33  ;;  %728 = vmatmul.f32.vlgmr.msra.gmra.mxu3 %v288_v7  ;;  %v300_v33 = vld [vmem:[%s4875_s18 + $0x168] sm:$0xff]  ;;  %v402_v7 = vld [vmem:[%s6555_s1 + $0x218] sm:$0xff] }
  0x3f   : > { %4181 = vmatpush.msrb.mxu1 %v4854_v40 }
  0x40   : > { %635 = vmatpush.msrb.mxu0 %v4849_v39  ;;  %v328_v39 = vld [vmem:[%s4875_s18 + $0x248] sm:$0xff] }
  0x41   : > { %4183 = vmatpush.msrb.mxu1 %v4864_v42 }
  0x42   : > { %636 = vmatpush.msrb.mxu0 %v4859_v41  ;;  %666 = vmatmul.f32.gmra.mxu2 %v292_v8  ;;  %v310_v41 = vld [vmem:[%s4875_s18 + $0x1b8] sm:$0xff]  ;;  %v401_v8 = vld [vmem:[%s6555_s1 + $0x210] sm:$0xff] }
  0x43   : > { %521 = vmatmul.f32.gmra.mxu0 %v265_v4  ;;  %4185 = vmatpush.msrb.mxu1 %v4887_v46  ;;  %v272_v4 = vld [vmem:[%s4875_s18 + $0x88] sm:$0xff] }
  0x44   : > { %586 = vmatmul.f32.gmra.mxu1 %v266_v5  ;;  %637 = vmatpush.msrb.mxu0 %v4882_v45  ;;  %v316_v45 = vld [vmem:[%s4875_s18 + $0x1e8] sm:$0xff]  ;;  %v283_v5 = vld [vmem:[%s4875_s18 + $0xe0] sm:$0xff] }
  0x45   : > { %4187 = vmatpush.msrb.mxu1 %v4909_v52 }
  0x46   : > { %638 = vmatpush.msrb.mxu0 %v4904_v51  ;;  %731 = vmatmul.f32.gmra.mxu3 %v293_v11  ;;  %v331_v51 = vld [vmem:[%s4875_s18 + $0x260] sm:$0xff]  ;;  %v277_v11 = vld [vmem:[%s4875_s18 + $0xb0] sm:$0xff] }
  0x47   : > { %4189 = vmatpush.msrb.mxu1 %v4921_v54 }
  0x48   : > { %639 = vmatpush.msrb.mxu0 %v4914_v53  ;;  %v257_v53 = vld [vmem:[%s4875_s18 + $0x10] sm:$0xff] }
  0x49   : > { %4191 = vmatpush.msrb.mxu1 %v4933_v56 }
  0x4a   : > { %640 = vmatpush.msrb.mxu0 %v371_v55  ;;  %669 = vmatmul.f32.gmra.mxu2 %v297_v12  ;;  %v399_v12 = vld [vmem:[%s6555_s1 + $0x200] sm:$0xff] }
  0x4b   : > { %524 = vmatmul.f32.gmra.mxu0 %v270_v9  ;;  %4193 = vmatpush.msrb.mxu1 %v4947_v60  ;;  %v400_v9 = vld [vmem:[%s6555_s1 + $0x208] sm:$0xff] }
  0x4c   : > { %589 = vmatmul.f32.gmra.mxu1 %v271_v10  ;;  %641 = vmatpush.msrb.mxu0 %v370_v57  ;;  %v273_v57 = vld [vmem:[%s4875_s18 + $0x90] sm:$0xff] }
  0x4d   : > { %4195 = vmatpush.msrb.mxu1 %v4957_v62 }
  0x4e   : > { %642 = vmatpush.msrb.mxu0 %v369_v61  ;;  %734 = vmatmul.f32.gmra.mxu3 %v298_v15  ;;  %v267_v61 = vld [vmem:[%s4875_s18 + $0x60] sm:$0xff] }
  0x4f   : > { %4197 = vmatpush.msrb.mxu1 %v4967_v0 }
  0x50   : > { %643 = vmatpush.msrb.mxu0 %v368_v63  ;;  %v407_v63 = vld [vmem:[%s6555_s1 + $0x240] sm:$0xff] }
  0x51   : > { %4199 = vmatpush.msrb.mxu1 %v4978_v2 }
  0x52   : > { %644 = vmatpush.msrb.mxu0 %v367_v1  ;;  %672 = vmatmul.f32.gmra.mxu2 %v302_v16  ;;  %v405_v1 = vld [vmem:[%s6555_s1 + $0x230] sm:$0xff]  ;;  %v258_v16 = vld [vmem:[%s4875_s18 + $0x18] sm:$0xff] }
  0x53   : > { %527 = vmatmul.f32.gmra.mxu0 %v275_v13  ;;  %4201 = vmatpush.msrb.mxu1 %v4989_v6 }
  0x54   : > { %592 = vmatmul.f32.gmra.mxu1 %v276_v14  ;;  %694 = vmatpush.msra.mxu0 %v4749_v18  ;;  %v307_v18 = vld [vmem:[%s4875_s18 + $0x1a0] sm:$0xff]  ;;  %v282_v14 = vld [vmem:[%s4875_s18 + $0xd8] sm:$0xff] }
  0x56   : > { %695 = vmatpush.msra.mxu0 %v4777_v24  ;;  %737 = vmatmul.f32.gmra.mxu3 %v303_v20  ;;  %v312_v24 = vld [vmem:[%s4875_s18 + $0x1c8] sm:$0xff] }
  0x58   : > { %696 = vmatpush.msra.mxu0 %v4787_v26  ;;  %v291_v26 = vld [vmem:[%s4875_s18 + $0x120] sm:$0xff] }
  0x5a   : > { %697 = vmatpush.msra.mxu0 %v4809_v30  ;;  %675 = vmatmul.f32.gmra.mxu2 %v307_v18  ;;  %v296_v30 = vld [vmem:[%s4875_s18 + $0x148] sm:$0xff]  ;;  %v259_v18 = vld [vmem:[%s4875_s18 + $0x20] sm:$0xff] }
  0x5b   : > { %530 = vmatmul.f32.gmra.mxu0 %v280_v17 }
  0x5c   : > { %595 = vmatmul.f32.gmra.mxu1 %v281_v19  ;;  %698 = vmatpush.msra.mxu0 %v4827_v34  ;;  %v301_v34 = vld [vmem:[%s4875_s18 + $0x170] sm:$0xff]  ;;  %v263_v19 = vld [vmem:[%s4875_s18 + $0x40] sm:$0xff] }
  0x5e   : > { %699 = vmatpush.msra.mxu0 %v4854_v40  ;;  %740 = vmatmul.f32.gmra.mxu3 %v308_v23  ;;  %v332_v40 = vld [vmem:[%s4875_s18 + $0x268] sm:$0xff] }
  0x60   : > { %700 = vmatpush.msra.mxu0 %v4864_v42  ;;  %v311_v42 = vld [vmem:[%s4875_s18 + $0x1c0] sm:$0xff] }
  0x62   : > { %701 = vmatpush.msra.mxu0 %v4887_v46  ;;  %678 = vmatmul.f32.gmra.mxu2 %v312_v24  ;;  %v320_v46 = vld [vmem:[%s4875_s18 + $0x208] sm:$0xff]  ;;  %v269_v24 = vld [vmem:[%s4875_s18 + $0x70] sm:$0xff] }
  0x63   : > { %533 = vmatmul.f32.gmra.mxu0 %v285_v21 }
  0x64   : > { %598 = vmatmul.f32.gmra.mxu1 %v286_v22  ;;  %702 = vmatpush.msra.mxu0 %v4909_v52  ;;  %v264_v22 = vld [vmem:[%s4875_s18 + $0x48] sm:$0xff] }
  0x66   : > { %703 = vmatpush.msra.mxu0 %v4921_v54  ;;  %743 = vmatmul.f32.gmra.mxu3 %v313_v27  ;;  %v268_v54 = vld [vmem:[%s4875_s18 + $0x68] sm:$0xff] }
  0x68   : > { %704 = vmatpush.msra.mxu0 %v4933_v56  ;;  %v262_v56 = vld [vmem:[%s4875_s18 + $0x38] sm:$0xff] }
  0x6a   : > { %705 = vmatpush.msra.mxu0 %v4947_v60  ;;  %681 = vmatmul.f32.gmra.mxu2 %v317_v28 }
  0x6b   : > { %536 = vmatmul.f32.gmra.mxu0 %v290_v25 }
  0x6c   : > { %601 = vmatmul.f32.gmra.mxu1 %v291_v26  ;;  %706 = vmatpush.msra.mxu0 %v4957_v62  ;;  %v278_v62 = vld [vmem:[%s4875_s18 + $0xb8] sm:$0xff] }
  0x6d   : > { %v274_v26 = vld [vmem:[%s4875_s18 + $0x98] sm:$0xff] }
  0x6e   : > { %707 = vmatpush.msra.mxu0 %v4967_v0  ;;  %746 = vmatmul.f32.gmra.mxu3 %v318_v31  ;;  %v406_v0 = vld [vmem:[%s6555_s1 + $0x238] sm:$0xff] }
  0x70   : > { %708 = vmatpush.msra.mxu0 %v4978_v2  ;;  %v404_v2 = vld [vmem:[%s6555_s1 + $0x228] sm:$0xff] }
  0x72   : > { %709 = vmatpush.msra.mxu0 %v4989_v6  ;;  %684 = vmatmul.f32.gmra.mxu2 %v322_v32  ;;  %v403_v6 = vld [vmem:[%s6555_s1 + $0x220] sm:$0xff]  ;;  %v284_v32 = vld [vmem:[%s4875_s18 + $0xe8] sm:$0xff] }
  0x73   : > { %539 = vmatmul.f32.gmra.mxu0 %v295_v29  ;;  %v279_v29 = vld [vmem:[%s4875_s18 + $0xc0] sm:$0xff] }
  0x74   : > { %604 = vmatmul.f32.gmra.mxu1 %v296_v30 }
  0x76   : > { %749 = vmatmul.f32.gmra.mxu3 %v323_v35 }
  0x7a   : > { %687 = vmatmul.f32.gmra.mxu2 %v327_v36 }
  0x7b   : > { %542 = vmatmul.f32.gmra.mxu0 %v300_v33 }
  0x7c   : > { %607 = vmatmul.f32.gmra.mxu1 %v301_v34  ;;  %v289_v34 = vld [vmem:[%s4875_s18 + $0x110] sm:$0xff] }
  0x7e   : > { %752 = vmatmul.f32.gmra.mxu3 %v328_v39 }
  0x82   : > { %690 = vmatmul.f32.gmra.mxu2 %v332_v40  ;;  %v299_v40 = vld [vmem:[%s4875_s18 + $0x160] sm:$0xff] }
  0x83   : > { %545 = vmatmul.f32.gmra.mxu0 %v305_v37  ;;  %v294_v37 = vld [vmem:[%s4875_s18 + $0x138] sm:$0xff] }
  0x84   : > { %610 = vmatmul.f32.gmra.mxu1 %v306_v38 }
  0x86   : > { %755 = vmatmul.f32.gmra.mxu3 %v333_v43  ;;  %v304_v43 = vld [vmem:[%s4875_s18 + $0x188] sm:$0xff] }
  0x8b   : > { %548 = vmatmul.f32.gmra.mxu0 %v310_v41 }
  0x8c   : > { %613 = vmatmul.f32.gmra.mxu1 %v311_v42 }
  0x93   : > { %551 = vmatmul.f32.gmra.mxu0 %v315_v44 }
  0x94   : > { %616 = vmatmul.f32.gmra.mxu1 %v316_v45 }
  0x9b   : > { %554 = vmatmul.f32.gmra.mxu0 %v320_v46  ;;  %v309_v46 = vld [vmem:[%s4875_s18 + $0x1b0] sm:$0xff] }
  0x9c   : > { %619 = vmatmul.f32.gmra.mxu1 %v321_v47 }
  0xa3   : > { %557 = vmatmul.f32.gmra.mxu0 %v325_v48  ;;  %v314_v48 = vld [vmem:[%s4875_s18 + $0x1d8] sm:$0xff] }
  0xa4   : > { %622 = vmatmul.f32.gmra.mxu1 %v326_v49 }
  0xab   : > { %560 = vmatmul.f32.gmra.mxu0 %v330_v50 }
  0xac   : > { %625 = vmatmul.f32.gmra.mxu1 %v331_v51  ;;  %v319_v51 = vld [vmem:[%s4875_s18 + $0x200] sm:$0xff] }
  0xb0   : > { %v5069_v52 = vpop.f32.mrf.mxu0 }
  0xb1   : > { %v5146_v27 = vpop.f32.mrf.mxu1 }
  0xb3   : > { %645 = vmatmul.f32.vlgmr.msrb.gmra.mxu0 %v257_v53 }
  0xb4   : > { %716 = vmatmul.f32.vlgmr.msrb.gmra.mxu1 %v268_v54  ;;  %764 = vmatpush.msrb.mxu0 %v409_v58 }
  0xb6   : > { %765 = vmatpush.msrb.mxu0 %v408_v59  ;;  %v329_v59 = vld [vmem:[%s4875_s18 + $0x250] sm:$0xff] }
  0xb8   : > { %v5073_v55 = vpop.f32.mrf.mxu0  ;;  %766 = vmatpush.msrb.mxu0 %v407_v63  ;;  %v334_v63 = vld [vmem:[%s4875_s18 + $0x278] sm:$0xff] }
  0xb9   : > { %v5152_v30 = vpop.f32.mrf.mxu1 }
  0xba   : > { %767 = vmatpush.msrb.mxu0 %v406_v0 }
  0xbb   : > { %648 = vmatmul.f32.gmra.mxu0 %v262_v56  ;;  %v324_v56 = vld [vmem:[%s4875_s18 + $0x228] sm:$0xff]  ;;  %s3905_s18 = sshll.u32 %s247_s25, 4  ;;  %s3906_s18 = int_to_ptr.vmem [resolvable:$true] %s3905_s18 }
  0xbc   : > { %719 = vmatmul.f32.gmra.mxu1 %v273_v57  ;;  %768 = vmatpush.msrb.mxu0 %v405_v1 }
  0xbe   : > { %769 = vmatpush.msrb.mxu0 %v404_v2 }
  0xc0   : > { %v5083_v60 = vpop.f32.mrf.mxu0  ;;  %770 = vmatpush.msrb.mxu0 %v403_v6 }
  0xc1   : > { %v5161_v35 = vpop.f32.mrf.mxu1 }
  0xc2   : > { %771 = vmatpush.msrb.mxu0 %v402_v7  ;;  %v664_v7 = vpop.f32.mrf.mxu2 }
  0xc3   : > { %651 = vmatmul.f32.gmra.mxu0 %v267_v61 }
  0xc4   : > { %722 = vmatmul.f32.gmra.mxu1 %v278_v62  ;;  %772 = vmatpush.msrb.mxu0 %v401_v8 }
  0xc6   : > { %773 = vmatpush.msrb.mxu0 %v400_v9  ;;  %v5216_v9 = vpop.f32.mrf.mxu3 }
  0xc8   : > { %v5099_v3 = vpop.f32.mrf.mxu0  ;;  %774 = vmatpush.msrb.mxu0 %v399_v12 }
  0xc9   : > { %v5167_v38 = vpop.f32.mrf.mxu1 }
  0xca   : > { %v667_v12 = vpop.f32.mrf.mxu2 }
  0xcb   : > { %654 = vmatmul.f32.gmra.mxu0 %v272_v4 }
  0xcc   : > { %725 = vmatmul.f32.gmra.mxu1 %v283_v5 }
  0xd0   : > { %v5115_v10 = vpop.f32.mrf.mxu0 }
  0xd1   : > { %v5174_v41 = vpop.f32.mrf.mxu1 }
  0xd3   : > { %657 = vmatmul.f32.gmra.mxu0 %v277_v11 }
  0xd8   : > { %v5121_v13 = vpop.f32.mrf.mxu0 }
  0xd9   : > { %v5180_v44 = vpop.f32.mrf.mxu1 }
  0xdb   : > { %660 = vmatmul.f32.gmra.mxu0 %v282_v14 }
  0xe0   : > { %v5124_v15 = vpop.f32.mrf.mxu0 }
  0xe1   : > { %v599_v49 = vpop.f32.mrf.mxu1 }
  0xe3   : > { %710 = vmatmul.f32.vlgmr.msra.gmra.mxu0 %v258_v16  ;;  %v5222_v16 = vpop.f32.mrf.mxu3 }
  0xe8   : > { %v5127_v17 = vpop.f32.mrf.mxu0 }
  0xe9   : > { %v602_v53 = vpop.f32.mrf.mxu1 }
  0xeb   : > { %713 = vmatmul.f32.gmra.mxu0 %v263_v19 }
  0xf0   : > { %v5130_v20 = vpop.f32.mrf.mxu0 }
  0xf1   : > { %v605_v57 = vpop.f32.mrf.mxu1 }
  0xf3   : > { %3974 = vmatmul.msk.f32.vlgmr.msrb.gmra.mxu0 %vm450_vm0, %v259_v18 }
  0xf8   : > { %v5134_v21 = vpop.f32.mrf.mxu0 }
  0xf9   : > { %v608_v61 = vpop.f32.mrf.mxu1 }
  0xfb   : > { %3975 = vmatmul.msk.f32.gmra.mxu0 %vm450_vm0, %v264_v22  ;;  %v670_v22 = vpop.f32.mrf.mxu2 }
 0x100   : > { %v5138_v23 = vpop.f32.mrf.mxu0 }
 0x101   : > { %v611_v1 = vpop.f32.mrf.mxu1 }
 0x103   : > { %3976 = vmatmul.msk.f32.gmra.mxu0 %vm450_vm0, %v269_v24  ;;  %v735_v24 = vpop.f32.mrf.mxu3 }
 0x108   : > { %v5142_v25 = vpop.f32.mrf.mxu0 }
 0x109   : > { %v614_v4 = vpop.f32.mrf.mxu1 }
 0x10b   : > { %3977 = vmatmul.msk.f32.gmra.mxu0 %vm450_vm0, %v274_v26 }
 0x110   : > { %v5148_v28 = vpop.f32.mrf.mxu0 }
 0x111   : > { %v5212_v6 = vpop.f32.mrf.mxu1 }
 0x113   : > { %3978 = vmatmul.msk.f32.gmra.mxu0 %vm450_vm0, %v279_v29 }
 0x118   : > { %v5154_v31 = vpop.f32.mrf.mxu0 }
 0x119   : > { %v5218_v11 = vpop.f32.mrf.mxu1 }
 0x11b   : > { %3979 = vmatmul.msk.f32.gmra.mxu0 %vm450_vm0, %v284_v32  ;;  %v673_v32 = vpop.f32.mrf.mxu2 }
 0x120   : > { %v5158_v33 = vpop.f32.mrf.mxu0 }
 0x121   : > { %6571 = vst [vmem:[#allocation5_spill] sm:$0xff] %v5158_v33  ;;  %v5226_v18 = vpop.f32.mrf.mxu1  ;;  %v600_v33 = vadd.f32 %v599_v49, %v5124_v15  ;;  %v612_v15 = vadd.f32 %v611_v1, %v5138_v23  ;;  %v442_v49 = vld [vmem:[%s6558_s4 + $0x60] sm:$0xff] }
 0x122   : > { %6575 = vst [vmem:[#allocation9_spill] sm:$0xff] %v5226_v18 }
 0x123   : > { %3980 = vmatmul.msk.f32.gmra.mxu0 %vm450_vm0, %v289_v34  ;;  %v738_v34 = vpop.f32.mrf.mxu3 }
 0x128   : > { %v5164_v36 = vpop.f32.mrf.mxu0 }
 0x129   : > { %6572 = vst [vmem:[#allocation6_spill] sm:$0xff] %v5164_v36  ;;  %v5230_v29 = vpop.f32.mrf.mxu1 }
 0x12a   : > { %6577 = vst [vmem:[#allocation11_spill] sm:$0xff] %v5230_v29 }
 0x12b   : > { %3981 = vmatmul.msk.f32.gmra.mxu0 %vm450_vm0, %v294_v37 }
 0x130   : > { %v5170_v39 = vpop.f32.mrf.mxu0 }
 0x133   : > { %3982 = vmatmul.msk.f32.gmra.mxu0 %vm450_vm0, %v299_v40  ;;  %v5234_v40 = vpop.f32.mrf.mxu1 }
 0x138   : > { %v5176_v42 = vpop.f32.mrf.mxu0 }
 0x13b   : > { %3983 = vmatmul.msk.f32.gmra.mxu0 %vm450_vm0, %v304_v43  ;;  %v676_v43 = vpop.f32.mrf.mxu2 }
 0x140   : > { %v5182_v45 = vpop.f32.mrf.mxu0 }
 0x143   : > { %3984 = vmatmul.msk.f32.gmra.mxu0 %vm450_vm0, %v309_v46 }
 0x148   : > { %v5186_v47 = vpop.f32.mrf.mxu0 }
 0x14b   : > { %3985 = vmatmul.msk.f32.gmra.mxu0 %vm450_vm0, %v314_v48  ;;  %v741_v48 = vpop.f32.mrf.mxu3 }
 0x150   : > { %v5190_v50 = vpop.f32.mrf.mxu0 }
 0x153   : > { %3986 = vmatmul.msk.f32.gmra.mxu0 %vm450_vm0, %v319_v51  ;;  %v720_v51 = vpop.f32.mrf.mxu1  ;;  %v744_v29 = vpop.f32.mrf.mxu3 }
 0x158   : > { %v5194_v54 = vpop.f32.mrf.mxu0 }
 0x15b   : > { %3987 = vmatmul.msk.f32.gmra.mxu0 %vm450_vm0, %v324_v56  ;;  %v679_v56 = vpop.f32.mrf.mxu2  ;;  %v5245_v36 = vpop.f32.mrf.mxu1 }
 0x160   : > { %v5198_v58 = vpop.f32.mrf.mxu0 }
 0x163   : > { %3988 = vmatmul.msk.f32.gmra.mxu0 %vm450_vm0, %v329_v59 }
 0x168   : > { %v5202_v62 = vpop.f32.mrf.mxu0 }
 0x16b   : > { %3989 = vmatmul.msk.f32.gmra.mxu0 %vm450_vm0, %v334_v63  ;;  %v445_v63 = vld [vmem:[%s6558_s4 + $0x78] sm:$0x1f] }
 0x16c   : > { %3990 = vmatpush.msk.msra.mxu1 %vm6561_vm1, %v445_v63  ;;  %4043 = vmatpush.msk.msra.mxu0 %vm6561_vm1, %v445_v63  ;;  %v5258_v63 = vpop.f32.mrf.mxu2 }
 0x170   : > { %v5206_v0 = vpop.f32.mrf.mxu0 }
 0x171   : > { %6573 = vst [vmem:[#allocation7_spill] sm:$0xff] %v5206_v0  ;;  %v603_v0 = vadd.f32 %v602_v53, %v5127_v17  ;;  %v591_v17 = vadd.f32 %v5167_v38, %v5099_v3  ;;  %v441_v53 = vld [vmem:[%s6558_s4 + $0x58] sm:$0xff] }
 0x173   : > { %v668_v23 = vadd.f32 %v667_v12, %v603_v0  ;;  %v656_v3 = vadd.f32 %v5186_v47, %v591_v17  ;;  %v585_v0 = vadd.f32 %v5152_v30, %v5073_v55  ;;  %v726_v47 = vpop.f32.mrf.mxu1 }
 0x175   : > { %v650_v30 = vadd.f32 %v5176_v42, %v585_v0 }
 0x178   : > { %v5208_v2 = vpop.f32.mrf.mxu0 }
 0x180   : > { %v5210_v5 = vpop.f32.mrf.mxu0 }
 0x188   : > { %v5214_v8 = vpop.f32.mrf.mxu0 }
 0x190   : > { %v5220_v14 = vpop.f32.mrf.mxu0 }
 0x191   : > { %6574 = vst [vmem:[#allocation8_spill] sm:$0xff] %v5220_v14  ;;  %v615_v14 = vadd.f32 %v614_v4, %v5142_v25  ;;  %v588_v25 = vadd.f32 %v5161_v35, %v5083_v60  ;;  %v677_v4 = vadd.f32 %v676_v43, %v612_v15 }
 0x193   : > { %v680_v38 = vadd.f32 %v679_v56, %v615_v14  ;;  %v653_v35 = vadd.f32 %v5182_v45, %v588_v25  ;;  %v721_v45 = vadd.f32 %v720_v51, %v656_v3  ;;  %v434_v25 = vld [vmem:[%s6558_s4 + $0x20] sm:$0xff] }
 0x195   : > { %v745_v14 = vadd.f32 %v744_v29, %v680_v38  ;;  %v5305_v42 = vadd.f32 %v5214_v8, %v721_v45  ;;  %v437_v29 = vld [vmem:[%s6558_s4 + $0x38] sm:$0xff] }
 0x198   : > { %v5224_v19 = vpop.f32.mrf.mxu0 }
 0x1a0   : > { %v5228_v26 = vpop.f32.mrf.mxu0 }
 0x1a1   : > { %6576 = vst [vmem:[#allocation10_spill] sm:$0xff] %v5228_v26  ;;  %v443_v26 = vld [vmem:[%s6558_s4 + $0x68] sm:$0xff] }
 0x1a8   : > { %v5232_v37 = vpop.f32.mrf.mxu0 }
 0x1b0   : > { %v5236_v46 = vpop.f32.mrf.mxu0 }
 0x1b1   : > { %6578 = vst [vmem:[#allocation12_spill] sm:$0xff] %v5236_v46  ;;  %v444_v46 = vld [vmem:[%s6558_s4 + $0x70] sm:$0xff] }
 0x1b2   : > { %942 = vmatpush.msra.mxu1 %v444_v46  ;;  %1869 = vmatpush.msra.mxu0 %v444_v46  ;;  %v835_v46 = vsel %vm6563_vm2, %v5305_v42, 0.0 }
 0x1b4   : > { %943 = vmatpush.msra.mxu1 %v443_v26  ;;  %1870 = vmatpush.msra.mxu0 %v443_v26  ;;  %v715_v26 = vadd.f32 %v5202_v62, %v650_v30 }
 0x1b6   : > { %944 = vmatpush.msra.mxu1 %v442_v49  ;;  %1871 = vmatpush.msra.mxu0 %v442_v49  ;;  %v5318_v62 = vadd.f32 %v5208_v2, %v715_v26 }
 0x1b8   : > { %v5238_v59 = vpop.f32.mrf.mxu0  ;;  %945 = vmatpush.msra.mxu1 %v441_v53  ;;  %1872 = vmatpush.msra.mxu0 %v441_v53  ;;  %v6585_v49 = vld [vmem:[#allocation12_spill] sm:$0xff] }
 0x1b9   : > { %6579 = vst [vmem:[#allocation13_spill] sm:$0xff] %v5238_v59  ;;  %v606_v59 = vadd.f32 %v605_v57, %v5130_v20  ;;  %v665_v20 = vadd.f32 %v664_v7, %v600_v33  ;;  %v594_v33 = vadd.f32 %v5174_v41, %v5115_v10  ;;  %v440_v10 = vld [vmem:[%s6558_s4 + $0x50] sm:$0xff]  ;;  %v439_v41 = vld [vmem:[%s6558_s4 + $0x48] sm:$0xff] }
 0x1ba   : > { %946 = vmatpush.msra.mxu1 %v440_v10  ;;  %1873 = vmatpush.msra.mxu0 %v440_v10 }
 0x1bb   : > { %v671_v57 = vadd.f32 %v670_v22, %v606_v59  ;;  %v730_v60 = vadd.f32 %v5216_v9, %v665_v20  ;;  %v438_v9 = vld [vmem:[%s6558_s4 + $0x40] sm:$0xff]  ;;  %v685_v22 = vpop.f32.mrf.mxu2  ;;  %v435_v59 = vld [vmem:[%s6558_s4 + $0x28] sm:$0xff]  ;;  %v826_v20 = vsel %vm6563_vm2, %v5318_v62, 0.0 }
 0x1bc   : > { %947 = vmatpush.msra.mxu1 %v439_v41  ;;  %1874 = vmatpush.msra.mxu0 %v439_v41 }
 0x1bd   : > { %v736_v12 = vadd.f32 %v735_v24, %v671_v57  ;;  %v718_v24 = vadd.f32 %v5234_v40, %v653_v35 }
 0x1be   : > { %948 = vmatpush.msra.mxu1 %v438_v9  ;;  %1875 = vmatpush.msra.mxu0 %v438_v9 }
 0x1bf   : > { %v5321_v8 = vadd.f32 %v5210_v5, %v718_v24  ;;  %v6583_v5 = vld [vmem:[#allocation7_spill] sm:$0xff]  ;;  %v5352_v17 = vadd.f32 %v6585_v49, %v736_v12  ;;  %v5413_v49 = vld [vmem:[%s6557_s3 + $0x70] sm:$0xff] }
 0x1c0   : > { %v5247_v18 = vpop.f32.mrf.mxu0  ;;  %949 = vmatpush.msra.mxu1 %v437_v29  ;;  %1876 = vmatpush.msra.mxu0 %v437_v29 }
 0x1c1   : > { %6580 = vst [vmem:[#allocation14_spill] sm:$0xff] %v5247_v18  ;;  %v609_v18 = vadd.f32 %v608_v61, %v5134_v21  ;;  %v597_v21 = vadd.f32 %v5180_v44, %v5121_v13  ;;  %v5273_v61 = vpop.f32.mrf.mxu3  ;;  %v582_v44 = vadd.f32 %v5146_v27, %v5069_v52  ;;  %v659_v52 = vadd.f32 %v5190_v50, %v594_v33 }
 0x1c2   : > { %v742_v27 = vadd.f32 %v741_v48, %v677_v4  ;;  %v6584_v48 = vld [vmem:[#allocation10_spill] sm:$0xff]  ;;  %v834_v53 = vsel %vm6563_vm2, %v5321_v8, 0.0 }
 0x1c3   : > { %v674_v1 = vadd.f32 %v673_v32, %v609_v18  ;;  %v662_v7 = vadd.f32 %v5194_v54, %v597_v21  ;;  %v733_v54 = vadd.f32 %v5222_v16, %v668_v23  ;;  %v618_v18 = vadd.f32 %v5212_v6, %v5148_v28  ;;  %v688_v0 = vpop.f32.mrf.mxu2 }
 0x1c4   : > { %v647_v50 = vadd.f32 %v5170_v39, %v582_v44  ;;  %v621_v28 = vadd.f32 %v5218_v11, %v5154_v31  ;;  %v724_v6 = vadd.f32 %v5245_v36, %v659_v52  ;;  %v436_v31 = vld [vmem:[%s6558_s4 + $0x30] sm:$0xff]  ;;  %v5342_v51 = vadd.f32 %v6584_v48, %v730_v60  ;;  %v6590_v48 = vld [vmem:[#allocation11_spill] sm:$0xff] }
 0x1c5   : > { %v739_v55 = vadd.f32 %v738_v34, %v674_v1  ;;  %v727_v16 = vadd.f32 %v726_v47, %v662_v7  ;;  %v5324_v34 = vadd.f32 %v5232_v37, %v733_v54  ;;  %v683_v36 = vadd.f32 %v5258_v63, %v618_v18  ;;  %950 = vmatpush.msra.mxu1 %v436_v31  ;;  %v432_v54 = vld [vmem:[%s6558_s4 + $0x10] sm:$0xff] }
 0x1c6   : > { %v712_v39 = vadd.f32 %v5198_v58, %v647_v50  ;;  %v6582_v58 = vld [vmem:[#allocation13_spill] sm:$0xff]  ;;  %v686_v63 = vadd.f32 %v685_v22, %v621_v28  ;;  %1877 = vmatpush.msra.mxu0 %v436_v31  ;;  %v836_v4 = vadd.f32 %v835_v46, %v834_v53  ;;  %v861_v47 = vsel %vm6563_vm2, %v5352_v17, 0.0  ;;  %v430_v50 = vld [vmem:[%s6558_s4] sm:$0xff]  ;;  %v6589_v46 = vld [vmem:[#allocation6_spill] sm:$0xff] }
 0x1c7   : > { %v5314_v32 = vadd.f32 %v5224_v19, %v727_v16  ;;  %v6581_v19 = vld [vmem:[#allocation8_spill] sm:$0xff]  ;;  %v5334_v2 = vadd.f32 %v6582_v58, %v739_v55  ;;  %v853_v21 = vsel %vm6563_vm2, %v5324_v34, 0.0  ;;  %v748_v1 = vadd.f32 %v5273_v61, %v683_v36  ;;  %951 = vmatpush.msra.mxu1 %v435_v59  ;;  %v433_v61 = vld [vmem:[%s6558_s4 + $0x18] sm:$0xff]  ;;  %v6587_v31 = vld [vmem:[#allocation5_spill] sm:$0xff] }
 0x1c8   : > { %v809_v13 = vpop.f32.mrf.mxu0  ;;  %v5331_v40 = vadd.f32 %v6581_v19, %v724_v6  ;;  %v5337_v37 = vadd.f32 %v6583_v5, %v712_v39  ;;  %v6586_v23 = vld [vmem:[#allocation14_spill] sm:$0xff]  ;;  %1878 = vmatpush.msra.mxu0 %v435_v59  ;;  %v837_v55 = vrot.slane %v836_v4, 4  ;;  %v6588_v36 = vld [vmem:[#allocation9_spill] sm:$0xff]  ;;  %v627_v59 = vadd.f32 %v6590_v48, %v6589_v46 }
 0x1c9   : > { %v750_v11 = vpop.f32.mrf.mxu3  ;;  %v5344_v56 = vadd.f32 %v809_v13, %v745_v14  ;;  %v844_v15 = vsel %vm6563_vm2, %v5314_v32, 0.0  ;;  %v5361_v57 = vadd.f32 %v6586_v23, %v742_v27  ;;  %v862_v33 = vsel %vm6563_vm2, %v5334_v2, 0.0  ;;  %952 = vmatpush.msra.mxu1 %v434_v25  ;;  %v431_v14 = vld [vmem:[%s6558_s4 + $0x8] sm:$0xff] }
 0x1ca   : > { %v843_v3 = vsel %vm6563_vm2, %v5331_v40, 0.0  ;;  %v825_v38 = vsel %vm6563_vm2, %v5337_v37, 0.0  ;;  %v852_v13 = vsel %vm6563_vm2, %v5342_v51, 0.0  ;;  %1879 = vmatpush.msra.mxu0 %v434_v25  ;;  %v751_v10 = vadd.f32 %v750_v11, %v686_v63 }
 0x1cb   : > { %v845_v7 = vadd.f32 %v844_v15, %v843_v3  ;;  %v871_v44 = vsel %vm6563_vm2, %v5344_v56, 0.0  ;;  %v827_v60 = vadd.f32 %v826_v20, %v825_v38  ;;  %v854_v35 = vadd.f32 %v853_v21, %v852_v13  ;;  %953 = vmatpush.msra.mxu1 %v433_v61  ;;  %v5408_v15 = vld [vmem:[%s6557_s3 + $0x78] sm:$0x1f]  ;;  %v691_v20 = vpop.f32.mrf.mxu2  ;;  %v5420_v3 = vld [vmem:[%s6557_s3 + $0x68] sm:$0xff] }
 0x1cc   : > { %v863_v12 = vadd.f32 %v862_v33, %v861_v47  ;;  %v870_v52 = vsel %vm6563_vm2, %v5361_v57, 0.0  ;;  %1880 = vmatpush.msra.mxu0 %v433_v61  ;;  %v838_v28 = vadd.f32 %v837_v55, %v836_v4  ;;  %v624_v11 = vadd.f32 %v6588_v36, %v6587_v31  ;;  %3992 = vmatpush.msk.msrb.mxu2 %vm6561_vm1, %v5408_v15  ;;  %v5426_v61 = vld [vmem:[%s6557_s3 + $0x60] sm:$0xff] }
 0x1cd   : > { %v872_v30 = vadd.f32 %v871_v44, %v870_v52  ;;  %v846_v45 = vrot.slane %v845_v7, 4  ;;  %v828_v22 = vrot.slane %v827_v60, 4  ;;  %954 = vmatpush.msra.mxu1 %v432_v54  ;;  %v855_v16 = vrot.slane %v854_v35, 4 }
 0x1ce   : > { %1881 = vmatpush.msra.mxu0 %v432_v54  ;;  %v864_v24 = vrot.slane %v863_v12, 4  ;;  %v839_v21 = vrot.slane %v838_v28, 2  ;;  %v689_v25 = vadd.f32 %v688_v0, %v624_v11  ;;  %1185 = vmatpush.msrb.mxu2 %v5413_v49  ;;  %v5432_v54 = vld [vmem:[%s6557_s3 + $0x58] sm:$0xff] }
 0x1cf   : > { %955 = vmatpush.msra.mxu1 %v431_v14  ;;  %v873_v6 = vrot.slane %v872_v30, 4  ;;  %v847_v19 = vadd.f32 %v846_v45, %v845_v7  ;;  %v829_v58 = vadd.f32 %v828_v22, %v827_v60  ;;  %v692_v7 = vadd.f32 %v691_v20, %v627_v59  ;;  %v5440_v45 = vld [vmem:[%s6557_s3 + $0x50] sm:$0xff] }
 0x1d0   : > { %v812_v43 = vpop.f32.mrf.mxu0  ;;  %1882 = vmatpush.msra.mxu0 %v431_v14  ;;  %v865_v63 = vadd.f32 %v864_v24, %v863_v12  ;;  %v840_v0 = vadd.f32 %v839_v21, %v838_v28  ;;  %1186 = vmatpush.msrb.mxu2 %v5420_v3 }
 0x1d1   : > { %v5382_v41 = vadd.f32 %v812_v43, %v748_v1  ;;  %v753_v18 = vpop.f32.mrf.mxu3  ;;  %956 = vmatpush.msra.mxu1 %v430_v50  ;;  %v856_v43 = vadd.f32 %v855_v16, %v854_v35  ;;  %v874_v23 = vadd.f32 %v873_v6, %v872_v30  ;;  %v848_v1 = vrot.slane %v847_v19, 2 }
 0x1d2   : > { %1883 = vmatpush.msra.mxu0 %v430_v50  ;;  %v830_v33 = vrot.slane %v829_v58, 2  ;;  %v866_v13 = vrot.slane %v865_v63, 2  ;;  %v754_v35 = vadd.f32 %v753_v18, %v689_v25  ;;  %1187 = vmatpush.msrb.mxu2 %v5426_v61  ;;  %v841_v18 = vrot.slane %v840_v0, 1 }
 0x1d3   : > { %v879_v26 = vsel %vm6563_vm2, %v5382_v41, 0.0  ;;  %v857_v38 = vrot.slane %v856_v43, 2  ;;  %v875_v60 = vrot.slane %v874_v23, 2  ;;  %v849_v47 = vadd.f32 %v848_v1, %v847_v19 }
 0x1d4   : > { %v831_v12 = vadd.f32 %v830_v33, %v829_v58  ;;  %v867_v30 = vadd.f32 %v866_v13, %v865_v63  ;;  %1188 = vmatpush.msrb.mxu2 %v5432_v54  ;;  %v842_v36 = vadd.f32 %v841_v18, %v840_v0 }
 0x1d5   : > { %v858_v52 = vadd.f32 %v857_v38, %v856_v43  ;;  %v876_v22 = vadd.f32 %v875_v60, %v874_v23  ;;  %v850_v50 = vrot.slane %v849_v47, 1 }
 0x1d6   : > { %1189 = vmatpush.msrb.mxu2 %v5440_v45  ;;  %v868_v6 = vrot.slane %v867_v30, 1 }
 0x1d7   : > { %v859_v28 = vrot.slane %v858_v52, 1  ;;  %v877_v11 = vrot.slane %v876_v22, 1  ;;  %v851_v58 = vadd.f32 %v850_v50, %v849_v47 }
 0x1d8   : > { %v815_v27 = vpop.f32.mrf.mxu0  ;;  %v869_v59 = vadd.f32 %v868_v6, %v867_v30 }
 0x1d9   : > { %v5389_v9 = vadd.f32 %v815_v27, %v751_v10  ;;  %v756_v44 = vpop.f32.mrf.mxu3  ;;  %v860_v46 = vadd.f32 %v859_v28, %v858_v52  ;;  %v878_v63 = vadd.f32 %v877_v11, %v876_v22  ;;  %v5458_v23 = vmul.f32 0.2, %v851_v58  ;;  %v5516_v11 = vld [vmem:[%s6557_s3 + $0x28] sm:$0xff]  ;;  %v5528_v58 = vld [vmem:[%s6557_s3 + $0x18] sm:$0xff] }
 0x1da   : > { %v757_v55 = vadd.f32 %v756_v44, %v692_v7  ;;  %v5464_v33 = vmul.f32 0.2, %v869_v59  ;;  %v5546_v59 = vld [vmem:[%s6557_s3] sm:$0xff] }
 0x1db   : > { %v880_v29 = vsel %vm6563_vm2, %v5389_v9, 0.0  ;;  %v5466_v7 = vmul.f32 0.2, %v878_v63  ;;  %v907_v0 = vmul.f32 %v5458_v23, %v5458_v23 }
 0x1dc   : > { %v881_v39 = vadd.f32 %v880_v29, %v879_v26  ;;  %v5448_v26 = vld [vmem:[%s6557_s3 + $0x48] sm:$0xff]  ;;  %v832_v29 = vrot.slane %v831_v12, 1 }
 0x1dd   : > { %1190 = vmatpush.msrb.mxu2 %v5448_v26  ;;  %v910_v52 = vmul.f32 %v5466_v7, %v5466_v7 }
 0x1de   : > { %v882_v5 = vrot.slane %v881_v39, 4 }
 0x1e0   : > { %v818_v53 = vpop.f32.mrf.mxu0  ;;  %v883_v4 = vadd.f32 %v882_v5, %v881_v39  ;;  %v833_v5 = vadd.f32 %v832_v29, %v831_v12 }
 0x1e1   : > { %v5435_v27 = vadd.f32 %v818_v53, %v754_v35  ;;  %v5456_v53 = vmul.f32 0.2, %v842_v36  ;;  %v5510_v36 = vld [vmem:[%s6557_s3 + $0x30] sm:$0xff] }
 0x1e2   : > { %v884_v10 = vrot.slane %v883_v4, 2  ;;  %v5460_v1 = vmul.f32 0.2, %v833_v5 }
 0x1e3   : > { %v888_v39 = vsel %vm6563_vm2, %v5435_v27, 0.0  ;;  %v906_v13 = vmul.f32 %v5456_v53, %v5456_v53 }
 0x1e4   : > { %v885_v24 = vadd.f32 %v884_v10, %v883_v4  ;;  %v5462_v4 = vmul.f32 0.2, %v860_v46  ;;  %v905_v35 = vmul.f32 %v5460_v1, %v5460_v1  ;;  %v909_v10 = vmul.f32 %v5464_v33, %v5464_v33  ;;  %v5534_v46 = vld [vmem:[%s6557_s3 + $0x10] sm:$0xff] }
 0x1e6   : > { %v886_v43 = vrot.slane %v885_v24, 1  ;;  %v908_v47 = vmul.f32 %v5462_v4, %v5462_v4 }
 0x1e8   : > { %v821_v14 = vpop.f32.mrf.mxu0  ;;  %v887_v21 = vadd.f32 %v886_v43, %v885_v24 }
 0x1e9   : > { %v5443_v16 = vadd.f32 %v821_v14, %v757_v55  ;;  %v922_v55 = vsel %vm921_vm3, %v906_v13, %v905_v35 }
 0x1ea   : > { %v5470_v44 = vmul.f32 0.2, %v887_v21  ;;  %v924_v14 = vsel %vm923_vm4, %v907_v0, %v922_v55 }
 0x1eb   : > { %v889_v31 = vsel %vm6563_vm2, %v5443_v16, 0.0  ;;  %v926_v22 = vsel %vm6567_vm5, %v908_v47, %v924_v14 }
 0x1ec   : > { %v890_v19 = vadd.f32 %v889_v31, %v888_v39  ;;  %v911_v30 = vmul.f32 %v5470_v44, %v5470_v44  ;;  %v928_v50 = vsel %vm6566_vm6, %v909_v10, %v926_v22  ;;  %v5499_v39 = vld [vmem:[%s6557_s3 + $0x40] sm:$0xff]  ;;  %v5504_v31 = vld [vmem:[%s6557_s3 + $0x38] sm:$0xff] }
 0x1ed   : > { %v930_v29 = vsel %vm6565_vm7, %v910_v52, %v928_v50  ;;  %1191 = vmatpush.msrb.mxu2 %v5499_v39 }
 0x1ee   : > { %v891_v48 = vrot.slane %v890_v19, 4  ;;  %v932_v28 = vsel %vm6564_vm8, %v911_v30, %v930_v29 }
 0x1ef   : > { %1192 = vmatpush.msrb.mxu2 %v5504_v31 }
 0x1f0   : > { %v892_v20 = vadd.f32 %v891_v48, %v890_v19  ;;  %v5522_v19 = vld [vmem:[%s6557_s3 + $0x20] sm:$0xff]  ;;  %v5540_v48 = vld [vmem:[%s6557_s3 + $0x8] sm:$0xff] }
 0x1f1   : > { %1193 = vmatpush.msrb.mxu2 %v5510_v36 }
 0x1f2   : > { %v893_v25 = vrot.slane %v892_v20, 2 }
 0x1f3   : > { %1194 = vmatpush.msrb.mxu2 %v5516_v11 }
 0x1f4   : > { %v894_v38 = vadd.f32 %v893_v25, %v892_v20 }
 0x1f5   : > { %1195 = vmatpush.msrb.mxu2 %v5522_v19 }
 0x1f6   : > { %v895_v60 = vrot.slane %v894_v38, 1 }
 0x1f7   : > { %1196 = vmatpush.msrb.mxu2 %v5528_v58 }
 0x1f8   : > { %v896_v12 = vadd.f32 %v895_v60, %v894_v38 }
 0x1f9   : > { %1197 = vmatpush.msrb.mxu2 %v5534_v46 }
 0x1fa   : > { %v5486_v18 = vmul.f32 0.2, %v896_v12 }
 0x1fb   : > { %1198 = vmatpush.msrb.mxu2 %v5540_v48 }
 0x1fc   : > { %v912_v24 = vmul.f32 %v5486_v18, %v5486_v18 }
 0x1fd   : > { %1199 = vmatpush.msrb.mxu2 %v5546_v59 }
 0x1fe   : > { %v934_v6 = vsel %vm6562_vm9, %v912_v24, %v932_v28 }
 0x1ff   : > { %3991 = vmatmul.msk.f32.vlgmr.msra.gmra.mxu1 %vm6563_vm2, %v934_v6  ;;  %4045 = vmatpush.msk.msra.mxu2 %vm6561_vm1, %v5408_v15 }
 0x201   : > { %2109 = vmatpush.msra.mxu2 %v5413_v49 }
 0x203   : > { %2110 = vmatpush.msra.mxu2 %v5420_v3 }
 0x205   : > { %2111 = vmatpush.msra.mxu2 %v5426_v61 }
 0x207   : > { %2112 = vmatpush.msra.mxu2 %v5432_v54 }
 0x209   : > { %2113 = vmatpush.msra.mxu2 %v5440_v45 }
 0x20b   : > { %2114 = vmatpush.msra.mxu2 %v5448_v26 }
 0x20d   : > { %2115 = vmatpush.msra.mxu2 %v5499_v39 }
 0x20f   : > { %2116 = vmatpush.msra.mxu2 %v5504_v31 }
 0x211   : > { %2117 = vmatpush.msra.mxu2 %v5510_v36 }
 0x213   : > { %2118 = vmatpush.msra.mxu2 %v5516_v11 }
 0x215   : > { %2119 = vmatpush.msra.mxu2 %v5522_v19 }
 0x217   : > { %2120 = vmatpush.msra.mxu2 %v5528_v58 }
 0x219   : > { %2121 = vmatpush.msra.mxu2 %v5534_v46 }
 0x21b   : > { %2122 = vmatpush.msra.mxu2 %v5540_v48 }
 0x21d   : > { %2123 = vmatpush.msra.mxu2 %v5546_v59 }
 0x27c   : > { %v958_v43 = vpop.f32.mrf.mxu1 }
 0x27d   : > { %v959_v5 = vadd.f32 1e-07, %v958_v43 }
 0x27f   : > { %4243 = vrsqrt.f32 %v959_v5  ;;  %vm968_vm10 = vcmp.eq.f32.partialorder %v959_v5, inf  ;;  %v971_v60 = vand.u32 2147483648, %v959_v5  ;;  %vm970_vm11 = vcmp.eq.f32.partialorder %v959_v5, 0.0 }
 0x285   : > { %v4244_v63 = vpop.eup %4243 }
 0x286   : > { %v962_v20 = vmul.f32 %v4244_v63, %v959_v5 }
 0x288   : > { %v963_v21 = vmul.f32 %v4244_v63, %v962_v20 }
 0x28a   : > { %v964_v25 = vmul.f32 0.5, %v963_v21 }
 0x28c   : > { %v965_v38 = vsub.f32 1.5, %v964_v25 }
 0x28e   : > { %v966_v13 = vmul.f32 %v4244_v63, %v965_v38 }
 0x290   : > { %v967_v0 = vmul.f32 %v966_v13, %v959_v5 }
 0x292   : > { %v969_v35 = vsel %vm968_vm10, %v959_v5, %v967_v0 }
 0x293   : > { %v5558_v47 = vsel %vm970_vm11, %v971_v60, %v969_v35 }
 0x294   : > { %4245 = vrcp.f32 %v5558_v47  ;;  %v974_v10 = vrot.slane %v5558_v47, 1  ;;  %v1000_v14 = vand.u32 2147483648, %v5558_v47  ;;  %v975_v50 = vrot.slane %v5558_v47, 2 }
 0x295   : > { %v998_v29 = vand.u32 2147483647, %v5558_v47  ;;  %vm994_vm13 = vweird.f32 %v5558_v47 }
 0x296   : > { %4247 = vrcp.f32 %v974_v10  ;;  %v1001_v43 = vor.u32 1.1754944e-38, %v1000_v14  ;;  %v1015_v0 = vand.u32 2147483648, %v974_v10  ;;  %vm1009_vm10 = vweird.f32 %v974_v10 }
 0x297   : > { %4249 = vrcp.f32 %v975_v50  ;;  %vm999_vm15 = vcmp.eq.f32.partialorder %v998_v29, 8.507059e+37  ;;  %v1013_v35 = vand.u32 2147483647, %v974_v10 }
 0x29a   : > { %v4246_v12 = vpop.eup %4245 }
 0x29b   : > { %v990_v52 = vmul.f32 %v4246_v12, %v5558_v47  ;;  %vm995_vm12 = vweird.f32 %v4246_v12 }
 0x29c   : > { %v4248_v55 = vpop.eup %4247  ;;  %vm996_vm14 = vmor %vm994_vm13, %vm995_vm12  ;;  %vm1014_vm12 = vcmp.eq.f32.partialorder %v1013_v35, 8.507059e+37 }
 0x29d   : > { %v991_v30 = vsub.f32 1.0, %v990_v52  ;;  %v1005_v22 = vmul.f32 %v4248_v55, %v974_v10  ;;  %vm1010_vm0 = vweird.f32 %v4248_v55  ;;  %v4250_v13 = vpop.eup %4249 }
 0x29e   : > { %vm1011_vm11 = vmor %vm1009_vm10, %vm1010_vm0  ;;  %v1020_v52 = vmul.f32 %v4250_v13, %v975_v50  ;;  %vm1025_vm13 = vweird.f32 %v4250_v13  ;;  %vm1330_vm10 = vcmask 1040384  }
 0x29f   : > { %v992_v24 = vmul.f32 %v4246_v12, %v991_v30  ;;  %v1006_v28 = vsub.f32 1.0, %v1005_v22  ;;  %v1016_v30 = vor.u32 1.1754944e-38, %v1015_v0  ;;  %v976_v22 = vrot.slane %v5558_v47, 3 }
 0x2a1   : > { %v993_v6 = vadd.f32 %v4246_v12, %v992_v24  ;;  %v1007_v63 = vmul.f32 %v4248_v55, %v1006_v28  ;;  %4251 = vrcp.f32 %v976_v22 }
 0x2a3   : > { %v997_v5 = vsel %vm996_vm14, %v4246_v12, %v993_v6  ;;  %v1008_v38 = vadd.f32 %v4248_v55, %v1007_v63  ;;  %vm1024_vm14 = vweird.f32 %v975_v50  ;;  %v1028_v63 = vand.u32 2147483647, %v975_v50 }
 0x2a4   : > { %v1002_v20 = vsel %vm999_vm15, %v1001_v43, %v997_v5  ;;  %vm1026_vm15 = vmor %vm1024_vm14, %vm1025_vm13 }
 0x2a5   : > { %v1003_v21 = vmul.f32 %v1002_v20, %v5460_v1  ;;  %v1012_v12 = vsel %vm1011_vm11, %v4248_v55, %v1008_v38  ;;  %v1021_v1 = vsub.f32 1.0, %v1020_v52  ;;  %v1030_v55 = vand.u32 2147483648, %v975_v50  ;;  %v5592_v50 = vld [vmem:[%s6559_s5 + $0x18] sm:$0x1] }
 0x2a6   : > { %v1017_v14 = vsel %vm1014_vm12, %v1016_v30, %v1012_v12  ;;  %vm1029_vm0 = vcmp.eq.f32.partialorder %v1028_v63, 8.507059e+37  ;;  %v977_v38 = vrot.slane %v5558_v47, 4  ;;  %4009 = vmatpush.msk.msrb.mxu3 %vm1330_vm10, %v5592_v50  ;;  %v1045_v30 = vand.u32 2147483648, %v976_v22 }
 0x2a7   : > { %v1109_v25 = vperm.slane %v1003_v21, 0  ;;  %v1018_v29 = vmul.f32 %v1017_v14, %v5456_v53  ;;  %v1022_v28 = vmul.f32 %v4250_v13, %v1021_v1  ;;  %v4252_v43 = vpop.eup %4251  ;;  %vm1039_vm12 = vweird.f32 %v976_v22 }
 0x2a8   : > { %v1035_v21 = vmul.f32 %v4252_v43, %v976_v22  ;;  %4253 = vrcp.f32 %v977_v38  ;;  %vm1040_vm11 = vweird.f32 %v4252_v43  ;;  %v1043_v1 = vand.u32 2147483647, %v976_v22 }
 0x2a9   : > { %v1117_v60 = vmul.f32 %v1109_v25, %v5337_v37  ;;  %v1118_v24 = vmul.f32 %v1109_v25, %v5318_v62  ;;  %v1110_v10 = vperm.slane %v1018_v29, 0  ;;  %v1023_v6 = vadd.f32 %v4250_v13, %v1022_v28  ;;  %vm1041_vm13 = vmor %vm1039_vm12, %vm1040_vm11 }
 0x2aa   : > { %v1031_v25 = vor.u32 1.1754944e-38, %v1030_v55  ;;  %v1036_v0 = vsub.f32 1.0, %v1035_v21  ;;  %v1046_v28 = vor.u32 1.1754944e-38, %v1045_v30  ;;  %vm1044_vm14 = vcmp.eq.f32.partialorder %v1043_v1, 8.507059e+37 }
 0x2ab   : > { %3993 = vmatmul.msk.f32.vlgmr.msrb.gmra.mxu2 %vm6563_vm2, %v1117_v60  ;;  %v1119_v5 = vmul.f32 %v1110_v10, %v5321_v8  ;;  %v1027_v20 = vsel %vm1026_vm15, %v4250_v13, %v1023_v6  ;;  %v1120_v60 = vmul.f32 %v1110_v10, %v5305_v42  ;;  %v978_v6 = vrot.slane %v5558_v47, 5 }
 0x2ac   : > { %v1032_v53 = vsel %vm1029_vm0, %v1031_v25, %v1027_v20  ;;  %v1037_v12 = vmul.f32 %v4252_v43, %v1036_v0  ;;  %4115 = vmatpush.msk.msrb.mxu2 %vm1330_vm10, %v5592_v50  ;;  %vm1054_vm0 = vweird.f32 %v977_v38  ;;  %v1058_v0 = vand.u32 2147483647, %v977_v38 }
 0x2ad   : > { %v1033_v35 = vmul.f32 %v1032_v53, %v5458_v23  ;;  %4255 = vrcp.f32 %v978_v6 }
 0x2ae   : > { %v1038_v52 = vadd.f32 %v4252_v43, %v1037_v12  ;;  %v4254_v23 = vpop.eup %4253  ;;  %vm1059_vm12 = vcmp.eq.f32.partialorder %v1058_v0, 8.507059e+37 }
 0x2af   : > { %v1111_v13 = vperm.slane %v1033_v35, 0  ;;  %v1050_v29 = vmul.f32 %v4254_v23, %v977_v38  ;;  %vm1055_vm15 = vweird.f32 %v4254_v23 }
 0x2b0   : > { %vm1056_vm11 = vmor %vm1054_vm0, %vm1055_vm15 }
 0x2b1   : > { %v1121_v14 = vmul.f32 %v1111_v13, %v5331_v40  ;;  %v1051_v55 = vsub.f32 1.0, %v1050_v29 }
 0x2b3   : > { %3994 = vmatmul.msk.f32.gmra.mxu2 %vm6563_vm2, %v1118_v24  ;;  %v1042_v24 = vsel %vm1041_vm13, %v4252_v43, %v1038_v52  ;;  %v1052_v20 = vmul.f32 %v4254_v23, %v1051_v55  ;;  %v4256_v25 = vpop.eup %4255  ;;  %v1060_v43 = vand.u32 2147483648, %v977_v38  ;;  %v979_v52 = vrot.slane %v5558_v47, 6 }
 0x2b4   : > { %v1047_v10 = vsel %vm1044_vm14, %v1046_v28, %v1042_v24  ;;  %v1065_v35 = vmul.f32 %v4256_v25, %v978_v6  ;;  %vm1070_vm13 = vweird.f32 %v4256_v25  ;;  %v1075_v28 = vand.u32 2147483648, %v978_v6 }
 0x2b5   : > { %v1048_v63 = vmul.f32 %v1047_v10, %v5462_v4  ;;  %v1053_v21 = vadd.f32 %v4254_v23, %v1052_v20  ;;  %v5609_v4 = vld [vmem:[%s6559_s5 + $0x10] sm:$0xff]  ;;  %v1061_v12 = vor.u32 1.1754944e-38, %v1060_v43  ;;  %4257 = vrcp.f32 %v979_v52 }
 0x2b6   : > { %1347 = vmatpush.msrb.mxu3 %v5609_v4  ;;  %3182 = vmatpush.msrb.mxu2 %v5609_v4  ;;  %v1066_v38 = vsub.f32 1.0, %v1065_v35  ;;  %vm1069_vm14 = vweird.f32 %v978_v6  ;;  %v1073_v55 = vand.u32 2147483647, %v978_v6  ;;  %v1076_v20 = vor.u32 1.1754944e-38, %v1075_v28 }
 0x2b7   : > { %v1112_v22 = vperm.slane %v1048_v63, 0  ;;  %vm1071_vm15 = vmor %vm1069_vm14, %vm1070_vm13 }
 0x2b8   : > { %vm1074_vm0 = vcmp.eq.f32.partialorder %v1073_v55, 8.507059e+37 }
 0x2b9   : > { %v1123_v53 = vmul.f32 %v1112_v22, %v5342_v51  ;;  %v1124_v30 = vmul.f32 %v1112_v22, %v5324_v34 }
 0x2bb   : > { %3995 = vmatmul.msk.f32.gmra.mxu2 %vm6563_vm2, %v1119_v5  ;;  %v1122_v5 = vmul.f32 %v1111_v13, %v5314_v32  ;;  %v4258_v29 = vpop.eup %4257 }
 0x2bc   : > { %v1080_v63 = vmul.f32 %v4258_v29, %v979_v52 }
 0x2be   : > { %v1081_v43 = vsub.f32 1.0, %v1080_v63 }
 0x2c3   : > { %3996 = vmatmul.msk.f32.gmra.mxu2 %vm6563_vm2, %v1120_v60  ;;  %v1057_v60 = vsel %vm1056_vm11, %v4254_v23, %v1053_v21  ;;  %v980_v21 = vrot.slane %v5558_v47, 7  ;;  %vm1085_vm11 = vweird.f32 %v4258_v29 }
 0x2c4   : > { %v1062_v13 = vsel %vm1059_vm12, %v1061_v12, %v1057_v60  ;;  %v1090_v12 = vand.u32 2147483648, %v979_v52  ;;  %vm1084_vm12 = vweird.f32 %v979_v52 }
 0x2c5   : > { %v1063_v23 = vmul.f32 %v1062_v13, %v5464_v33  ;;  %v447_v33 = vld [vmem:[%s6559_s5 + $0x8] sm:$0xff]  ;;  %4259 = vrcp.f32 %v980_v21  ;;  %vm1086_vm13 = vmor %vm1084_vm12, %vm1085_vm11  ;;  %v1105_v55 = vand.u32 2147483648, %v980_v21 }
 0x2c6   : > { %1348 = vmatpush.msrb.mxu3 %v447_v33  ;;  %3183 = vmatpush.msrb.mxu2 %v447_v33 }
 0x2c7   : > { %v1113_v1 = vperm.slane %v1063_v23, 0  ;;  %v1091_v23 = vor.u32 1.1754944e-38, %v1090_v12 }
 0x2c9   : > { %v1125_v10 = vmul.f32 %v1113_v1, %v5352_v17 }
 0x2cb   : > { %3997 = vmatmul.msk.f32.gmra.mxu2 %vm6563_vm2, %v1121_v14  ;;  %v1067_v14 = vmul.f32 %v4256_v25, %v1066_v38  ;;  %v4260_v35 = vpop.eup %4259  ;;  %v1088_v38 = vand.u32 2147483647, %v979_v52  ;;  %v446_v52 = vld [vmem:[%s6559_s5] sm:$0xff] }
 0x2cc   : > { %1349 = vmatpush.msrb.mxu3 %v446_v52  ;;  %3184 = vmatpush.msrb.mxu2 %v446_v52 }
 0x2cd   : > { %v1068_v24 = vadd.f32 %v4256_v25, %v1067_v14  ;;  %vm1089_vm14 = vcmp.eq.f32.partialorder %v1088_v38, 8.507059e+37 }
 0x2ce   : > { %4062 = vmatpush.msk.msra.mxu3 %vm1330_vm10, %v5592_v50 }
 0x2d0   : > { %2266 = vmatpush.msra.mxu3 %v5609_v4 }
 0x2d2   : > { %2267 = vmatpush.msra.mxu3 %v447_v33 }
 0x2d3   : > { %3998 = vmatmul.msk.f32.gmra.mxu2 %vm6563_vm2, %v1122_v5  ;;  %v1072_v5 = vsel %vm1071_vm15, %v4256_v25, %v1068_v24  ;;  %v1082_v25 = vmul.f32 %v4258_v29, %v1081_v43  ;;  %vm1100_vm15 = vweird.f32 %v4260_v35 }
 0x2d4   : > { %v1077_v22 = vsel %vm1074_vm0, %v1076_v20, %v1072_v5  ;;  %vm1099_vm0 = vweird.f32 %v980_v21  ;;  %v1103_v5 = vand.u32 2147483647, %v980_v21  ;;  %2268 = vmatpush.msra.mxu3 %v446_v52  ;;  %v1106_v20 = vor.u32 1.1754944e-38, %v1105_v55 }
 0x2d5   : > { %v1078_v6 = vmul.f32 %v1077_v22, %v5466_v7  ;;  %v1083_v60 = vadd.f32 %v4258_v29, %v1082_v25  ;;  %vm1101_vm11 = vmor %vm1099_vm0, %vm1100_vm15 }
 0x2d6   : > { %vm1104_vm12 = vcmp.eq.f32.partialorder %v1103_v5, 8.507059e+37 }
 0x2d7   : > { %v1114_v0 = vperm.slane %v1078_v6, 0  ;;  %v1087_v47 = vsel %vm1086_vm13, %v4258_v29, %v1083_v60  ;;  %vm1281_vm13 = vcmask 203776  }
 0x2d8   : > { %v1092_v7 = vsel %vm1089_vm14, %v1091_v23, %v1087_v47 }
 0x2d9   : > { %v1127_v13 = vmul.f32 %v1114_v0, %v5361_v57  ;;  %v1093_v24 = vmul.f32 %v1092_v7, %v5470_v44 }
 0x2db   : > { %3999 = vmatmul.msk.f32.gmra.mxu2 %vm6563_vm2, %v1123_v53  ;;  %v1126_v53 = vmul.f32 %v1113_v1, %v5334_v2  ;;  %v1128_v1 = vmul.f32 %v1114_v0, %v5344_v56 }
 0x2e3   : > { %4000 = vmatmul.msk.f32.gmra.mxu2 %vm6563_vm2, %v1124_v30  ;;  %v1095_v30 = vmul.f32 %v4260_v35, %v980_v21 }
 0x2e5   : > { %v1096_v14 = vsub.f32 1.0, %v1095_v30 }
 0x2e7   : > { %v1097_v28 = vmul.f32 %v4260_v35, %v1096_v14 }
 0x2e9   : > { %v1098_v29 = vadd.f32 %v4260_v35, %v1097_v28 }
 0x2eb   : > { %4001 = vmatmul.msk.f32.gmra.mxu2 %vm6563_vm2, %v1125_v10  ;;  %v1115_v10 = vperm.slane %v1093_v24, 0  ;;  %v1102_v63 = vsel %vm1101_vm11, %v4260_v35, %v1098_v29 }
 0x2ec   : > { %v1107_v22 = vsel %vm1104_vm12, %v1106_v20, %v1102_v63 }
 0x2ed   : > { %v1129_v44 = vmul.f32 %v1115_v10, %v5382_v41  ;;  %v1130_v50 = vmul.f32 %v1115_v10, %v5389_v9  ;;  %v1108_v43 = vmul.f32 %v1107_v22, %v5486_v18 }
 0x2ef   : > { %v1116_v4 = vperm.slane %v1108_v43, 0 }
 0x2f1   : > { %v1132_v33 = vmul.f32 %v1116_v4, %v5443_v16 }
 0x2f3   : > { %4002 = vmatmul.msk.f32.gmra.mxu2 %vm6563_vm2, %v1126_v53  ;;  %v1131_v53 = vmul.f32 %v1116_v4, %v5435_v27 }
 0x2fb   : > { %4003 = vmatmul.msk.f32.gmra.mxu2 %vm6563_vm2, %v1127_v13 }
 0x303   : > { %4004 = vmatmul.msk.f32.gmra.mxu2 %vm6563_vm2, %v1128_v1 }
 0x30b   : > { %4005 = vmatmul.msk.f32.gmra.mxu2 %vm6563_vm2, %v1129_v44 }
 0x313   : > { %4006 = vmatmul.msk.f32.gmra.mxu2 %vm6563_vm2, %v1130_v50 }
 0x31b   : > { %4007 = vmatmul.msk.f32.gmra.mxu2 %vm6563_vm2, %v1131_v53 }
 0x323   : > { %4008 = vmatmul.msk.f32.gmra.mxu2 %vm6563_vm2, %v1132_v33 }
 0x32e   : > { %v1201_v21 = vpop.f32.mrf.mxu2 }
 0x32f   : > { %v1249_v6 = vmul.f32 1.442695, %v1201_v21 }
 0x331   : > { %4261 = vpow2.f32 %v1249_v6 }
 0x336   : > { %v1204_v25 = vpop.f32.mrf.mxu2 }
 0x337   : > { %v5646_v0 = vpop.eup %4261  ;;  %v1251_v60 = vmul.f32 1.442695, %v1204_v25 }
 0x338   : > { %4010 = vmatmul.msk.f32.vlgmr.msrb.gmra.mxu3 %vm1281_vm13, %v5646_v0 }
 0x339   : > { %4263 = vpow2.f32 %v1251_v60 }
 0x33e   : > { %v1207_v18 = vpop.f32.mrf.mxu2 }
 0x33f   : > { %v5650_v35 = vpop.eup %4263  ;;  %v1253_v12 = vmul.f32 1.442695, %v1207_v18 }
 0x340   : > { %4011 = vmatmul.msk.f32.gmra.mxu3 %vm1281_vm13, %v5650_v35 }
 0x341   : > { %4265 = vpow2.f32 %v1253_v12 }
 0x346   : > { %v1210_v13 = vpop.f32.mrf.mxu2 }
 0x347   : > { %v5654_v38 = vpop.eup %4265  ;;  %v1255_v47 = vmul.f32 1.442695, %v1210_v13 }
 0x348   : > { %4012 = vmatmul.msk.f32.gmra.mxu3 %vm1281_vm13, %v5654_v38 }
 0x349   : > { %4267 = vpow2.f32 %v1255_v47 }
 0x34e   : > { %v1213_v30 = vpop.f32.mrf.mxu2 }
 0x34f   : > { %v5658_v23 = vpop.eup %4267  ;;  %v1257_v7 = vmul.f32 1.442695, %v1213_v30 }
 0x350   : > { %4013 = vmatmul.msk.f32.gmra.mxu3 %vm1281_vm13, %v5658_v23 }
 0x351   : > { %4269 = vpow2.f32 %v1257_v7 }
 0x356   : > { %v1216_v14 = vpop.f32.mrf.mxu2 }
 0x357   : > { %v5662_v1 = vpop.eup %4269  ;;  %v1259_v24 = vmul.f32 1.442695, %v1216_v14 }
 0x358   : > { %4014 = vmatmul.msk.f32.gmra.mxu3 %vm1281_vm13, %v5662_v1 }
 0x359   : > { %4271 = vpow2.f32 %v1259_v24 }
 0x35e   : > { %v1219_v28 = vpop.f32.mrf.mxu2 }
 0x35f   : > { %v5666_v52 = vpop.eup %4271  ;;  %v1261_v10 = vmul.f32 1.442695, %v1219_v28 }
 0x360   : > { %4015 = vmatmul.msk.f32.gmra.mxu3 %vm1281_vm13, %v5666_v52 }
 0x361   : > { %4273 = vpow2.f32 %v1261_v10 }
 0x366   : > { %v1222_v29 = vpop.f32.mrf.mxu2 }
 0x367   : > { %v5670_v55 = vpop.eup %4273  ;;  %v1263_v44 = vmul.f32 1.442695, %v1222_v29 }
 0x368   : > { %4016 = vmatmul.msk.f32.gmra.mxu3 %vm1281_vm13, %v5670_v55 }
 0x369   : > { %4275 = vpow2.f32 %v1263_v44  ;;  %v413_v44 = vld [vmem:[%s6556_s2 + $0x18] sm:$0x1] }
 0x36a   : > { %4026 = vmatpush.msk.msrb.mxu1 %vm1330_vm10, %v413_v44  ;;  %4079 = vmatpush.msk.msrb.mxu0 %vm1330_vm10, %v413_v44 }
 0x36b   : > { %4132 = vmatpush.msk.msrb.mxu3 %vm1330_vm10, %v413_v44 }
 0x36e   : > { %v1225_v5 = vpop.f32.mrf.mxu2 }
 0x36f   : > { %v5674_v63 = vpop.eup %4275  ;;  %v1265_v20 = vmul.f32 1.442695, %v1225_v5  ;;  %v412_v5 = vld [vmem:[%s6556_s2 + $0x10] sm:$0xff] }
 0x370   : > { %4017 = vmatmul.msk.f32.gmra.mxu3 %vm1281_vm13, %v5674_v63  ;;  %1703 = vmatpush.msrb.mxu1 %v412_v5 }
 0x371   : > { %4277 = vpow2.f32 %v1265_v20  ;;  %2619 = vmatpush.msrb.mxu0 %v412_v5  ;;  %3535 = vmatpush.msrb.mxu3 %v412_v5 }
 0x376   : > { %v1228_v22 = vpop.f32.mrf.mxu2 }
 0x377   : > { %v5678_v50 = vpop.eup %4277  ;;  %v1267_v43 = vmul.f32 1.442695, %v1228_v22  ;;  %v411_v22 = vld [vmem:[%s6556_s2 + $0x8] sm:$0xff] }
 0x378   : > { %4018 = vmatmul.msk.f32.gmra.mxu3 %vm1281_vm13, %v5678_v50  ;;  %1704 = vmatpush.msrb.mxu1 %v411_v22 }
 0x379   : > { %4279 = vpow2.f32 %v1267_v43  ;;  %v410_v43 = vld [vmem:[%s6556_s2] sm:$0xff]  ;;  %2620 = vmatpush.msrb.mxu0 %v411_v22  ;;  %3536 = vmatpush.msrb.mxu3 %v411_v22 }
 0x37a   : > { %1705 = vmatpush.msrb.mxu1 %v410_v43 }
 0x37b   : > { %2621 = vmatpush.msrb.mxu0 %v410_v43  ;;  %3537 = vmatpush.msrb.mxu3 %v410_v43  ;;  %v4514_v43 = vld [vmem:[%s6558_s4 + $0x40] sm:$0xff] }
 0x37e   : > { %v1231_v4 = vpop.f32.mrf.mxu2 }
 0x37f   : > { %v5682_v53 = vpop.eup %4279  ;;  %v1269_v33 = vmul.f32 1.442695, %v1231_v4  ;;  %v4507_v4 = vld [vmem:[%s6558_s4 + $0x78] sm:$0x1f] }
 0x380   : > { %4019 = vmatmul.msk.f32.gmra.mxu3 %vm1281_vm13, %v5682_v53  ;;  %4096 = vmatpush.msk.msra.mxu1 %vm6561_vm1, %v4507_v4 }
 0x381   : > { %4281 = vpow2.f32 %v1269_v33 }
 0x386   : > { %v1234_v21 = vpop.f32.mrf.mxu2 }
 0x387   : > { %v5686_v6 = vpop.eup %4281  ;;  %v1271_v25 = vmul.f32 1.442695, %v1234_v21  ;;  %v4508_v21 = vld [vmem:[%s6558_s4 + $0x70] sm:$0xff] }
 0x388   : > { %4020 = vmatmul.msk.f32.gmra.mxu3 %vm1281_vm13, %v5686_v6  ;;  %2785 = vmatpush.msra.mxu1 %v4508_v21  ;;  %v4515_v21 = vld [vmem:[%s6558_s4 + $0x38] sm:$0xff] }
 0x389   : > { %4283 = vpow2.f32 %v1271_v25  ;;  %v4509_v25 = vld [vmem:[%s6558_s4 + $0x68] sm:$0xff] }
 0x38a   : > { %2786 = vmatpush.msra.mxu1 %v4509_v25 }
 0x38e   : > { %v1237_v60 = vpop.f32.mrf.mxu2 }
 0x38f   : > { %v5690_v18 = vpop.eup %4283  ;;  %v1273_v12 = vmul.f32 1.442695, %v1237_v60  ;;  %v4510_v60 = vld [vmem:[%s6558_s4 + $0x60] sm:$0xff] }
 0x390   : > { %4021 = vmatmul.msk.f32.gmra.mxu3 %vm1281_vm13, %v5690_v18  ;;  %2787 = vmatpush.msra.mxu1 %v4510_v60 }
 0x391   : > { %4285 = vpow2.f32 %v1273_v12  ;;  %v4511_v12 = vld [vmem:[%s6558_s4 + $0x58] sm:$0xff] }
 0x392   : > { %2788 = vmatpush.msra.mxu1 %v4511_v12 }
 0x396   : > { %v1240_v13 = vpop.f32.mrf.mxu2 }
 0x397   : > { %v5694_v47 = vpop.eup %4285  ;;  %v1275_v30 = vmul.f32 1.442695, %v1240_v13 }
 0x398   : > { %4022 = vmatmul.msk.f32.gmra.mxu3 %vm1281_vm13, %v5694_v47 }
 0x399   : > { %4287 = vpow2.f32 %v1275_v30 }
 0x39e   : > { %v1243_v7 = vpop.f32.mrf.mxu2 }
 0x39f   : > { %v5698_v14 = vpop.eup %4287  ;;  %v1277_v24 = vmul.f32 1.442695, %v1243_v7 }
 0x3a0   : > { %4023 = vmatmul.msk.f32.gmra.mxu3 %vm1281_vm13, %v5698_v14 }
 0x3a1   : > { %4289 = vpow2.f32 %v1277_v24  ;;  %v4512_v24 = vld [vmem:[%s6558_s4 + $0x50] sm:$0xff] }
 0x3a2   : > { %2789 = vmatpush.msra.mxu1 %v4512_v24 }
 0x3a6   : > { %v1246_v28 = vpop.f32.mrf.mxu2 }
 0x3a7   : > { %v5702_v10 = vpop.eup %4289  ;;  %v1279_v29 = vmul.f32 1.442695, %v1246_v28 }
 0x3a8   : > { %4024 = vmatmul.msk.f32.gmra.mxu3 %vm1281_vm13, %v5702_v10 }
 0x3a9   : > { %4291 = vpow2.f32 %v1279_v29  ;;  %v4513_v29 = vld [vmem:[%s6558_s4 + $0x48] sm:$0xff] }
 0x3aa   : > { %2790 = vmatpush.msra.mxu1 %v4513_v29 }
 0x3ac   : > { %2791 = vmatpush.msra.mxu1 %v4514_v43  ;;  %v4517_v43 = vld [vmem:[%s6558_s4 + $0x28] sm:$0xff] }
 0x3ae   : > { %2792 = vmatpush.msra.mxu1 %v4515_v21 }
 0x3af   : > { %v5714_v20 = vpop.eup %4291 }
 0x3b0   : > { %4025 = vmatmul.msk.f32.gmra.mxu3 %vm1281_vm13, %v5714_v20 }
 0x3bb   : > { %v1351_v33 = vpop.f32.mrf.mxu3 }
 0x3bc   : > { %4293 = vrcp.f32 %v1351_v33  ;;  %v1410_v44 = vand.u32 2147483648, %v1351_v33  ;;  %v1408_v22 = vand.u32 2147483647, %v1351_v33  ;;  %vm1404_vm14 = vweird.f32 %v1351_v33 }
 0x3be   : > { %v1411_v60 = vor.u32 1.1754944e-38, %v1410_v44  ;;  %vm1409_vm0 = vcmp.eq.f32.partialorder %v1408_v22, 8.507059e+37 }
 0x3c2   : > { %v4294_v13 = vpop.eup %4293 }
 0x3c3   : > { %v1400_v30 = vmul.f32 %v4294_v13, %v1351_v33  ;;  %v1354_v7 = vpop.f32.mrf.mxu3  ;;  %vm1405_vm10 = vweird.f32 %v4294_v13 }
 0x3c4   : > { %4295 = vrcp.f32 %v1354_v7  ;;  %vm1406_vm15 = vmor %vm1404_vm14, %vm1405_vm10  ;;  %v1425_v44 = vand.u32 2147483648, %v1354_v7  ;;  %v1423_v22 = vand.u32 2147483647, %v1354_v7  ;;  %vm1419_vm12 = vweird.f32 %v1354_v7 }
 0x3c5   : > { %v1401_v28 = vsub.f32 1.0, %v1400_v30 }
 0x3c6   : > { %vm1424_vm14 = vcmp.eq.f32.partialorder %v1423_v22, 8.507059e+37 }
 0x3c7   : > { %v1402_v5 = vmul.f32 %v4294_v13, %v1401_v28  ;;  %v4516_v28 = vld [vmem:[%s6558_s4 + $0x30] sm:$0xff] }
 0x3c8   : > { %2793 = vmatpush.msra.mxu1 %v4516_v28 }
 0x3c9   : > { %v1403_v4 = vadd.f32 %v4294_v13, %v1402_v5 }
 0x3ca   : > { %v4296_v25 = vpop.eup %4295  ;;  %2794 = vmatpush.msra.mxu1 %v4517_v43 }
 0x3cb   : > { %v1407_v12 = vsel %vm1406_vm15, %v4294_v13, %v1403_v4  ;;  %v1415_v30 = vmul.f32 %v4296_v25, %v1354_v7  ;;  %v1357_v24 = vpop.f32.mrf.mxu3  ;;  %vm1420_vm11 = vweird.f32 %v4296_v25  ;;  %v4518_v4 = vld [vmem:[%s6558_s4 + $0x20] sm:$0xff] }
 0x3cc   : > { %4297 = vrcp.f32 %v1357_v24  ;;  %v1412_v29 = vsel %vm1409_vm0, %v1411_v60, %v1407_v12  ;;  %2795 = vmatpush.msra.mxu1 %v4518_v4  ;;  %vm1421_vm10 = vmor %vm1419_vm12, %vm1420_vm11  ;;  %v4519_v12 = vld [vmem:[%s6558_s4 + $0x18] sm:$0xff]  ;;  %v1438_v22 = vand.u32 2147483647, %v1357_v24  ;;  %v4522_v4 = vld [vmem:[%s6558_s4] sm:$0xff]  ;;  %vm1434_vm0 = vweird.f32 %v1357_v24 }
 0x3cd   : > { %v1416_v33 = vsub.f32 1.0, %v1415_v30  ;;  %v1413_v5 = vmul.f32 %v5646_v0, %v1412_v29  ;;  %v1426_v0 = vor.u32 1.1754944e-38, %v1425_v44  ;;  %v1440_v44 = vand.u32 2147483648, %v1357_v24 }
 0x3ce   : > { %2796 = vmatpush.msra.mxu1 %v4519_v12  ;;  %vm1439_vm12 = vcmp.eq.f32.partialorder %v1438_v22, 8.507059e+37 }
 0x3cf   : > { %4027 = vmatmul.msk.f32.vlgmr.msrb.gmra.mxu1 %vm1281_vm13, %v1413_v5  ;;  %v1417_v13 = vmul.f32 %v4296_v25, %v1416_v33  ;;  %v4520_v5 = vld [vmem:[%s6558_s4 + $0x10] sm:$0xff] }
 0x3d0   : > { %2797 = vmatpush.msra.mxu1 %v4520_v5 }
 0x3d1   : > { %v1418_v21 = vadd.f32 %v4296_v25, %v1417_v13  ;;  %v4521_v13 = vld [vmem:[%s6558_s4 + $0x8] sm:$0xff] }
 0x3d2   : > { %v4298_v60 = vpop.eup %4297  ;;  %2798 = vmatpush.msra.mxu1 %v4521_v13 }
 0x3d3   : > { %v1430_v30 = vmul.f32 %v4298_v60, %v1357_v24  ;;  %v1360_v28 = vpop.f32.mrf.mxu3  ;;  %v1422_v29 = vsel %vm1421_vm10, %v4296_v25, %v1418_v21  ;;  %vm1435_vm15 = vweird.f32 %v4298_v60 }
 0x3d4   : > { %4299 = vrcp.f32 %v1360_v28  ;;  %v1427_v33 = vsel %vm1424_vm14, %v1426_v0, %v1422_v29  ;;  %2799 = vmatpush.msra.mxu1 %v4522_v4  ;;  %vm1436_vm11 = vmor %vm1434_vm0, %vm1435_vm15  ;;  %v1441_v0 = vor.u32 1.1754944e-38, %v1440_v44  ;;  %v1455_v24 = vand.u32 2147483648, %v1360_v28 }
 0x3d5   : > { %v1431_v7 = vsub.f32 1.0, %v1430_v30  ;;  %v1428_v43 = vmul.f32 %v5650_v35, %v1427_v33  ;;  %vm1449_vm14 = vweird.f32 %v1360_v28 }
 0x3d6   : > { %4098 = vmatpush.msk.msrb.mxu1 %vm6561_vm1, %v5408_v15  ;;  %v1453_v15 = vand.u32 2147483647, %v1360_v28 }
 0x3d7   : > { %4028 = vmatmul.msk.f32.gmra.mxu1 %vm1281_vm13, %v1428_v43  ;;  %v1432_v25 = vmul.f32 %v4298_v60, %v1431_v7 }
 0x3d8   : > { %3025 = vmatpush.msrb.mxu1 %v5413_v49  ;;  %v1456_v49 = vor.u32 1.1754944e-38, %v1455_v24  ;;  %vm1454_vm0 = vcmp.eq.f32.partialorder %v1453_v15, 8.507059e+37 }
 0x3d9   : > { %v1433_v21 = vadd.f32 %v4298_v60, %v1432_v25 }
 0x3da   : > { %v4300_v35 = vpop.eup %4299  ;;  %3026 = vmatpush.msrb.mxu1 %v5420_v3 }
 0x3db   : > { %v1445_v12 = vmul.f32 %v4300_v35, %v1360_v28  ;;  %v1363_v30 = vpop.f32.mrf.mxu3  ;;  %v1437_v29 = vsel %vm1436_vm11, %v4298_v60, %v1433_v21  ;;  %vm1450_vm10 = vweird.f32 %v4300_v35 }
 0x3dc   : > { %4301 = vrcp.f32 %v1363_v30  ;;  %v1442_v33 = vsel %vm1439_vm12, %v1441_v0, %v1437_v29  ;;  %3027 = vmatpush.msrb.mxu1 %v5426_v61  ;;  %vm1451_vm15 = vmor %vm1449_vm14, %vm1450_vm10  ;;  %v1470_v21 = vand.u32 2147483648, %v1363_v30  ;;  %v1468_v28 = vand.u32 2147483647, %v1363_v30 }
 0x3dd   : > { %v1446_v5 = vsub.f32 1.0, %v1445_v12  ;;  %v1443_v7 = vmul.f32 %v5654_v38, %v1442_v33  ;;  %vm1464_vm12 = vweird.f32 %v1363_v30 }
 0x3de   : > { %3028 = vmatpush.msrb.mxu1 %v5432_v54  ;;  %v1471_v0 = vor.u32 1.1754944e-38, %v1470_v21  ;;  %vm1469_vm14 = vcmp.eq.f32.partialorder %v1468_v28, 8.507059e+37 }
 0x3df   : > { %v1447_v43 = vmul.f32 %v4300_v35, %v1446_v5  ;;  %4029 = vmatmul.msk.f32.gmra.mxu1 %vm1281_vm13, %v1443_v7 }
 0x3e0   : > { %3029 = vmatpush.msrb.mxu1 %v5440_v45 }
 0x3e1   : > { %v1448_v60 = vadd.f32 %v4300_v35, %v1447_v43 }
 0x3e2   : > { %v4302_v44 = vpop.eup %4301  ;;  %3030 = vmatpush.msrb.mxu1 %v5448_v26 }
 0x3e3   : > { %v1460_v13 = vmul.f32 %v4302_v44, %v1363_v30  ;;  %v1366_v25 = vpop.f32.mrf.mxu3  ;;  %v1452_v38 = vsel %vm1451_vm15, %v4300_v35, %v1448_v60  ;;  %vm1465_vm11 = vweird.f32 %v4302_v44 }
 0x3e4   : > { %4303 = vrcp.f32 %v1366_v25  ;;  %v1457_v3 = vsel %vm1454_vm0, %v1456_v49, %v1452_v38  ;;  %3031 = vmatpush.msrb.mxu1 %v5499_v39  ;;  %vm1466_vm10 = vmor %vm1464_vm12, %vm1465_vm11  ;;  %v1485_v5 = vand.u32 2147483648, %v1366_v25  ;;  %v1483_v30 = vand.u32 2147483647, %v1366_v25 }
 0x3e5   : > { %v1461_v22 = vsub.f32 1.0, %v1460_v13  ;;  %v1458_v4 = vmul.f32 %v5658_v23, %v1457_v3  ;;  %vm1479_vm0 = vweird.f32 %v1366_v25 }
 0x3e6   : > { %3032 = vmatpush.msrb.mxu1 %v5504_v31  ;;  %v1486_v24 = vor.u32 1.1754944e-38, %v1485_v5  ;;  %vm1484_vm12 = vcmp.eq.f32.partialorder %v1483_v30, 8.507059e+37 }
 0x3e7   : > { %v1462_v61 = vmul.f32 %v4302_v44, %v1461_v22  ;;  %4030 = vmatmul.msk.f32.gmra.mxu1 %vm1281_vm13, %v1458_v4 }
 0x3e8   : > { %3033 = vmatpush.msrb.mxu1 %v5510_v36 }
 0x3e9   : > { %v1463_v54 = vadd.f32 %v4302_v44, %v1462_v61 }
 0x3ea   : > { %v4304_v35 = vpop.eup %4303  ;;  %3034 = vmatpush.msrb.mxu1 %v5516_v11 }
 0x3eb   : > { %v1475_v45 = vmul.f32 %v4304_v35, %v1366_v25  ;;  %v1369_v12 = vpop.f32.mrf.mxu3  ;;  %v1467_v23 = vsel %vm1466_vm10, %v4302_v44, %v1463_v54  ;;  %vm1480_vm15 = vweird.f32 %v4304_v35 }
 0x3ec   : > { %4305 = vrcp.f32 %v1369_v12  ;;  %v1472_v26 = vsel %vm1469_vm14, %v1471_v0, %v1467_v23  ;;  %3035 = vmatpush.msrb.mxu1 %v5522_v19  ;;  %vm1481_vm11 = vmor %vm1479_vm0, %vm1480_vm15  ;;  %v1500_v44 = vand.u32 2147483648, %v1369_v12  ;;  %v1498_v49 = vand.u32 2147483647, %v1369_v12 }
 0x3ed   : > { %v1476_v29 = vsub.f32 1.0, %v1475_v45  ;;  %v1473_v33 = vmul.f32 %v5662_v1, %v1472_v26  ;;  %vm1494_vm14 = vweird.f32 %v1369_v12 }
 0x3ee   : > { %3036 = vmatpush.msrb.mxu1 %v5528_v58  ;;  %v1501_v25 = vor.u32 1.1754944e-38, %v1500_v44  ;;  %vm1499_vm0 = vcmp.eq.f32.partialorder %v1498_v49, 8.507059e+37 }
 0x3ef   : > { %v1477_v39 = vmul.f32 %v4304_v35, %v1476_v29  ;;  %4031 = vmatmul.msk.f32.gmra.mxu1 %vm1281_vm13, %v1473_v33 }
 0x3f0   : > { %3037 = vmatpush.msrb.mxu1 %v5534_v46 }
 0x3f1   : > { %v1478_v31 = vadd.f32 %v4304_v35, %v1477_v39 }
 0x3f2   : > { %v4306_v7 = vpop.eup %4305  ;;  %3038 = vmatpush.msrb.mxu1 %v5540_v48 }
 0x3f3   : > { %v1490_v36 = vmul.f32 %v4306_v7, %v1369_v12  ;;  %v1372_v43 = vpop.f32.mrf.mxu3  ;;  %v1482_v1 = vsel %vm1481_vm11, %v4304_v35, %v1478_v31  ;;  %vm1495_vm10 = vweird.f32 %v4306_v7 }
 0x3f4   : > { %4307 = vrcp.f32 %v1372_v43  ;;  %v1487_v11 = vsel %vm1484_vm12, %v1486_v24, %v1482_v1  ;;  %3039 = vmatpush.msrb.mxu1 %v5546_v59  ;;  %vm1496_vm15 = vmor %vm1494_vm14, %vm1495_vm10  ;;  %v1515_v4 = vand.u32 2147483648, %v1372_v43  ;;  %v1513_v59 = vand.u32 2147483647, %v1372_v43 }
 0x3f5   : > { %v1491_v15 = vsub.f32 1.0, %v1490_v36  ;;  %v1488_v60 = vmul.f32 %v5666_v52, %v1487_v11  ;;  %vm1509_vm12 = vweird.f32 %v1372_v43 }
 0x3f6   : > { %v1516_v54 = vor.u32 1.1754944e-38, %v1515_v4  ;;  %vm1514_vm14 = vcmp.eq.f32.partialorder %v1513_v59, 8.507059e+37 }
 0x3f7   : > { %v1492_v19 = vmul.f32 %v4306_v7, %v1491_v15  ;;  %4032 = vmatmul.msk.f32.gmra.mxu1 %vm1281_vm13, %v1488_v60 }
 0x3f9   : > { %v1493_v58 = vadd.f32 %v4306_v7, %v1492_v19 }
 0x3fa   : > { %v4308_v13 = vpop.eup %4307 }
 0x3fb   : > { %v1505_v38 = vmul.f32 %v4308_v13, %v1372_v43  ;;  %v1375_v46 = vpop.f32.mrf.mxu3  ;;  %v1497_v3 = vsel %vm1496_vm15, %v4306_v7, %v1493_v58  ;;  %vm1510_vm11 = vweird.f32 %v4308_v13 }
 0x3fc   : > { %4309 = vrcp.f32 %v1375_v46  ;;  %v1502_v52 = vsel %vm1499_vm0, %v1501_v25, %v1497_v3  ;;  %vm1511_vm10 = vmor %vm1509_vm12, %vm1510_vm11  ;;  %v1530_v26 = vand.u32 2147483648, %v1375_v46  ;;  %v1528_v33 = vand.u32 2147483647, %v1375_v46 }
 0x3fd   : > { %v1506_v22 = vsub.f32 1.0, %v1505_v38  ;;  %v1503_v48 = vmul.f32 %v5670_v55, %v1502_v52  ;;  %vm1524_vm0 = vweird.f32 %v1375_v46 }
 0x3fe   : > { %v1531_v30 = vor.u32 1.1754944e-38, %v1530_v26  ;;  %vm1529_vm12 = vcmp.eq.f32.partialorder %v1528_v33, 8.507059e+37 }
 0x3ff   : > { %v1507_v21 = vmul.f32 %v4308_v13, %v1506_v22  ;;  %4033 = vmatmul.msk.f32.gmra.mxu1 %vm1281_vm13, %v1503_v48 }
 0x401   : > { %v1508_v61 = vadd.f32 %v4308_v13, %v1507_v21 }
 0x402   : > { %v4310_v28 = vpop.eup %4309 }
 0x403   : > { %v1520_v35 = vmul.f32 %v4310_v28, %v1375_v46  ;;  %v1378_v0 = vpop.f32.mrf.mxu3  ;;  %v1512_v45 = vsel %vm1511_vm10, %v4308_v13, %v1508_v61  ;;  %vm1525_vm15 = vweird.f32 %v4310_v28 }
 0x404   : > { %4311 = vrcp.f32 %v1378_v0  ;;  %v1517_v12 = vsel %vm1514_vm14, %v1516_v54, %v1512_v45  ;;  %vm1526_vm11 = vmor %vm1524_vm0, %vm1525_vm15  ;;  %v1545_v1 = vand.u32 2147483648, %v1378_v0  ;;  %v1543_v15 = vand.u32 2147483647, %v1378_v0 }
 0x405   : > { %v1521_v23 = vsub.f32 1.0, %v1520_v35  ;;  %v1518_v55 = vmul.f32 %v5674_v63, %v1517_v12  ;;  %vm1539_vm14 = vweird.f32 %v1378_v0 }
 0x406   : > { %v1546_v19 = vor.u32 1.1754944e-38, %v1545_v1  ;;  %vm1544_vm0 = vcmp.eq.f32.partialorder %v1543_v15, 8.507059e+37 }
 0x407   : > { %v1522_v29 = vmul.f32 %v4310_v28, %v1521_v23  ;;  %4034 = vmatmul.msk.f32.gmra.mxu1 %vm1281_vm13, %v1518_v55 }
 0x409   : > { %v1523_v5 = vadd.f32 %v4310_v28, %v1522_v29 }
 0x40a   : > { %v4312_v39 = vpop.eup %4311 }
 0x40b   : > { %v1535_v31 = vmul.f32 %v4312_v39, %v1378_v0  ;;  %v1381_v7 = vpop.f32.mrf.mxu3  ;;  %v1527_v24 = vsel %vm1526_vm11, %v4310_v28, %v1523_v5  ;;  %vm1540_vm10 = vweird.f32 %v4312_v39 }
 0x40c   : > { %4313 = vrcp.f32 %v1381_v7  ;;  %v1532_v36 = vsel %vm1529_vm12, %v1531_v30, %v1527_v24  ;;  %vm1541_vm15 = vmor %vm1539_vm14, %vm1540_vm10  ;;  %v1560_v46 = vand.u32 2147483648, %v1381_v7  ;;  %v1558_v52 = vand.u32 2147483647, %v1381_v7 }
 0x40d   : > { %v1536_v43 = vsub.f32 1.0, %v1535_v31  ;;  %v1533_v63 = vmul.f32 %v5678_v50, %v1532_v36  ;;  %vm1554_vm12 = vweird.f32 %v1381_v7 }
 0x40e   : > { %v1561_v4 = vor.u32 1.1754944e-38, %v1560_v46  ;;  %vm1559_vm14 = vcmp.eq.f32.partialorder %v1558_v52, 8.507059e+37 }
 0x40f   : > { %v1537_v11 = vmul.f32 %v4312_v39, %v1536_v43  ;;  %4035 = vmatmul.msk.f32.gmra.mxu1 %vm1281_vm13, %v1533_v63 }
 0x411   : > { %v1538_v60 = vadd.f32 %v4312_v39, %v1537_v11 }
 0x412   : > { %v4314_v44 = vpop.eup %4313 }
 0x413   : > { %v1550_v49 = vmul.f32 %v4314_v44, %v1381_v7  ;;  %v1384_v58 = vpop.f32.mrf.mxu3  ;;  %v1542_v13 = vsel %vm1541_vm15, %v4312_v39, %v1538_v60  ;;  %vm1555_vm11 = vweird.f32 %v4314_v44 }
 0x414   : > { %4315 = vrcp.f32 %v1384_v58  ;;  %v1547_v25 = vsel %vm1544_vm0, %v1546_v19, %v1542_v13  ;;  %vm1556_vm10 = vmor %vm1554_vm12, %vm1555_vm11  ;;  %v1575_v35 = vand.u32 2147483648, %v1384_v58  ;;  %v1573_v45 = vand.u32 2147483647, %v1384_v58 }
 0x415   : > { %v1551_v38 = vsub.f32 1.0, %v1550_v49  ;;  %v1548_v50 = vmul.f32 %v5682_v53, %v1547_v25  ;;  %vm1569_vm0 = vweird.f32 %v1384_v58 }
 0x416   : > { %v1576_v55 = vor.u32 1.1754944e-38, %v1575_v35  ;;  %vm1574_vm12 = vcmp.eq.f32.partialorder %v1573_v45, 8.507059e+37 }
 0x417   : > { %v1552_v3 = vmul.f32 %v4314_v44, %v1551_v38  ;;  %4036 = vmatmul.msk.f32.gmra.mxu1 %vm1281_vm13, %v1548_v50 }
 0x419   : > { %v1553_v22 = vadd.f32 %v4314_v44, %v1552_v3 }
 0x41a   : > { %v4316_v48 = vpop.eup %4315 }
 0x41b   : > { %v1565_v21 = vmul.f32 %v4316_v48, %v1384_v58  ;;  %v1387_v59 = vpop.f32.mrf.mxu3  ;;  %v1557_v61 = vsel %vm1556_vm10, %v4314_v44, %v1553_v22  ;;  %vm1570_vm15 = vweird.f32 %v4316_v48 }
 0x41c   : > { %4317 = vrcp.f32 %v1387_v59  ;;  %v1562_v28 = vsel %vm1559_vm14, %v1561_v4, %v1557_v61  ;;  %vm1571_vm11 = vmor %vm1569_vm0, %vm1570_vm15  ;;  %v1590_v30 = vand.u32 2147483648, %v1387_v59  ;;  %v1588_v7 = vand.u32 2147483647, %v1387_v59 }
 0x41d   : > { %v1566_v54 = vsub.f32 1.0, %v1565_v21  ;;  %v1563_v53 = vmul.f32 %v5686_v6, %v1562_v28  ;;  %vm1584_vm14 = vweird.f32 %v1387_v59 }
 0x41e   : > { %v1591_v43 = vor.u32 1.1754944e-38, %v1590_v30  ;;  %vm1589_vm0 = vcmp.eq.f32.partialorder %v1588_v7, 8.507059e+37 }
 0x41f   : > { %v1567_v0 = vmul.f32 %v4316_v48, %v1566_v54  ;;  %4037 = vmatmul.msk.f32.gmra.mxu1 %vm1281_vm13, %v1563_v53 }
 0x421   : > { %v1568_v12 = vadd.f32 %v4316_v48, %v1567_v0 }
 0x422   : > { %v4318_v23 = vpop.eup %4317 }
 0x423   : > { %v1580_v26 = vmul.f32 %v4318_v23, %v1387_v59  ;;  %v1390_v29 = vpop.f32.mrf.mxu3  ;;  %v1572_v33 = vsel %vm1571_vm11, %v4316_v48, %v1568_v12  ;;  %vm1585_vm10 = vweird.f32 %v4318_v23 }
 0x424   : > { %4319 = vrcp.f32 %v1390_v29  ;;  %v1577_v5 = vsel %vm1574_vm12, %v1576_v55, %v1572_v33  ;;  %vm1586_vm15 = vmor %vm1584_vm14, %vm1585_vm10  ;;  %v1605_v44 = vand.u32 2147483648, %v1390_v29  ;;  %v1603_v49 = vand.u32 2147483647, %v1390_v29 }
 0x425   : > { %v1581_v39 = vsub.f32 1.0, %v1580_v26  ;;  %v1578_v6 = vmul.f32 %v5690_v18, %v1577_v5  ;;  %vm1599_vm12 = vweird.f32 %v1390_v29 }
 0x426   : > { %v1606_v25 = vor.u32 1.1754944e-38, %v1605_v44  ;;  %vm1604_vm14 = vcmp.eq.f32.partialorder %v1603_v49, 8.507059e+37 }
 0x427   : > { %v1582_v31 = vmul.f32 %v4318_v23, %v1581_v39  ;;  %4038 = vmatmul.msk.f32.gmra.mxu1 %vm1281_vm13, %v1578_v6 }
 0x429   : > { %v1583_v24 = vadd.f32 %v4318_v23, %v1582_v31 }
 0x42a   : > { %v4320_v36 = vpop.eup %4319 }
 0x42b   : > { %v1595_v63 = vmul.f32 %v4320_v36, %v1390_v29  ;;  %v1393_v1 = vpop.f32.mrf.mxu3  ;;  %v1587_v11 = vsel %vm1586_vm15, %v4318_v23, %v1583_v24  ;;  %vm1600_vm11 = vweird.f32 %v4320_v36 }
 0x42c   : > { %4321 = vrcp.f32 %v1393_v1  ;;  %v1592_v15 = vsel %vm1589_vm0, %v1591_v43, %v1587_v11  ;;  %vm1601_vm10 = vmor %vm1599_vm12, %vm1600_vm11  ;;  %v1620_v22 = vand.u32 2147483648, %v1393_v1  ;;  %v1618_v4 = vand.u32 2147483647, %v1393_v1 }
 0x42d   : > { %v1596_v60 = vsub.f32 1.0, %v1595_v63  ;;  %v1593_v18 = vmul.f32 %v5694_v47, %v1592_v15  ;;  %vm1614_vm0 = vweird.f32 %v1393_v1 }
 0x42e   : > { %v1621_v61 = vor.u32 1.1754944e-38, %v1620_v22  ;;  %vm1619_vm12 = vcmp.eq.f32.partialorder %v1618_v4, 8.507059e+37 }
 0x42f   : > { %v1597_v19 = vmul.f32 %v4320_v36, %v1596_v60  ;;  %4039 = vmatmul.msk.f32.gmra.mxu1 %vm1281_vm13, %v1593_v18 }
 0x431   : > { %v1598_v58 = vadd.f32 %v4320_v36, %v1597_v19 }
 0x432   : > { %v4322_v13 = vpop.eup %4321 }
 0x433   : > { %v1610_v38 = vmul.f32 %v4322_v13, %v1393_v1  ;;  %v1396_v50 = vpop.f32.mrf.mxu3  ;;  %v1602_v46 = vsel %vm1601_vm10, %v4320_v36, %v1598_v58  ;;  %vm1615_vm15 = vweird.f32 %v4322_v13 }
 0x434   : > { %4323 = vrcp.f32 %v1396_v50  ;;  %v1607_v3 = vsel %vm1604_vm14, %v1606_v25, %v1602_v46  ;;  %vm1616_vm11 = vmor %vm1614_vm0, %vm1615_vm15  ;;  %v1635_v45 = vand.u32 2147483648, %v1396_v50  ;;  %v1633_v12 = vand.u32 2147483647, %v1396_v50 }
 0x435   : > { %v1611_v52 = vsub.f32 1.0, %v1610_v38  ;;  %v1608_v47 = vmul.f32 %v5698_v14, %v1607_v3  ;;  %vm1629_vm14 = vweird.f32 %v1396_v50 }
 0x436   : > { %v1636_v55 = vor.u32 1.1754944e-38, %v1635_v45  ;;  %vm1634_vm15 = vcmp.eq.f32.partialorder %v1633_v12, 8.507059e+37 }
 0x437   : > { %v1612_v48 = vmul.f32 %v4322_v13, %v1611_v52  ;;  %4040 = vmatmul.msk.f32.gmra.mxu1 %vm1281_vm13, %v1608_v47 }
 0x439   : > { %v1613_v21 = vadd.f32 %v4322_v13, %v1612_v48 }
 0x43a   : > { %v4324_v59 = vpop.eup %4323 }
 0x43b   : > { %v1625_v28 = vmul.f32 %v4324_v59, %v1396_v50  ;;  %v1617_v54 = vsel %vm1616_vm11, %v4322_v13, %v1613_v21  ;;  %vm1630_vm10 = vweird.f32 %v4324_v59 }
 0x43c   : > { %v1622_v53 = vsel %vm1619_vm12, %v1621_v61, %v1617_v54  ;;  %vm1631_vm1 = vmor %vm1629_vm14, %vm1630_vm10 }
 0x43d   : > { %v1626_v35 = vsub.f32 1.0, %v1625_v28  ;;  %v1623_v0 = vmul.f32 %v5702_v10, %v1622_v53 }
 0x43f   : > { %v1627_v14 = vmul.f32 %v4324_v59, %v1626_v35  ;;  %4041 = vmatmul.msk.f32.gmra.mxu1 %vm1281_vm13, %v1623_v0 }
 0x441   : > { %v1628_v23 = vadd.f32 %v4324_v59, %v1627_v14 }
 0x443   : > { %v1632_v26 = vsel %vm1631_vm1, %v4324_v59, %v1628_v23 }
 0x444   : > { %v1637_v29 = vsel %vm1634_vm15, %v1636_v55, %v1632_v26 }
 0x445   : > { %v1638_v33 = vmul.f32 %v5714_v20, %v1637_v29 }
 0x447   : > { %4042 = vmatmul.msk.f32.gmra.mxu1 %vm1281_vm13, %v1638_v33 }
 0x44c   : > { %v1707_v5 = vpop.f32.mrf.mxu1 }
 0x44d   : > { %v1755_v19 = vmul.f32 %v1707_v5, %v5337_v37 }
 0x44f   : > { %v1771_v48 = vsel %vm6563_vm2, %v1755_v19, 0.0 }
 0x454   : > { %v1710_v39 = vpop.f32.mrf.mxu1 }
 0x455   : > { %v1756_v20 = vmul.f32 %v1710_v39, %v5318_v62 }
 0x457   : > { %v1772_v3 = vsel %vm6563_vm2, %v1756_v20, 0.0 }
 0x458   : > { %v1773_v35 = vadd.f32 %v1772_v3, %v1771_v48 }
 0x45c   : > { %v1713_v10 = vpop.f32.mrf.mxu1 }
 0x45d   : > { %v1757_v18 = vmul.f32 %v1713_v10, %v5321_v8  ;;  %v1774_v10 = vrot.slane %v1773_v35, 4 }
 0x45f   : > { %v1780_v52 = vsel %vm6563_vm2, %v1757_v18, 0.0 }
 0x464   : > { %v1716_v6 = vpop.f32.mrf.mxu1 }
 0x465   : > { %v1758_v11 = vmul.f32 %v1716_v6, %v5305_v42 }
 0x467   : > { %v1781_v13 = vsel %vm6563_vm2, %v1758_v11, 0.0 }
 0x468   : > { %v1782_v4 = vadd.f32 %v1781_v13, %v1780_v52 }
 0x46a   : > { %v1783_v26 = vrot.slane %v1782_v4, 4 }
 0x46c   : > { %v1719_v30 = vpop.f32.mrf.mxu1 }
 0x46d   : > { %v1759_v49 = vmul.f32 %v1719_v30, %v5331_v40 }
 0x46f   : > { %v1789_v21 = vsel %vm6563_vm2, %v1759_v49, 0.0 }
 0x474   : > { %v1722_v31 = vpop.f32.mrf.mxu1 }
 0x475   : > { %v1760_v15 = vmul.f32 %v1722_v31, %v5314_v32 }
 0x477   : > { %v1790_v50 = vsel %vm6563_vm2, %v1760_v15, 0.0 }
 0x478   : > { %v1791_v61 = vadd.f32 %v1790_v50, %v1789_v21 }
 0x47a   : > { %v1792_v33 = vrot.slane %v1791_v61, 4 }
 0x47c   : > { %v1725_v7 = vpop.f32.mrf.mxu1 }
 0x47d   : > { %v1761_v25 = vmul.f32 %v1725_v7, %v5342_v51  ;;  %v1784_v7 = vadd.f32 %v1783_v26, %v1782_v4 }
 0x47f   : > { %v1798_v28 = vsel %vm6563_vm2, %v1761_v25, 0.0 }
 0x484   : > { %v1728_v24 = vpop.f32.mrf.mxu1 }
 0x485   : > { %v1762_v44 = vmul.f32 %v1728_v24, %v5324_v34 }
 0x487   : > { %v1799_v47 = vsel %vm6563_vm2, %v1762_v44, 0.0 }
 0x488   : > { %v1800_v0 = vadd.f32 %v1799_v47, %v1798_v28 }
 0x48a   : > { %v1801_v6 = vrot.slane %v1800_v0, 4 }
 0x48c   : > { %v1731_v36 = vpop.f32.mrf.mxu1 }
 0x48d   : > { %v1763_v46 = vmul.f32 %v1731_v36, %v5352_v17  ;;  %v1793_v36 = vadd.f32 %v1792_v33, %v1791_v61 }
 0x48f   : > { %v1807_v45 = vsel %vm6563_vm2, %v1763_v46, 0.0  ;;  %v1794_v18 = vrot.slane %v1793_v36, 2 }
 0x494   : > { %v1734_v43 = vpop.f32.mrf.mxu1 }
 0x495   : > { %v1764_v58 = vmul.f32 %v1734_v43, %v5334_v2 }
 0x497   : > { %v1808_v59 = vsel %vm6563_vm2, %v1764_v58, 0.0 }
 0x498   : > { %v1809_v12 = vadd.f32 %v1808_v59, %v1807_v45 }
 0x49a   : > { %v1810_v31 = vrot.slane %v1809_v12, 4 }
 0x49c   : > { %v1737_v63 = vpop.f32.mrf.mxu1  ;;  %v1811_v15 = vadd.f32 %v1810_v31, %v1809_v12 }
 0x49d   : > { %v1765_v22 = vmul.f32 %v1737_v63, %v5361_v57  ;;  %v1775_v63 = vadd.f32 %v1774_v10, %v1773_v35 }
 0x49e   : > { %v1812_v58 = vrot.slane %v1811_v15, 2 }
 0x49f   : > { %v1816_v23 = vsel %vm6563_vm2, %v1765_v22, 0.0  ;;  %v1776_v19 = vrot.slane %v1775_v63, 2 }
 0x4a0   : > { %v1813_v22 = vadd.f32 %v1812_v58, %v1811_v15 }
 0x4a1   : > { %v1777_v3 = vadd.f32 %v1776_v19, %v1775_v63 }
 0x4a2   : > { %v1814_v45 = vrot.slane %v1813_v22, 1 }
 0x4a4   : > { %v1740_v1 = vpop.f32.mrf.mxu1 }
 0x4a5   : > { %v1766_v38 = vmul.f32 %v1740_v1, %v5344_v56  ;;  %v1802_v1 = vadd.f32 %v1801_v6, %v1800_v0 }
 0x4a7   : > { %v1817_v54 = vsel %vm6563_vm2, %v1766_v38, 0.0  ;;  %v1803_v49 = vrot.slane %v1802_v1, 2  ;;  %v1795_v38 = vadd.f32 %v1794_v18, %v1793_v36 }
 0x4a8   : > { %v1818_v29 = vadd.f32 %v1817_v54, %v1816_v23 }
 0x4a9   : > { %v1804_v52 = vadd.f32 %v1803_v49, %v1802_v1  ;;  %v1796_v59 = vrot.slane %v1795_v38, 1 }
 0x4aa   : > { %v1819_v24 = vrot.slane %v1818_v29, 4 }
 0x4ab   : > { %v1805_v35 = vrot.slane %v1804_v52, 1 }
 0x4ac   : > { %v1743_v60 = vpop.f32.mrf.mxu1  ;;  %v1820_v20 = vadd.f32 %v1819_v24, %v1818_v29 }
 0x4ad   : > { %v1767_v53 = vmul.f32 %v1743_v60, %v5382_v41  ;;  %v1785_v60 = vrot.slane %v1784_v7, 2  ;;  %v5861_v33 = vadd.f32 %v1805_v35, %v1804_v52 }
 0x4ae   : > { %v1821_v25 = vrot.slane %v1820_v20, 2 }
 0x4af   : > { %v1825_v5 = vsel %vm6563_vm2, %v1767_v53, 0.0  ;;  %v1786_v13 = vadd.f32 %v1785_v60, %v1784_v7  ;;  %v1778_v53 = vrot.slane %v1777_v3, 1  ;;  %v1846_v36 = vmul.f32 %v5861_v33, %v5861_v33 }
 0x4b0   : > { %v1822_v21 = vadd.f32 %v1821_v25, %v1820_v20 }
 0x4b1   : > { %v1787_v4 = vrot.slane %v1786_v13, 1  ;;  %v5859_v29 = vadd.f32 %v1778_v53, %v1777_v3 }
 0x4b2   : > { %v1823_v12 = vrot.slane %v1822_v21, 1 }
 0x4b3   : > { %v1843_v24 = vmul.f32 %v5859_v29, %v5859_v29 }
 0x4b4   : > { %v1746_v14 = vpop.f32.mrf.mxu1  ;;  %v5867_v6 = vadd.f32 %v1823_v12, %v1822_v21 }
 0x4b5   : > { %v1768_v55 = vmul.f32 %v1746_v14, %v5389_v9  ;;  %v5855_v14 = vadd.f32 %v1787_v4, %v1786_v13 }
 0x4b7   : > { %v1826_v39 = vsel %vm6563_vm2, %v1768_v55, 0.0  ;;  %v5857_v55 = vadd.f32 %v1796_v59, %v1795_v38  ;;  %v1844_v10 = vmul.f32 %v5855_v14, %v5855_v14 }
 0x4b8   : > { %v1827_v30 = vadd.f32 %v1826_v39, %v1825_v5  ;;  %v5863_v39 = vadd.f32 %v1814_v45, %v1813_v22 }
 0x4b9   : > { %v1845_v31 = vmul.f32 %v5857_v55, %v5857_v55  ;;  %v1859_v1 = vsel %vm921_vm3, %v1844_v10, %v1843_v24 }
 0x4ba   : > { %v1828_v43 = vrot.slane %v1827_v30, 4  ;;  %v1847_v63 = vmul.f32 %v5863_v39, %v5863_v39 }
 0x4bb   : > { %v1860_v60 = vsel %vm923_vm4, %v1845_v31, %v1859_v1 }
 0x4bc   : > { %v1749_v11 = vpop.f32.mrf.mxu1  ;;  %v1829_v44 = vadd.f32 %v1828_v43, %v1827_v30  ;;  %v1861_v18 = vsel %vm6567_vm5, %v1846_v36, %v1860_v60 }
 0x4bd   : > { %v1769_v46 = vmul.f32 %v1749_v11, %v5435_v27  ;;  %v1848_v11 = vmul.f32 %v5867_v6, %v5867_v6  ;;  %v1862_v19 = vsel %vm6566_vm6, %v1847_v63, %v1861_v18 }
 0x4be   : > { %v1830_v50 = vrot.slane %v1829_v44, 2 }
 0x4bf   : > { %v1834_v28 = vsel %vm6563_vm2, %v1769_v46, 0.0  ;;  %v1863_v58 = vsel %vm6565_vm7, %v1848_v11, %v1862_v19 }
 0x4c0   : > { %v1831_v61 = vadd.f32 %v1830_v50, %v1829_v44 }
 0x4c2   : > { %v1832_v26 = vrot.slane %v1831_v61, 1 }
 0x4c4   : > { %v1752_v47 = vpop.f32.mrf.mxu1  ;;  %v5871_v7 = vadd.f32 %v1832_v26, %v1831_v61 }
 0x4c5   : > { %v1770_v48 = vmul.f32 %v1752_v47, %v5443_v16 }
 0x4c6   : > { %v1849_v20 = vmul.f32 %v5871_v7, %v5871_v7 }
 0x4c7   : > { %v1835_v54 = vsel %vm6563_vm2, %v1770_v48, 0.0 }
 0x4c8   : > { %v1836_v0 = vadd.f32 %v1835_v54, %v1834_v28  ;;  %v1864_v13 = vsel %vm6564_vm8, %v1849_v20, %v1863_v58 }
 0x4ca   : > { %v1837_v23 = vrot.slane %v1836_v0, 4 }
 0x4cc   : > { %v1838_v5 = vadd.f32 %v1837_v23, %v1836_v0 }
 0x4ce   : > { %v1839_v30 = vrot.slane %v1838_v5, 2 }
 0x4d0   : > { %v1840_v43 = vadd.f32 %v1839_v30, %v1838_v5 }
 0x4d2   : > { %v1841_v15 = vrot.slane %v1840_v43, 1 }
 0x4d4   : > { %v5886_v44 = vadd.f32 %v1841_v15, %v1840_v43 }
 0x4d6   : > { %v1850_v49 = vmul.f32 %v5886_v44, %v5886_v44 }
 0x4d8   : > { %v1865_v25 = vsel %vm6562_vm9, %v1850_v49, %v1864_v13 }
 0x4d9   : > { %4044 = vmatmul.msk.f32.vlgmr.msra.gmra.mxu0 %vm6563_vm2, %v1865_v25 }
 0x556   : > { %v1885_v38 = vpop.f32.mrf.mxu0 }
 0x557   : > { %v1886_v50 = vadd.f32 1e-07, %v1885_v38 }
 0x559   : > { %4325 = vrsqrt.f32 %v1886_v50  ;;  %vm1895_vm1 = vcmp.eq.f32.partialorder %v1886_v50, inf  ;;  %v1898_v21 = vand.u32 2147483648, %v1886_v50  ;;  %vm1897_vm0 = vcmp.eq.f32.partialorder %v1886_v50, 0.0 }
 0x55f   : > { %v4326_v46 = vpop.eup %4325 }
 0x560   : > { %v1889_v3 = vmul.f32 %v4326_v46, %v1886_v50 }
 0x562   : > { %v1890_v52 = vmul.f32 %v4326_v46, %v1889_v3 }
 0x564   : > { %v1891_v47 = vmul.f32 0.5, %v1890_v52 }
 0x566   : > { %v1892_v22 = vsub.f32 1.5, %v1891_v47 }
 0x568   : > { %v1893_v48 = vmul.f32 %v4326_v46, %v1892_v22 }
 0x56a   : > { %v1894_v4 = vmul.f32 %v1893_v48, %v1886_v50 }
 0x56c   : > { %v1896_v59 = vsel %vm1895_vm1, %v1886_v50, %v1894_v4 }
 0x56d   : > { %v5895_v61 = vsel %vm1897_vm0, %v1898_v21, %v1896_v59 }
 0x56e   : > { %4327 = vrcp.f32 %v5895_v61  ;;  %v1901_v28 = vrot.slane %v5895_v61, 1  ;;  %v1927_v45 = vand.u32 2147483648, %v5895_v61  ;;  %v1902_v23 = vrot.slane %v5895_v61, 2 }
 0x56f   : > { %v1925_v5 = vand.u32 2147483647, %v5895_v61  ;;  %vm1921_vm12 = vweird.f32 %v5895_v61  ;;  %v1903_v25 = vrot.slane %v5895_v61, 3 }
 0x570   : > { %4329 = vrcp.f32 %v1901_v28  ;;  %v1928_v31 = vor.u32 1.1754944e-38, %v1927_v45  ;;  %v1942_v60 = vand.u32 2147483648, %v1901_v28  ;;  %vm1936_vm1 = vweird.f32 %v1901_v28 }
 0x571   : > { %4331 = vrcp.f32 %v1902_v23  ;;  %vm1926_vm14 = vcmp.eq.f32.partialorder %v1925_v5, 8.507059e+37  ;;  %v1940_v18 = vand.u32 2147483647, %v1901_v28  ;;  %v1957_v22 = vand.u32 2147483648, %v1902_v23 }
 0x572   : > { %v1943_v58 = vor.u32 1.1754944e-38, %v1942_v60  ;;  %4333 = vrcp.f32 %v1903_v25  ;;  %v1955_v4 = vand.u32 2147483647, %v1902_v23  ;;  %v1972_v5 = vand.u32 2147483648, %v1903_v25 }
 0x574   : > { %v4328_v54 = vpop.eup %4327 }
 0x575   : > { %v1917_v53 = vmul.f32 %v4328_v54, %v5895_v61  ;;  %vm1922_vm11 = vweird.f32 %v4328_v54 }
 0x576   : > { %v4330_v35 = vpop.eup %4329  ;;  %vm1923_vm10 = vmor %vm1921_vm12, %vm1922_vm11  ;;  %vm1941_vm11 = vcmp.eq.f32.partialorder %v1940_v18, 8.507059e+37 }
 0x577   : > { %v1918_v0 = vsub.f32 1.0, %v1917_v53  ;;  %v1932_v12 = vmul.f32 %v4330_v35, %v1901_v28  ;;  %vm1937_vm15 = vweird.f32 %v4330_v35  ;;  %v4332_v15 = vpop.eup %4331  ;;  %v1958_v28 = vor.u32 1.1754944e-38, %v1957_v22 }
 0x578   : > { %vm1938_vm0 = vmor %vm1936_vm1, %vm1937_vm15  ;;  %v1947_v49 = vmul.f32 %v4332_v15, %v1902_v23  ;;  %vm1952_vm12 = vweird.f32 %v4332_v15  ;;  %v4334_v47 = vpop.eup %4333  ;;  %vm1956_vm15 = vcmp.eq.f32.partialorder %v1955_v4, 8.507059e+37 }
 0x579   : > { %v1919_v26 = vmul.f32 %v4328_v54, %v1918_v0  ;;  %v1933_v10 = vsub.f32 1.0, %v1932_v12  ;;  %v1962_v59 = vmul.f32 %v4334_v47, %v1903_v25  ;;  %vm1967_vm1 = vweird.f32 %v4334_v47 }
 0x57b   : > { %v1920_v30 = vadd.f32 %v4328_v54, %v1919_v26  ;;  %v1934_v36 = vmul.f32 %v4330_v35, %v1933_v10  ;;  %v1963_v53 = vsub.f32 1.0, %v1962_v59 }
 0x57d   : > { %v1924_v24 = vsel %vm1923_vm10, %v4328_v54, %v1920_v30  ;;  %v1935_v11 = vadd.f32 %v4330_v35, %v1934_v36  ;;  %vm1951_vm10 = vweird.f32 %v1902_v23  ;;  %v1904_v54 = vrot.slane %v5895_v61, 4 }
 0x57e   : > { %v1929_v43 = vsel %vm1926_vm14, %v1928_v31, %v1924_v24  ;;  %vm1953_vm14 = vmor %vm1951_vm10, %vm1952_vm12  ;;  %v1964_v45 = vmul.f32 %v4334_v47, %v1963_v53  ;;  %v1970_v30 = vand.u32 2147483647, %v1903_v25  ;;  %v1973_v36 = vor.u32 1.1754944e-38, %v1972_v5 }
 0x57f   : > { %v1930_v63 = vmul.f32 %v1929_v43, %v5859_v29  ;;  %v1939_v19 = vsel %vm1938_vm0, %v4330_v35, %v1935_v11  ;;  %v1948_v29 = vsub.f32 1.0, %v1947_v49  ;;  %4335 = vrcp.f32 %v1904_v54 }
 0x580   : > { %v1944_v13 = vsel %vm1941_vm11, %v1943_v58, %v1939_v19  ;;  %v1965_v23 = vadd.f32 %v4334_v47, %v1964_v45  ;;  %vm1966_vm0 = vweird.f32 %v1903_v25  ;;  %vm1971_vm12 = vcmp.eq.f32.partialorder %v1970_v30, 8.507059e+37 }
 0x581   : > { %v2036_v1 = vperm.slane %v1930_v63, 0  ;;  %v1945_v50 = vmul.f32 %v1944_v13, %v5855_v14  ;;  %v1949_v46 = vmul.f32 %v4332_v15, %v1948_v29  ;;  %vm1968_vm11 = vmor %vm1966_vm0, %vm1967_vm1  ;;  %v1905_v43 = vrot.slane %v5895_v61, 5 }
 0x582   : > { %v1969_v31 = vsel %vm1968_vm11, %v4334_v47, %v1965_v23  ;;  %v1987_v19 = vand.u32 2147483648, %v1904_v54  ;;  %v1985_v58 = vand.u32 2147483647, %v1904_v54  ;;  %v1907_v53 = vrot.slane %v5895_v61, 7 }
 0x583   : > { %v2044_v20 = vmul.f32 %v2036_v1, %v5337_v37  ;;  %v2045_v38 = vmul.f32 %v2036_v1, %v5318_v62  ;;  %v2037_v3 = vperm.slane %v1945_v50, 0  ;;  %v1950_v52 = vadd.f32 %v4332_v15, %v1949_v46 }
 0x584   : > { %4337 = vrcp.f32 %v1905_v43  ;;  %v1988_v29 = vor.u32 1.1754944e-38, %v1987_v19  ;;  %vm1986_vm1 = vcmp.eq.f32.partialorder %v1985_v58, 8.507059e+37  ;;  %v2002_v4 = vand.u32 2147483648, %v1905_v43 }
 0x585   : > { %4046 = vmatmul.msk.f32.vlgmr.msra.gmra.mxu2 %vm6563_vm2, %v2044_v20  ;;  %v2046_v48 = vmul.f32 %v2037_v3, %v5321_v8  ;;  %v1954_v21 = vsel %vm1953_vm14, %v4332_v15, %v1950_v52  ;;  %v2047_v35 = vmul.f32 %v2037_v3, %v5305_v42  ;;  %v4336_v26 = vpop.eup %4335  ;;  %vm1981_vm14 = vweird.f32 %v1904_v54 }
 0x586   : > { %v1959_v14 = vsel %vm1956_vm15, %v1958_v28, %v1954_v21  ;;  %v1977_v24 = vmul.f32 %v4336_v26, %v1904_v54  ;;  %vm1982_vm10 = vweird.f32 %v4336_v26  ;;  %vm1996_vm11 = vweird.f32 %v1905_v43 }
 0x587   : > { %v1960_v0 = vmul.f32 %v1959_v14, %v5857_v55  ;;  %v1974_v55 = vsel %vm1971_vm12, %v1973_v36, %v1969_v31  ;;  %vm1983_vm15 = vmor %vm1981_vm14, %vm1982_vm10  ;;  %v2000_v59 = vand.u32 2147483647, %v1905_v43  ;;  %v2003_v54 = vor.u32 1.1754944e-38, %v2002_v4 }
 0x588   : > { %v1978_v63 = vsub.f32 1.0, %v1977_v24  ;;  %v1975_v11 = vmul.f32 %v1974_v55, %v5861_v33 }
 0x589   : > { %v2038_v12 = vperm.slane %v1960_v0, 0  ;;  %vm2001_vm10 = vcmp.eq.f32.partialorder %v2000_v59, 8.507059e+37 }
 0x58a   : > { %v1979_v15 = vmul.f32 %v4336_v26, %v1978_v63  ;;  %v2039_v60 = vperm.slane %v1975_v11, 0  ;;  %v4338_v18 = vpop.eup %4337 }
 0x58b   : > { %v2048_v10 = vmul.f32 %v2038_v12, %v5331_v40  ;;  %v2049_v1 = vmul.f32 %v2038_v12, %v5314_v32  ;;  %v1992_v25 = vmul.f32 %v4338_v18, %v1905_v43  ;;  %vm1997_vm0 = vweird.f32 %v4338_v18 }
 0x58c   : > { %v1980_v20 = vadd.f32 %v4336_v26, %v1979_v15  ;;  %v2050_v49 = vmul.f32 %v2039_v60, %v5342_v51  ;;  %v2051_v46 = vmul.f32 %v2039_v60, %v5324_v34  ;;  %vm1998_vm12 = vmor %vm1996_vm11, %vm1997_vm0  ;;  %v2032_v60 = vand.u32 2147483648, %v1907_v53 }
 0x58d   : > { %4047 = vmatmul.msk.f32.gmra.mxu2 %vm6563_vm2, %v2045_v38  ;;  %v1906_v38 = vrot.slane %v5895_v61, 6  ;;  %v1993_v50 = vsub.f32 1.0, %v1992_v25 }
 0x58e   : > { %v1984_v13 = vsel %vm1983_vm15, %v4336_v26, %v1980_v20 }
 0x58f   : > { %v1989_v33 = vsel %vm1986_vm1, %v1988_v29, %v1984_v13  ;;  %4339 = vrcp.f32 %v1906_v38  ;;  %v1994_v52 = vmul.f32 %v4338_v18, %v1993_v50  ;;  %vm2011_vm15 = vweird.f32 %v1906_v38 }
 0x590   : > { %v1990_v3 = vmul.f32 %v1989_v33, %v5863_v39  ;;  %4341 = vrcp.f32 %v1907_v53  ;;  %v2015_v31 = vand.u32 2147483647, %v1906_v38 }
 0x591   : > { %v1995_v22 = vadd.f32 %v4338_v18, %v1994_v52 }
 0x592   : > { %v2040_v47 = vperm.slane %v1990_v3, 0  ;;  %vm2016_vm0 = vcmp.eq.f32.partialorder %v2015_v31, 8.507059e+37 }
 0x593   : > { %v1999_v28 = vsel %vm1998_vm12, %v4338_v18, %v1995_v22  ;;  %vm2026_vm12 = vweird.f32 %v1907_v53  ;;  %v2030_v18 = vand.u32 2147483647, %v1907_v53 }
 0x594   : > { %v2052_v21 = vmul.f32 %v2040_v47, %v5352_v17  ;;  %v2004_v39 = vsel %vm2001_vm10, %v2003_v54, %v1999_v28  ;;  %v2053_v0 = vmul.f32 %v2040_v47, %v5334_v2 }
 0x595   : > { %4048 = vmatmul.msk.f32.gmra.mxu2 %vm6563_vm2, %v2046_v48  ;;  %v4340_v48 = vpop.eup %4339  ;;  %v2005_v45 = vmul.f32 %v2004_v39, %v5867_v6 }
 0x596   : > { %v2007_v14 = vmul.f32 %v4340_v48, %v1906_v38  ;;  %vm2012_vm14 = vweird.f32 %v4340_v48  ;;  %v4342_v5 = vpop.eup %4341 }
 0x597   : > { %v2041_v23 = vperm.slane %v2005_v45, 0  ;;  %vm2013_vm1 = vmor %vm2011_vm15, %vm2012_vm14  ;;  %v2022_v24 = vmul.f32 %v4342_v5, %v1907_v53  ;;  %vm2027_vm11 = vweird.f32 %v4342_v5  ;;  %vm2031_vm14 = vcmp.eq.f32.partialorder %v2030_v18, 8.507059e+37 }
 0x598   : > { %vm2028_vm10 = vmor %vm2026_vm12, %vm2027_vm11 }
 0x599   : > { %v2054_v30 = vmul.f32 %v2041_v23, %v5361_v57  ;;  %v2023_v55 = vsub.f32 1.0, %v2022_v24  ;;  %v2055_v43 = vmul.f32 %v2041_v23, %v5344_v56 }
 0x59d   : > { %4049 = vmatmul.msk.f32.gmra.mxu2 %vm6563_vm2, %v2047_v35  ;;  %v2008_v35 = vsub.f32 1.0, %v2007_v14 }
 0x59f   : > { %v2009_v12 = vmul.f32 %v4340_v48, %v2008_v35 }
 0x5a1   : > { %v2010_v26 = vadd.f32 %v4340_v48, %v2009_v12 }
 0x5a3   : > { %v2014_v61 = vsel %vm2013_vm1, %v4340_v48, %v2010_v26 }
 0x5a5   : > { %4050 = vmatmul.msk.f32.gmra.mxu2 %vm6563_vm2, %v2048_v10  ;;  %v2017_v10 = vand.u32 2147483648, %v1906_v38 }
 0x5a7   : > { %v2018_v36 = vor.u32 1.1754944e-38, %v2017_v10 }
 0x5a9   : > { %v2019_v6 = vsel %vm2016_vm0, %v2018_v36, %v2014_v61 }
 0x5aa   : > { %v2020_v63 = vmul.f32 %v2019_v6, %v5871_v7 }
 0x5ac   : > { %v2042_v11 = vperm.slane %v2020_v63, 0 }
 0x5ad   : > { %4051 = vmatmul.msk.f32.gmra.mxu2 %vm6563_vm2, %v2049_v1  ;;  %v2024_v1 = vmul.f32 %v4342_v5, %v2023_v55 }
 0x5ae   : > { %v2056_v20 = vmul.f32 %v2042_v11, %v5382_v41  ;;  %v2057_v7 = vmul.f32 %v2042_v11, %v5389_v9 }
 0x5af   : > { %v2025_v15 = vadd.f32 %v4342_v5, %v2024_v1 }
 0x5b1   : > { %v2029_v19 = vsel %vm2028_vm10, %v4342_v5, %v2025_v15 }
 0x5b5   : > { %4052 = vmatmul.msk.f32.gmra.mxu2 %vm6563_vm2, %v2050_v49  ;;  %v2033_v49 = vor.u32 1.1754944e-38, %v2032_v60 }
 0x5b7   : > { %v2034_v58 = vsel %vm2031_vm14, %v2033_v49, %v2029_v19 }
 0x5b8   : > { %v2035_v13 = vmul.f32 %v2034_v58, %v5886_v44 }
 0x5ba   : > { %v2043_v25 = vperm.slane %v2035_v13, 0 }
 0x5bc   : > { %v2058_v29 = vmul.f32 %v2043_v25, %v5435_v27  ;;  %v2059_v33 = vmul.f32 %v2043_v25, %v5443_v16 }
 0x5bd   : > { %4053 = vmatmul.msk.f32.gmra.mxu2 %vm6563_vm2, %v2051_v46 }
 0x5c5   : > { %4054 = vmatmul.msk.f32.gmra.mxu2 %vm6563_vm2, %v2052_v21 }
 0x5cd   : > { %4055 = vmatmul.msk.f32.gmra.mxu2 %vm6563_vm2, %v2053_v0 }
 0x5d5   : > { %4056 = vmatmul.msk.f32.gmra.mxu2 %vm6563_vm2, %v2054_v30 }
 0x5dd   : > { %4057 = vmatmul.msk.f32.gmra.mxu2 %vm6563_vm2, %v2055_v43 }
 0x5e5   : > { %4058 = vmatmul.msk.f32.gmra.mxu2 %vm6563_vm2, %v2056_v20 }
 0x5ed   : > { %4059 = vmatmul.msk.f32.gmra.mxu2 %vm6563_vm2, %v2057_v7 }
 0x5f5   : > { %4060 = vmatmul.msk.f32.gmra.mxu2 %vm6563_vm2, %v2058_v29 }
 0x5fd   : > { %4061 = vmatmul.msk.f32.gmra.mxu2 %vm6563_vm2, %v2059_v33 }
 0x608   : > { %v2125_v38 = vpop.f32.mrf.mxu2 }
 0x609   : > { %v2173_v50 = vmul.f32 1.442695, %v2125_v38 }
 0x60b   : > { %4343 = vpow2.f32 %v2173_v50 }
 0x610   : > { %v2128_v46 = vpop.f32.mrf.mxu2 }
 0x611   : > { %v5949_v3 = vpop.eup %4343  ;;  %v2175_v52 = vmul.f32 1.442695, %v2128_v46 }
 0x612   : > { %4063 = vmatmul.msk.f32.vlgmr.msra.gmra.mxu3 %vm1281_vm13, %v5949_v3 }
 0x613   : > { %4345 = vpow2.f32 %v2175_v52 }
 0x618   : > { %v2131_v44 = vpop.f32.mrf.mxu2 }
 0x619   : > { %v5953_v47 = vpop.eup %4345  ;;  %v2177_v22 = vmul.f32 1.442695, %v2131_v44 }
 0x61a   : > { %4064 = vmatmul.msk.f32.gmra.mxu3 %vm1281_vm13, %v5953_v47 }
 0x61b   : > { %4347 = vpow2.f32 %v2177_v22 }
 0x620   : > { %v2134_v48 = vpop.f32.mrf.mxu2 }
 0x621   : > { %v5957_v4 = vpop.eup %4347  ;;  %v2179_v21 = vmul.f32 1.442695, %v2134_v48 }
 0x622   : > { %4065 = vmatmul.msk.f32.gmra.mxu3 %vm1281_vm13, %v5957_v4 }
 0x623   : > { %4349 = vpow2.f32 %v2179_v21 }
 0x628   : > { %v2137_v59 = vpop.f32.mrf.mxu2 }
 0x629   : > { %v5961_v28 = vpop.eup %4349  ;;  %v2181_v14 = vmul.f32 1.442695, %v2137_v59 }
 0x62a   : > { %4066 = vmatmul.msk.f32.gmra.mxu3 %vm1281_vm13, %v5961_v28 }
 0x62b   : > { %4351 = vpow2.f32 %v2181_v14 }
 0x630   : > { %v2140_v54 = vpop.f32.mrf.mxu2 }
 0x631   : > { %v5965_v39 = vpop.eup %4351  ;;  %v2183_v53 = vmul.f32 1.442695, %v2140_v54 }
 0x632   : > { %4067 = vmatmul.msk.f32.gmra.mxu3 %vm1281_vm13, %v5965_v39 }
 0x633   : > { %4353 = vpow2.f32 %v2183_v53 }
 0x638   : > { %v2143_v35 = vpop.f32.mrf.mxu2 }
 0x639   : > { %v5969_v0 = vpop.eup %4353  ;;  %v2185_v45 = vmul.f32 1.442695, %v2143_v35 }
 0x63a   : > { %4068 = vmatmul.msk.f32.gmra.mxu3 %vm1281_vm13, %v5969_v0 }
 0x63b   : > { %4355 = vpow2.f32 %v2185_v45 }
 0x640   : > { %v2146_v12 = vpop.f32.mrf.mxu2 }
 0x641   : > { %v5973_v23 = vpop.eup %4355  ;;  %v2187_v26 = vmul.f32 1.442695, %v2146_v12 }
 0x642   : > { %4069 = vmatmul.msk.f32.gmra.mxu3 %vm1281_vm13, %v5973_v23 }
 0x643   : > { %4357 = vpow2.f32 %v2187_v26 }
 0x648   : > { %v2149_v5 = vpop.f32.mrf.mxu2 }
 0x649   : > { %v5977_v10 = vpop.eup %4357  ;;  %v2189_v30 = vmul.f32 1.442695, %v2149_v5 }
 0x64a   : > { %4070 = vmatmul.msk.f32.gmra.mxu3 %vm1281_vm13, %v5977_v10 }
 0x64b   : > { %4359 = vpow2.f32 %v2189_v30 }
 0x650   : > { %v2152_v31 = vpop.f32.mrf.mxu2 }
 0x651   : > { %v5981_v61 = vpop.eup %4359  ;;  %v2191_v24 = vmul.f32 1.442695, %v2152_v31 }
 0x652   : > { %4071 = vmatmul.msk.f32.gmra.mxu3 %vm1281_vm13, %v5981_v61 }
 0x653   : > { %4361 = vpow2.f32 %v2191_v24 }
 0x658   : > { %v2155_v36 = vpop.f32.mrf.mxu2 }
 0x659   : > { %v5985_v6 = vpop.eup %4361  ;;  %v2193_v55 = vmul.f32 1.442695, %v2155_v36 }
 0x65a   : > { %4072 = vmatmul.msk.f32.gmra.mxu3 %vm1281_vm13, %v5985_v6 }
 0x65b   : > { %4363 = vpow2.f32 %v2193_v55 }
 0x660   : > { %v2158_v43 = vpop.f32.mrf.mxu2 }
 0x661   : > { %v5989_v63 = vpop.eup %4363  ;;  %v2195_v1 = vmul.f32 1.442695, %v2158_v43 }
 0x662   : > { %4073 = vmatmul.msk.f32.gmra.mxu3 %vm1281_vm13, %v5989_v63 }
 0x663   : > { %4365 = vpow2.f32 %v2195_v1 }
 0x668   : > { %v2161_v11 = vpop.f32.mrf.mxu2 }
 0x669   : > { %v5993_v15 = vpop.eup %4365  ;;  %v2197_v60 = vmul.f32 1.442695, %v2161_v11 }
 0x66a   : > { %4074 = vmatmul.msk.f32.gmra.mxu3 %vm1281_vm13, %v5993_v15 }
 0x66b   : > { %4367 = vpow2.f32 %v2197_v60 }
 0x670   : > { %v2164_v20 = vpop.f32.mrf.mxu2 }
 0x671   : > { %v5997_v18 = vpop.eup %4367  ;;  %v2199_v19 = vmul.f32 1.442695, %v2164_v20 }
 0x672   : > { %4075 = vmatmul.msk.f32.gmra.mxu3 %vm1281_vm13, %v5997_v18 }
 0x673   : > { %4369 = vpow2.f32 %v2199_v19 }
 0x678   : > { %v2167_v49 = vpop.f32.mrf.mxu2 }
 0x679   : > { %v6001_v58 = vpop.eup %4369  ;;  %v2201_v7 = vmul.f32 1.442695, %v2167_v49 }
 0x67a   : > { %4076 = vmatmul.msk.f32.gmra.mxu3 %vm1281_vm13, %v6001_v58 }
 0x67b   : > { %4371 = vpow2.f32 %v2201_v7 }
 0x680   : > { %v2170_v13 = vpop.f32.mrf.mxu2 }
 0x681   : > { %v6005_v25 = vpop.eup %4371  ;;  %v2203_v29 = vmul.f32 1.442695, %v2170_v13 }
 0x682   : > { %4077 = vmatmul.msk.f32.gmra.mxu3 %vm1281_vm13, %v6005_v25 }
 0x683   : > { %4373 = vpow2.f32 %v2203_v29 }
 0x689   : > { %v6009_v33 = vpop.eup %4373 }
 0x68a   : > { %4078 = vmatmul.msk.f32.gmra.mxu3 %vm1281_vm13, %v6009_v33 }
 0x695   : > { %v2270_v38 = vpop.f32.mrf.mxu3 }
 0x696   : > { %4375 = vrcp.f32 %v2270_v38  ;;  %v2329_v22 = vand.u32 2147483648, %v2270_v38  ;;  %v2327_v21 = vand.u32 2147483647, %v2270_v38  ;;  %vm2323_vm1 = vweird.f32 %v2270_v38 }
 0x698   : > { %v2330_v54 = vor.u32 1.1754944e-38, %v2329_v22  ;;  %vm2328_vm11 = vcmp.eq.f32.partialorder %v2327_v21, 8.507059e+37 }
 0x69c   : > { %v4376_v50 = vpop.eup %4375 }
 0x69d   : > { %v2319_v46 = vmul.f32 %v4376_v50, %v2270_v38  ;;  %v2273_v52 = vpop.f32.mrf.mxu3  ;;  %vm2324_vm15 = vweird.f32 %v4376_v50 }
 0x69e   : > { %4377 = vrcp.f32 %v2273_v52  ;;  %vm2325_vm0 = vmor %vm2323_vm1, %vm2324_vm15  ;;  %v2344_v30 = vand.u32 2147483648, %v2273_v52  ;;  %v2342_v24 = vand.u32 2147483647, %v2273_v52  ;;  %vm2338_vm10 = vweird.f32 %v2273_v52 }
 0x69f   : > { %v2320_v44 = vsub.f32 1.0, %v2319_v46 }
 0x6a0   : > { %v2345_v43 = vor.u32 1.1754944e-38, %v2344_v30  ;;  %vm2343_vm15 = vcmp.eq.f32.partialorder %v2342_v24, 8.507059e+37 }
 0x6a1   : > { %v2321_v48 = vmul.f32 %v4376_v50, %v2320_v44 }
 0x6a3   : > { %v2322_v59 = vadd.f32 %v4376_v50, %v2321_v48 }
 0x6a4   : > { %v4378_v14 = vpop.eup %4377 }
 0x6a5   : > { %v2326_v53 = vsel %vm2325_vm0, %v4376_v50, %v2322_v59  ;;  %v2334_v35 = vmul.f32 %v4378_v14, %v2273_v52  ;;  %v2276_v45 = vpop.f32.mrf.mxu3  ;;  %vm2339_vm12 = vweird.f32 %v4378_v14 }
 0x6a6   : > { %v2331_v12 = vsel %vm2328_vm11, %v2330_v54, %v2326_v53  ;;  %4379 = vrcp.f32 %v2276_v45  ;;  %vm2340_vm14 = vmor %vm2338_vm10, %vm2339_vm12  ;;  %v2359_v49 = vand.u32 2147483648, %v2276_v45  ;;  %v2357_v13 = vand.u32 2147483647, %v2276_v45 }
 0x6a7   : > { %v2332_v26 = vmul.f32 %v5949_v3, %v2331_v12  ;;  %v2335_v5 = vsub.f32 1.0, %v2334_v35  ;;  %vm2353_vm0 = vweird.f32 %v2276_v45 }
 0x6a8   : > { %v2360_v50 = vor.u32 1.1754944e-38, %v2359_v49  ;;  %vm2358_vm12 = vcmp.eq.f32.partialorder %v2357_v13, 8.507059e+37 }
 0x6a9   : > { %v2336_v31 = vmul.f32 %v4378_v14, %v2335_v5  ;;  %4080 = vmatmul.msk.f32.vlgmr.msrb.gmra.mxu0 %vm1281_vm13, %v2332_v26 }
 0x6ab   : > { %v2337_v36 = vadd.f32 %v4378_v14, %v2336_v31 }
 0x6ac   : > { %v4380_v55 = vpop.eup %4379 }
 0x6ad   : > { %v2349_v1 = vmul.f32 %v4380_v55, %v2276_v45  ;;  %v2279_v11 = vpop.f32.mrf.mxu3  ;;  %v2341_v60 = vsel %vm2340_vm14, %v4378_v14, %v2337_v36  ;;  %vm2354_vm1 = vweird.f32 %v4380_v55 }
 0x6ae   : > { %4381 = vrcp.f32 %v2279_v11  ;;  %v2346_v20 = vsel %vm2343_vm15, %v2345_v43, %v2341_v60  ;;  %vm2355_vm11 = vmor %vm2353_vm0, %vm2354_vm1  ;;  %v2374_v21 = vand.u32 2147483648, %v2279_v11  ;;  %v2372_v14 = vand.u32 2147483647, %v2279_v11 }
 0x6af   : > { %v2350_v19 = vsub.f32 1.0, %v2349_v1  ;;  %v2347_v3 = vmul.f32 %v5953_v47, %v2346_v20  ;;  %vm2368_vm14 = vweird.f32 %v2279_v11 }
 0x6b0   : > { %v2375_v35 = vor.u32 1.1754944e-38, %v2374_v21  ;;  %vm2373_vm1 = vcmp.eq.f32.partialorder %v2372_v14, 8.507059e+37 }
 0x6b1   : > { %v2351_v7 = vmul.f32 %v4380_v55, %v2350_v19  ;;  %4081 = vmatmul.msk.f32.gmra.mxu0 %vm1281_vm13, %v2347_v3 }
 0x6b3   : > { %v2352_v29 = vadd.f32 %v4380_v55, %v2351_v7 }
 0x6b4   : > { %v4382_v38 = vpop.eup %4381 }
 0x6b5   : > { %v2364_v46 = vmul.f32 %v4382_v38, %v2279_v11  ;;  %v2282_v52 = vpop.f32.mrf.mxu3  ;;  %v2356_v44 = vsel %vm2355_vm11, %v4380_v55, %v2352_v29  ;;  %vm2369_vm10 = vweird.f32 %v4382_v38 }
 0x6b6   : > { %4383 = vrcp.f32 %v2282_v52  ;;  %v2361_v22 = vsel %vm2358_vm12, %v2360_v50, %v2356_v44  ;;  %vm2370_vm15 = vmor %vm2368_vm14, %vm2369_vm10  ;;  %v2389_v31 = vand.u32 2147483648, %v2282_v52  ;;  %v2387_v36 = vand.u32 2147483647, %v2282_v52 }
 0x6b7   : > { %v2365_v48 = vsub.f32 1.0, %v2364_v46  ;;  %v2362_v47 = vmul.f32 %v5957_v4, %v2361_v22  ;;  %vm2383_vm11 = vweird.f32 %v2282_v52 }
 0x6b8   : > { %v2390_v1 = vor.u32 1.1754944e-38, %v2389_v31  ;;  %vm2388_vm10 = vcmp.eq.f32.partialorder %v2387_v36, 8.507059e+37 }
 0x6b9   : > { %v2366_v59 = vmul.f32 %v4382_v38, %v2365_v48  ;;  %4082 = vmatmul.msk.f32.gmra.mxu0 %vm1281_vm13, %v2362_v47 }
 0x6bb   : > { %v2367_v54 = vadd.f32 %v4382_v38, %v2366_v59 }
 0x6bc   : > { %v4384_v53 = vpop.eup %4383 }
 0x6bd   : > { %v2379_v45 = vmul.f32 %v4384_v53, %v2282_v52  ;;  %v2285_v12 = vpop.f32.mrf.mxu3  ;;  %v2371_v26 = vsel %vm2370_vm15, %v4382_v38, %v2367_v54  ;;  %vm2384_vm0 = vweird.f32 %v4384_v53 }
 0x6be   : > { %4385 = vrcp.f32 %v2285_v12  ;;  %v2376_v5 = vsel %vm2373_vm1, %v2375_v35, %v2371_v26  ;;  %vm2385_vm12 = vmor %vm2383_vm11, %vm2384_vm0  ;;  %v2404_v49 = vand.u32 2147483648, %v2285_v12  ;;  %v2402_v13 = vand.u32 2147483647, %v2285_v12 }
 0x6bf   : > { %v2380_v30 = vsub.f32 1.0, %v2379_v45  ;;  %v2377_v4 = vmul.f32 %v5961_v28, %v2376_v5  ;;  %vm2398_vm15 = vweird.f32 %v2285_v12 }
 0x6c0   : > { %v2405_v50 = vor.u32 1.1754944e-38, %v2404_v49  ;;  %vm2403_vm0 = vcmp.eq.f32.partialorder %v2402_v13, 8.507059e+37 }
 0x6c1   : > { %v2381_v24 = vmul.f32 %v4384_v53, %v2380_v30  ;;  %4083 = vmatmul.msk.f32.gmra.mxu0 %vm1281_vm13, %v2377_v4 }
 0x6c3   : > { %v2382_v55 = vadd.f32 %v4384_v53, %v2381_v24 }
 0x6c4   : > { %v4386_v43 = vpop.eup %4385 }
 0x6c5   : > { %v2394_v11 = vmul.f32 %v4386_v43, %v2285_v12  ;;  %v2288_v60 = vpop.f32.mrf.mxu3  ;;  %v2386_v20 = vsel %vm2385_vm12, %v4384_v53, %v2382_v55  ;;  %vm2399_vm14 = vweird.f32 %v4386_v43 }
 0x6c6   : > { %4387 = vrcp.f32 %v2288_v60  ;;  %v2391_v19 = vsel %vm2388_vm10, %v2390_v1, %v2386_v20  ;;  %vm2400_vm1 = vmor %vm2398_vm15, %vm2399_vm14  ;;  %v2419_v21 = vand.u32 2147483648, %v2288_v60  ;;  %v2417_v59 = vand.u32 2147483647, %v2288_v60 }
 0x6c7   : > { %v2395_v3 = vsub.f32 1.0, %v2394_v11  ;;  %v2392_v28 = vmul.f32 %v5965_v39, %v2391_v19  ;;  %vm2413_vm12 = vweird.f32 %v2288_v60 }
 0x6c8   : > { %v2420_v53 = vor.u32 1.1754944e-38, %v2419_v21  ;;  %vm2418_vm14 = vcmp.eq.f32.partialorder %v2417_v59, 8.507059e+37 }
 0x6c9   : > { %v2396_v7 = vmul.f32 %v4386_v43, %v2395_v3  ;;  %4084 = vmatmul.msk.f32.gmra.mxu0 %vm1281_vm13, %v2392_v28 }
 0x6cb   : > { %v2397_v29 = vadd.f32 %v4386_v43, %v2396_v7 }
 0x6cc   : > { %v4388_v38 = vpop.eup %4387 }
 0x6cd   : > { %v2409_v46 = vmul.f32 %v4388_v38, %v2288_v60  ;;  %v2291_v52 = vpop.f32.mrf.mxu3  ;;  %v2401_v44 = vsel %vm2400_vm1, %v4386_v43, %v2397_v29  ;;  %vm2414_vm11 = vweird.f32 %v4388_v38 }
 0x6ce   : > { %4389 = vrcp.f32 %v2291_v52  ;;  %v2406_v22 = vsel %vm2403_vm0, %v2405_v50, %v2401_v44  ;;  %vm2415_vm10 = vmor %vm2413_vm12, %vm2414_vm11  ;;  %v2434_v4 = vand.u32 2147483648, %v2291_v52  ;;  %v2432_v31 = vand.u32 2147483647, %v2291_v52 }
 0x6cf   : > { %v2410_v48 = vsub.f32 1.0, %v2409_v46  ;;  %v2407_v39 = vmul.f32 %v5969_v0, %v2406_v22  ;;  %vm2428_vm1 = vweird.f32 %v2291_v52 }
 0x6d0   : > { %v2435_v55 = vor.u32 1.1754944e-38, %v2434_v4  ;;  %vm2433_vm11 = vcmp.eq.f32.partialorder %v2432_v31, 8.507059e+37 }
 0x6d1   : > { %v2411_v47 = vmul.f32 %v4388_v38, %v2410_v48  ;;  %4085 = vmatmul.msk.f32.gmra.mxu0 %vm1281_vm13, %v2407_v39 }
 0x6d3   : > { %v2412_v14 = vadd.f32 %v4388_v38, %v2411_v47 }
 0x6d4   : > { %v4390_v54 = vpop.eup %4389 }
 0x6d5   : > { %v2424_v35 = vmul.f32 %v4390_v54, %v2291_v52  ;;  %v2294_v45 = vpop.f32.mrf.mxu3  ;;  %v2416_v12 = vsel %vm2415_vm10, %v4388_v38, %v2412_v14  ;;  %vm2429_vm15 = vweird.f32 %v4390_v54 }
 0x6d6   : > { %4391 = vrcp.f32 %v2294_v45  ;;  %v2421_v5 = vsel %vm2418_vm14, %v2420_v53, %v2416_v12  ;;  %vm2430_vm0 = vmor %vm2428_vm1, %vm2429_vm15  ;;  %v2449_v3 = vand.u32 2147483648, %v2294_v45  ;;  %v2447_v28 = vand.u32 2147483647, %v2294_v45 }
 0x6d7   : > { %v2425_v26 = vsub.f32 1.0, %v2424_v35  ;;  %v2422_v0 = vmul.f32 %v5973_v23, %v2421_v5  ;;  %vm2443_vm10 = vweird.f32 %v2294_v45 }
 0x6d8   : > { %v2450_v13 = vor.u32 1.1754944e-38, %v2449_v3  ;;  %vm2448_vm15 = vcmp.eq.f32.partialorder %v2447_v28, 8.507059e+37 }
 0x6d9   : > { %v2426_v30 = vmul.f32 %v4390_v54, %v2425_v26  ;;  %4086 = vmatmul.msk.f32.gmra.mxu0 %vm1281_vm13, %v2422_v0 }
 0x6db   : > { %v2427_v24 = vadd.f32 %v4390_v54, %v2426_v30 }
 0x6dc   : > { %v4392_v36 = vpop.eup %4391 }
 0x6dd   : > { %v2439_v43 = vmul.f32 %v4392_v36, %v2294_v45  ;;  %v2297_v1 = vpop.f32.mrf.mxu3  ;;  %v2431_v11 = vsel %vm2430_vm0, %v4390_v54, %v2427_v24  ;;  %vm2444_vm12 = vweird.f32 %v4392_v36 }
 0x6de   : > { %4393 = vrcp.f32 %v2297_v1  ;;  %v2436_v20 = vsel %vm2433_vm11, %v2435_v55, %v2431_v11  ;;  %vm2445_vm14 = vmor %vm2443_vm10, %vm2444_vm12  ;;  %v2464_v22 = vand.u32 2147483648, %v2297_v1  ;;  %v2462_v48 = vand.u32 2147483647, %v2297_v1 }
 0x6df   : > { %v2440_v60 = vsub.f32 1.0, %v2439_v43  ;;  %v2437_v23 = vmul.f32 %v5977_v10, %v2436_v20  ;;  %vm2458_vm0 = vweird.f32 %v2297_v1 }
 0x6e0   : > { %v2465_v21 = vor.u32 1.1754944e-38, %v2464_v22  ;;  %vm2463_vm12 = vcmp.eq.f32.partialorder %v2462_v48, 8.507059e+37 }
 0x6e1   : > { %v2441_v19 = vmul.f32 %v4392_v36, %v2440_v60  ;;  %4087 = vmatmul.msk.f32.gmra.mxu0 %vm1281_vm13, %v2437_v23 }
 0x6e3   : > { %v2442_v49 = vadd.f32 %v4392_v36, %v2441_v19 }
 0x6e4   : > { %v4394_v7 = vpop.eup %4393 }
 0x6e5   : > { %v2454_v29 = vmul.f32 %v4394_v7, %v2297_v1  ;;  %v2300_v38 = vpop.f32.mrf.mxu3  ;;  %v2446_v50 = vsel %vm2445_vm14, %v4392_v36, %v2442_v49  ;;  %vm2459_vm1 = vweird.f32 %v4394_v7 }
 0x6e6   : > { %4395 = vrcp.f32 %v2300_v38  ;;  %v2451_v52 = vsel %vm2448_vm15, %v2450_v13, %v2446_v50  ;;  %vm2460_vm11 = vmor %vm2458_vm0, %vm2459_vm1  ;;  %v2479_v12 = vand.u32 2147483648, %v2300_v38  ;;  %v2477_v26 = vand.u32 2147483647, %v2300_v38 }
 0x6e7   : > { %v2455_v46 = vsub.f32 1.0, %v2454_v29  ;;  %v2452_v10 = vmul.f32 %v5981_v61, %v2451_v52  ;;  %vm2473_vm14 = vweird.f32 %v2300_v38 }
 0x6e8   : > { %v2480_v30 = vor.u32 1.1754944e-38, %v2479_v12  ;;  %vm2478_vm1 = vcmp.eq.f32.partialorder %v2477_v26, 8.507059e+37 }
 0x6e9   : > { %v2456_v44 = vmul.f32 %v4394_v7, %v2455_v46  ;;  %4088 = vmatmul.msk.f32.gmra.mxu0 %vm1281_vm13, %v2452_v10 }
 0x6eb   : > { %v2457_v39 = vadd.f32 %v4394_v7, %v2456_v44 }
 0x6ec   : > { %v4396_v47 = vpop.eup %4395 }
 0x6ed   : > { %v2469_v59 = vmul.f32 %v4396_v47, %v2300_v38  ;;  %v2303_v14 = vpop.f32.mrf.mxu3  ;;  %v2461_v54 = vsel %vm2460_vm11, %v4394_v7, %v2457_v39  ;;  %vm2474_vm10 = vweird.f32 %v4396_v47 }
 0x6ee   : > { %4397 = vrcp.f32 %v2303_v14  ;;  %v2466_v35 = vsel %vm2463_vm12, %v2465_v21, %v2461_v54  ;;  %vm2475_vm15 = vmor %vm2473_vm14, %vm2474_vm10  ;;  %v2494_v1 = vand.u32 2147483648, %v2303_v14  ;;  %v2492_v11 = vand.u32 2147483647, %v2303_v14 }
 0x6ef   : > { %v2470_v53 = vsub.f32 1.0, %v2469_v59  ;;  %v2467_v61 = vmul.f32 %v5985_v6, %v2466_v35  ;;  %vm2488_vm11 = vweird.f32 %v2303_v14 }
 0x6f0   : > { %v2495_v23 = vor.u32 1.1754944e-38, %v2494_v1  ;;  %vm2493_vm10 = vcmp.eq.f32.partialorder %v2492_v11, 8.507059e+37 }
 0x6f1   : > { %v2471_v45 = vmul.f32 %v4396_v47, %v2470_v53  ;;  %4089 = vmatmul.msk.f32.gmra.mxu0 %vm1281_vm13, %v2467_v61 }
 0x6f3   : > { %v2472_v5 = vadd.f32 %v4396_v47, %v2471_v45 }
 0x6f4   : > { %v4398_v0 = vpop.eup %4397 }
 0x6f5   : > { %v2484_v4 = vmul.f32 %v4398_v0, %v2303_v14  ;;  %v2306_v31 = vpop.f32.mrf.mxu3  ;;  %v2476_v24 = vsel %vm2475_vm15, %v4396_v47, %v2472_v5  ;;  %vm2489_vm0 = vweird.f32 %v4398_v0 }
 0x6f6   : > { %4399 = vrcp.f32 %v2306_v31  ;;  %v2481_v55 = vsel %vm2478_vm1, %v2480_v30, %v2476_v24  ;;  %vm2490_vm12 = vmor %vm2488_vm11, %vm2489_vm0  ;;  %v2509_v29 = vand.u32 2147483648, %v2306_v31  ;;  %v2507_v38 = vand.u32 2147483647, %v2306_v31 }
 0x6f7   : > { %v2485_v36 = vsub.f32 1.0, %v2484_v4  ;;  %v2482_v6 = vmul.f32 %v5989_v63, %v2481_v55  ;;  %vm2503_vm15 = vweird.f32 %v2306_v31 }
 0x6f8   : > { %v2510_v52 = vor.u32 1.1754944e-38, %v2509_v29  ;;  %vm2508_vm0 = vcmp.eq.f32.partialorder %v2507_v38, 8.507059e+37 }
 0x6f9   : > { %v2486_v43 = vmul.f32 %v4398_v0, %v2485_v36  ;;  %4090 = vmatmul.msk.f32.gmra.mxu0 %vm1281_vm13, %v2482_v6 }
 0x6fb   : > { %v2487_v60 = vadd.f32 %v4398_v0, %v2486_v43 }
 0x6fc   : > { %v4400_v20 = vpop.eup %4399 }
 0x6fd   : > { %v2499_v19 = vmul.f32 %v4400_v20, %v2306_v31  ;;  %v2309_v3 = vpop.f32.mrf.mxu3  ;;  %v2491_v28 = vsel %vm2490_vm12, %v4398_v0, %v2487_v60  ;;  %vm2504_vm14 = vweird.f32 %v4400_v20 }
 0x6fe   : > { %4401 = vrcp.f32 %v2309_v3  ;;  %v2496_v7 = vsel %vm2493_vm10, %v2495_v23, %v2491_v28  ;;  %vm2505_vm1 = vmor %vm2503_vm15, %vm2504_vm14  ;;  %v2524_v21 = vand.u32 2147483648, %v2309_v3  ;;  %v2522_v59 = vand.u32 2147483647, %v2309_v3 }
 0x6ff   : > { %v2500_v49 = vsub.f32 1.0, %v2499_v19  ;;  %v2497_v63 = vmul.f32 %v5993_v15, %v2496_v7  ;;  %vm2518_vm12 = vweird.f32 %v2309_v3 }
 0x700   : > { %v2525_v53 = vor.u32 1.1754944e-38, %v2524_v21  ;;  %vm2523_vm14 = vcmp.eq.f32.partialorder %v2522_v59, 8.507059e+37 }
 0x701   : > { %v2501_v13 = vmul.f32 %v4400_v20, %v2500_v49  ;;  %4091 = vmatmul.msk.f32.gmra.mxu0 %vm1281_vm13, %v2497_v63 }
 0x703   : > { %v2502_v50 = vadd.f32 %v4400_v20, %v2501_v13 }
 0x704   : > { %v4402_v46 = vpop.eup %4401 }
 0x705   : > { %v2514_v10 = vmul.f32 %v4402_v46, %v2309_v3  ;;  %v2312_v44 = vpop.f32.mrf.mxu3  ;;  %v2506_v22 = vsel %vm2505_vm1, %v4400_v20, %v2502_v50  ;;  %vm2519_vm11 = vweird.f32 %v4402_v46 }
 0x706   : > { %4403 = vrcp.f32 %v2312_v44  ;;  %v2511_v39 = vsel %vm2508_vm0, %v2510_v52, %v2506_v22  ;;  %vm2520_vm10 = vmor %vm2518_vm12, %vm2519_vm11  ;;  %v2539_v5 = vand.u32 2147483648, %v2312_v44  ;;  %v2537_v30 = vand.u32 2147483647, %v2312_v44 }
 0x707   : > { %v2515_v48 = vsub.f32 1.0, %v2514_v10  ;;  %v2512_v15 = vmul.f32 %v5997_v18, %v2511_v39  ;;  %vm2533_vm1 = vweird.f32 %v2312_v44 }
 0x708   : > { %v2540_v24 = vor.u32 1.1754944e-38, %v2539_v5  ;;  %vm2538_vm11 = vcmp.eq.f32.partialorder %v2537_v30, 8.507059e+37 }
 0x709   : > { %v2516_v47 = vmul.f32 %v4402_v46, %v2515_v48  ;;  %4092 = vmatmul.msk.f32.gmra.mxu0 %vm1281_vm13, %v2512_v15 }
 0x70b   : > { %v2517_v14 = vadd.f32 %v4402_v46, %v2516_v47 }
 0x70c   : > { %v4404_v54 = vpop.eup %4403 }
 0x70d   : > { %v2529_v35 = vmul.f32 %v4404_v54, %v2312_v44  ;;  %v2315_v61 = vpop.f32.mrf.mxu3  ;;  %v2521_v45 = vsel %vm2520_vm10, %v4402_v46, %v2517_v14  ;;  %vm2534_vm15 = vweird.f32 %v4404_v54 }
 0x70e   : > { %4405 = vrcp.f32 %v2315_v61  ;;  %v2526_v26 = vsel %vm2523_vm14, %v2525_v53, %v2521_v45  ;;  %vm2535_vm0 = vmor %vm2533_vm1, %vm2534_vm15  ;;  %v2554_v11 = vand.u32 2147483648, %v2315_v61  ;;  %vm2548_vm10 = vweird.f32 %v2315_v61 }
 0x70f   : > { %v2530_v12 = vsub.f32 1.0, %v2529_v35  ;;  %v2527_v18 = vmul.f32 %v6001_v58, %v2526_v26  ;;  %v2552_v58 = vand.u32 2147483647, %v2315_v61  ;;  %vm6592_vm15 = vcmask 1044480  }
 0x710   : > { %v2555_v23 = vor.u32 1.1754944e-38, %v2554_v11 }
 0x711   : > { %v2531_v0 = vmul.f32 %v4404_v54, %v2530_v12  ;;  %4093 = vmatmul.msk.f32.gmra.mxu0 %vm1281_vm13, %v2527_v18  ;;  %vm2553_vm9 = vcmp.eq.f32.partialorder %v2552_v58, 8.507059e+37 }
 0x713   : > { %v2532_v4 = vadd.f32 %v4404_v54, %v2531_v0 }
 0x714   : > { %v4406_v31 = vpop.eup %4405 }
 0x715   : > { %v2544_v36 = vmul.f32 %v4406_v31, %v2315_v61  ;;  %v2536_v55 = vsel %vm2535_vm0, %v4404_v54, %v2532_v4  ;;  %vm2549_vm12 = vweird.f32 %v4406_v31 }
 0x716   : > { %v2541_v6 = vsel %vm2538_vm11, %v2540_v24, %v2536_v55  ;;  %vm2550_vm14 = vmor %vm2548_vm10, %vm2549_vm12 }
 0x717   : > { %v2545_v43 = vsub.f32 1.0, %v2544_v36  ;;  %v2542_v1 = vmul.f32 %v6005_v25, %v2541_v6 }
 0x719   : > { %v2546_v60 = vmul.f32 %v4406_v31, %v2545_v43  ;;  %4094 = vmatmul.msk.f32.gmra.mxu0 %vm1281_vm13, %v2542_v1 }
 0x71b   : > { %v2547_v20 = vadd.f32 %v4406_v31, %v2546_v60 }
 0x71d   : > { %v2551_v19 = vsel %vm2550_vm14, %v4406_v31, %v2547_v20 }
 0x71e   : > { %v2556_v3 = vsel %vm2553_vm9, %v2555_v23, %v2551_v19  ;;  %vm6591_vm9 = vcmask 1047559  }
 0x71f   : > { %v2557_v28 = vmul.f32 %v6009_v33, %v2556_v3 }
 0x721   : > { %4095 = vmatmul.msk.f32.gmra.mxu0 %vm1281_vm13, %v2557_v28 }
 0x726   : > { %v2623_v49 = vpop.f32.mrf.mxu0 }
 0x727   : > { %v2671_v25 = vmul.f32 %v2623_v49, %v5337_v37 }
 0x729   : > { %v2687_v13 = vsel %vm6563_vm2, %v2671_v25, 0.0 }
 0x72e   : > { %v2626_v7 = vpop.f32.mrf.mxu0 }
 0x72f   : > { %v2672_v63 = vmul.f32 %v2626_v7, %v5318_v62 }
 0x731   : > { %v2688_v29 = vsel %vm6563_vm2, %v2672_v63, 0.0 }
 0x732   : > { %v2689_v38 = vadd.f32 %v2688_v29, %v2687_v13 }
 0x734   : > { %v2690_v7 = vrot.slane %v2689_v38, 4 }
 0x736   : > { %v2629_v50 = vpop.f32.mrf.mxu0 }
 0x737   : > { %v2673_v46 = vmul.f32 %v2629_v50, %v5321_v8 }
 0x739   : > { %v2696_v33 = vsel %vm6563_vm2, %v2673_v46, 0.0 }
 0x73e   : > { %v2632_v52 = vpop.f32.mrf.mxu0 }
 0x73f   : > { %v2674_v10 = vmul.f32 %v2632_v52, %v5305_v42 }
 0x741   : > { %v2697_v44 = vsel %vm6563_vm2, %v2674_v10, 0.0 }
 0x742   : > { %v2698_v22 = vadd.f32 %v2697_v44, %v2696_v33  ;;  %v2691_v33 = vadd.f32 %v2690_v7, %v2689_v38 }
 0x744   : > { %v2699_v19 = vrot.slane %v2698_v22, 4 }
 0x746   : > { %v2635_v48 = vpop.f32.mrf.mxu0  ;;  %v2700_v50 = vadd.f32 %v2699_v19, %v2698_v22 }
 0x747   : > { %v2675_v39 = vmul.f32 %v2635_v48, %v5331_v40 }
 0x749   : > { %v2705_v21 = vsel %vm6563_vm2, %v2675_v39, 0.0 }
 0x74e   : > { %v2638_v15 = vpop.f32.mrf.mxu0 }
 0x74f   : > { %v2676_v47 = vmul.f32 %v2638_v15, %v5314_v32  ;;  %v2701_v15 = vrot.slane %v2700_v50, 2 }
 0x751   : > { %v2706_v59 = vsel %vm6563_vm2, %v2676_v47, 0.0 }
 0x752   : > { %v2707_v14 = vadd.f32 %v2706_v59, %v2705_v21 }
 0x754   : > { %v2708_v28 = vrot.slane %v2707_v14, 4 }
 0x756   : > { %v2641_v54 = vpop.f32.mrf.mxu0  ;;  %v2709_v52 = vadd.f32 %v2708_v28, %v2707_v14 }
 0x757   : > { %v2677_v0 = vmul.f32 %v2641_v54, %v5342_v51  ;;  %v2692_v54 = vrot.slane %v2691_v33, 2 }
 0x758   : > { %v2710_v21 = vrot.slane %v2709_v52, 2 }
 0x759   : > { %v2714_v55 = vsel %vm6563_vm2, %v2677_v0, 0.0 }
 0x75e   : > { %v2644_v53 = vpop.f32.mrf.mxu0 }
 0x75f   : > { %v2678_v5 = vmul.f32 %v2644_v53, %v5324_v34 }
 0x761   : > { %v2715_v31 = vsel %vm6563_vm2, %v2678_v5, 0.0  ;;  %v2693_v5 = vadd.f32 %v2692_v54, %v2691_v33 }
 0x762   : > { %v2716_v1 = vadd.f32 %v2715_v31, %v2714_v55 }
 0x764   : > { %v2717_v63 = vrot.slane %v2716_v1, 4 }
 0x766   : > { %v2647_v35 = vpop.f32.mrf.mxu0  ;;  %v2718_v44 = vadd.f32 %v2717_v63, %v2716_v1 }
 0x767   : > { %v2679_v4 = vmul.f32 %v2647_v35, %v5352_v17 }
 0x768   : > { %v2719_v53 = vrot.slane %v2718_v44, 2 }
 0x769   : > { %v2723_v11 = vsel %vm6563_vm2, %v2679_v4, 0.0 }
 0x76a   : > { %v2720_v14 = vadd.f32 %v2719_v53, %v2718_v44 }
 0x76e   : > { %v2650_v61 = vpop.f32.mrf.mxu0 }
 0x76f   : > { %v2680_v18 = vmul.f32 %v2650_v61, %v5334_v2  ;;  %v2702_v61 = vadd.f32 %v2701_v15, %v2700_v50 }
 0x771   : > { %v2724_v36 = vsel %vm6563_vm2, %v2680_v18, 0.0 }
 0x772   : > { %v2725_v58 = vadd.f32 %v2724_v36, %v2723_v11 }
 0x774   : > { %v2726_v29 = vrot.slane %v2725_v58, 4 }
 0x776   : > { %v2653_v45 = vpop.f32.mrf.mxu0  ;;  %v2727_v39 = vadd.f32 %v2726_v29, %v2725_v58 }
 0x777   : > { %v2681_v24 = vmul.f32 %v2653_v45, %v5361_v57 }
 0x778   : > { %v2728_v35 = vrot.slane %v2727_v39, 2 }
 0x779   : > { %v2732_v20 = vsel %vm6563_vm2, %v2681_v24, 0.0 }
 0x77a   : > { %v2729_v38 = vadd.f32 %v2728_v35, %v2727_v39 }
 0x77c   : > { %v2730_v11 = vrot.slane %v2729_v38, 1 }
 0x77e   : > { %v2656_v12 = vpop.f32.mrf.mxu0 }
 0x77f   : > { %v2682_v30 = vmul.f32 %v2656_v12, %v5344_v56  ;;  %v2711_v12 = vadd.f32 %v2710_v21, %v2709_v52 }
 0x781   : > { %v2733_v6 = vsel %vm6563_vm2, %v2682_v30, 0.0  ;;  %v2703_v30 = vrot.slane %v2702_v61, 1  ;;  %v2712_v31 = vrot.slane %v2711_v12, 1 }
 0x782   : > { %v2734_v3 = vadd.f32 %v2733_v6, %v2732_v20  ;;  %v2694_v6 = vrot.slane %v2693_v5, 1 }
 0x784   : > { %v2735_v46 = vrot.slane %v2734_v3, 4 }
 0x786   : > { %v2659_v26 = vpop.f32.mrf.mxu0  ;;  %v2736_v47 = vadd.f32 %v2735_v46, %v2734_v3  ;;  %v6081_v3 = vadd.f32 %v2694_v6, %v2693_v5  ;;  %v4526_v5 = vld [vmem:[%s6558_s4 + $0x60] sm:$0xff]  ;;  %v4537_v6 = vld [vmem:[%s6558_s4 + $0x8] sm:$0xff] }
 0x787   : > { %v2683_v43 = vmul.f32 %v2659_v26, %v5382_v41 }
 0x788   : > { %v2737_v45 = vrot.slane %v2736_v47, 2  ;;  %v2759_v46 = vmul.f32 %v6081_v3, %v6081_v3 }
 0x789   : > { %v2741_v49 = vsel %vm6563_vm2, %v2683_v43, 0.0  ;;  %v2721_v43 = vrot.slane %v2720_v14, 1 }
 0x78a   : > { %v2738_v4 = vadd.f32 %v2737_v45, %v2736_v47 }
 0x78b   : > { %v6083_v28 = vadd.f32 %v2721_v43, %v2720_v14  ;;  %v4527_v14 = vld [vmem:[%s6558_s4 + $0x58] sm:$0xff]  ;;  %v4538_v43 = vld [vmem:[%s6558_s4] sm:$0xff] }
 0x78c   : > { %v2739_v58 = vrot.slane %v2738_v4, 1 }
 0x78d   : > { %v2762_v52 = vmul.f32 %v6083_v28, %v6083_v28 }
 0x78e   : > { %v2662_v60 = vpop.f32.mrf.mxu0  ;;  %v6089_v63 = vadd.f32 %v2739_v58, %v2738_v4  ;;  %v4532_v4 = vld [vmem:[%s6558_s4 + $0x30] sm:$0xff] }
 0x78f   : > { %v2684_v23 = vmul.f32 %v2662_v60, %v5389_v9  ;;  %v6077_v60 = vadd.f32 %v2703_v30, %v2702_v61  ;;  %v4531_v30 = vld [vmem:[%s6558_s4 + $0x38] sm:$0xff] }
 0x791   : > { %v2742_v25 = vsel %vm6563_vm2, %v2684_v23, 0.0  ;;  %v6079_v23 = vadd.f32 %v2712_v31, %v2711_v12  ;;  %v2760_v7 = vmul.f32 %v6077_v60, %v6077_v60  ;;  %v4523_v12 = vld [vmem:[%s6558_s4 + $0x78] sm:$0x1f]  ;;  %v4533_v31 = vld [vmem:[%s6558_s4 + $0x28] sm:$0xff] }
 0x792   : > { %v2743_v13 = vadd.f32 %v2742_v25, %v2741_v49  ;;  %v6085_v25 = vadd.f32 %v2730_v11, %v2729_v38  ;;  %v4529_v38 = vld [vmem:[%s6558_s4 + $0x48] sm:$0xff] }
 0x793   : > { %v2761_v29 = vmul.f32 %v6079_v23, %v6079_v23  ;;  %v2775_v44 = vsel %vm921_vm3, %v2760_v7, %v2759_v46 }
 0x794   : > { %v2744_v10 = vrot.slane %v2743_v13, 4  ;;  %v2763_v33 = vmul.f32 %v6085_v25, %v6085_v25 }
 0x795   : > { %v2776_v15 = vsel %vm923_vm4, %v2761_v29, %v2775_v44 }
 0x796   : > { %v2665_v48 = vpop.f32.mrf.mxu0  ;;  %v2745_v59 = vadd.f32 %v2744_v10, %v2743_v13  ;;  %v2777_v21 = vsel %vm6567_vm5, %v2762_v52, %v2776_v15 }
 0x797   : > { %v2685_v22 = vmul.f32 %v2665_v48, %v5435_v27  ;;  %v2764_v48 = vmul.f32 %v6089_v63, %v6089_v63  ;;  %v2778_v54 = vsel %vm6566_vm6, %v2763_v33, %v2777_v21 }
 0x798   : > { %v2746_v26 = vrot.slane %v2745_v59, 2 }
 0x799   : > { %v2750_v36 = vsel %vm6563_vm2, %v2685_v22, 0.0  ;;  %v2779_v35 = vsel %vm6565_vm7, %v2764_v48, %v2778_v54  ;;  %v4525_v22 = vld [vmem:[%s6558_s4 + $0x68] sm:$0xff] }
 0x79a   : > { %v2747_v24 = vadd.f32 %v2746_v26, %v2745_v59  ;;  %v4524_v26 = vld [vmem:[%s6558_s4 + $0x70] sm:$0xff] }
 0x79c   : > { %v2748_v19 = vrot.slane %v2747_v24, 1 }
 0x79e   : > { %v2668_v18 = vpop.f32.mrf.mxu0  ;;  %v6093_v50 = vadd.f32 %v2748_v19, %v2747_v24  ;;  %v4534_v24 = vld [vmem:[%s6558_s4 + $0x20] sm:$0xff] }
 0x79f   : > { %v2686_v0 = vmul.f32 %v2668_v18, %v5443_v16  ;;  %v4528_v18 = vld [vmem:[%s6558_s4 + $0x50] sm:$0xff] }
 0x7a0   : > { %v2765_v47 = vmul.f32 %v6093_v50, %v6093_v50 }
 0x7a1   : > { %v2751_v55 = vsel %vm6563_vm2, %v2686_v0, 0.0  ;;  %v4530_v0 = vld [vmem:[%s6558_s4 + $0x40] sm:$0xff] }
 0x7a2   : > { %v2752_v1 = vadd.f32 %v2751_v55, %v2750_v36  ;;  %v2780_v61 = vsel %vm6564_vm8, %v2765_v47, %v2779_v35  ;;  %v4535_v36 = vld [vmem:[%s6558_s4 + $0x18] sm:$0xff]  ;;  %v4536_v55 = vld [vmem:[%s6558_s4 + $0x10] sm:$0xff] }
 0x7a4   : > { %v2753_v20 = vrot.slane %v2752_v1, 4 }
 0x7a6   : > { %v2754_v49 = vadd.f32 %v2753_v20, %v2752_v1 }
 0x7a8   : > { %v2755_v13 = vrot.slane %v2754_v49, 2 }
 0x7aa   : > { %v2756_v10 = vadd.f32 %v2755_v13, %v2754_v49 }
 0x7ac   : > { %v2757_v39 = vrot.slane %v2756_v10, 1 }
 0x7ae   : > { %v6108_v59 = vadd.f32 %v2757_v39, %v2756_v10 }
 0x7b0   : > { %v2766_v53 = vmul.f32 %v6108_v59, %v6108_v59 }
 0x7b2   : > { %v2781_v45 = vsel %vm6591_vm9, %v2766_v53, %v2780_v61 }
 0x7b3   : > { %4097 = vmatmul.msk.f32.vlgmr.msra.gmra.mxu1 %vm6563_vm2, %v2781_v45 }
 0x7b4   : > { %4149 = vmatpush.msk.msra.mxu1 %vm6592_vm15, %v4523_v12 }
 0x7b6   : > { %3701 = vmatpush.msra.mxu1 %v4524_v26 }
 0x7b8   : > { %3702 = vmatpush.msra.mxu1 %v4525_v22 }
 0x7ba   : > { %3703 = vmatpush.msra.mxu1 %v4526_v5 }
 0x7bc   : > { %3704 = vmatpush.msra.mxu1 %v4527_v14 }
 0x7be   : > { %3705 = vmatpush.msra.mxu1 %v4528_v18 }
 0x7c0   : > { %3706 = vmatpush.msra.mxu1 %v4529_v38 }
 0x7c2   : > { %3707 = vmatpush.msra.mxu1 %v4530_v0 }
 0x7c4   : > { %3708 = vmatpush.msra.mxu1 %v4531_v30 }
 0x7c6   : > { %3709 = vmatpush.msra.mxu1 %v4532_v4 }
 0x7c8   : > { %3710 = vmatpush.msra.mxu1 %v4533_v31 }
 0x7ca   : > { %3711 = vmatpush.msra.mxu1 %v4534_v24 }
 0x7cc   : > { %3712 = vmatpush.msra.mxu1 %v4535_v36 }
 0x7ce   : > { %3713 = vmatpush.msra.mxu1 %v4536_v55 }
 0x7d0   : > { %3714 = vmatpush.msra.mxu1 %v4537_v6 }
 0x7d2   : > { %3715 = vmatpush.msra.mxu1 %v4538_v43 }
 0x830   : > { %v2801_v1 = vpop.f32.mrf.mxu1 }
 0x831   : > { %v2802_v11 = vadd.f32 1e-07, %v2801_v1 }
 0x833   : > { %4407 = vrsqrt.f32 %v2802_v11  ;;  %vm2811_vm1 = vcmp.eq.f32.partialorder %v2802_v11, inf  ;;  %v2814_v46 = vand.u32 2147483648, %v2802_v11  ;;  %vm2813_vm0 = vcmp.eq.f32.partialorder %v2802_v11, 0.0 }
 0x839   : > { %v4408_v58 = vpop.eup %4407 }
 0x83a   : > { %v2805_v20 = vmul.f32 %v4408_v58, %v2802_v11 }
 0x83c   : > { %v2806_v19 = vmul.f32 %v4408_v58, %v2805_v20 }
 0x83e   : > { %v2807_v49 = vmul.f32 0.5, %v2806_v19 }
 0x840   : > { %v2808_v7 = vsub.f32 1.5, %v2807_v49 }
 0x842   : > { %v2809_v13 = vmul.f32 %v4408_v58, %v2808_v7 }
 0x844   : > { %v2810_v29 = vmul.f32 %v2809_v13, %v2802_v11 }
 0x846   : > { %v2812_v52 = vsel %vm2811_vm1, %v2802_v11, %v2810_v29 }
 0x847   : > { %v6166_v10 = vsel %vm2813_vm0, %v2814_v46, %v2812_v52 }
 0x848   : > { %4409 = vrcp.f32 %v6166_v10  ;;  %v2817_v33 = vrot.slane %v6166_v10, 1  ;;  %v2843_v47 = vand.u32 2147483648, %v6166_v10  ;;  %v2818_v54 = vrot.slane %v6166_v10, 2 }
 0x849   : > { %v2841_v35 = vand.u32 2147483647, %v6166_v10  ;;  %vm2837_vm12 = vweird.f32 %v6166_v10  ;;  %v2819_v43 = vrot.slane %v6166_v10, 3 }
 0x84a   : > { %4411 = vrcp.f32 %v2817_v33  ;;  %v2844_v12 = vor.u32 1.1754944e-38, %v2843_v47  ;;  %v2858_v30 = vand.u32 2147483648, %v2817_v33  ;;  %vm2852_vm15 = vweird.f32 %v2817_v33 }
 0x84b   : > { %4413 = vrcp.f32 %v2818_v54  ;;  %vm2842_vm14 = vcmp.eq.f32.partialorder %v2841_v35, 8.507059e+37  ;;  %v2856_v31 = vand.u32 2147483647, %v2817_v33  ;;  %v2873_v7 = vand.u32 2147483648, %v2818_v54 }
 0x84c   : > { %v2859_v55 = vor.u32 1.1754944e-38, %v2858_v30  ;;  %4415 = vrcp.f32 %v2819_v43  ;;  %v2871_v29 = vand.u32 2147483647, %v2818_v54  ;;  %v2888_v35 = vand.u32 2147483648, %v2819_v43 }
 0x84d   : > { %vm2857_vm0 = vcmp.eq.f32.partialorder %v2856_v31, 8.507059e+37 }
 0x84e   : > { %v4410_v44 = vpop.eup %4409 }
 0x84f   : > { %v2833_v48 = vmul.f32 %v4410_v44, %v6166_v10  ;;  %vm2838_vm11 = vweird.f32 %v4410_v44 }
 0x850   : > { %v4412_v39 = vpop.eup %4411  ;;  %vm2839_vm10 = vmor %vm2837_vm12, %vm2838_vm11  ;;  %vm2867_vm12 = vweird.f32 %v2818_v54 }
 0x851   : > { %v2834_v15 = vsub.f32 1.0, %v2833_v48  ;;  %v2848_v21 = vmul.f32 %v4412_v39, %v2817_v33  ;;  %vm2853_vm9 = vweird.f32 %v4412_v39  ;;  %v4414_v0 = vpop.eup %4413  ;;  %v2874_v33 = vor.u32 1.1754944e-38, %v2873_v7 }
 0x852   : > { %vm2854_vm1 = vmor %vm2852_vm15, %vm2853_vm9  ;;  %v2863_v36 = vmul.f32 %v4414_v0, %v2818_v54  ;;  %vm2868_vm11 = vweird.f32 %v4414_v0  ;;  %v4416_v49 = vpop.eup %4415  ;;  %vm2882_vm15 = vweird.f32 %v2819_v43 }
 0x853   : > { %v2835_v53 = vmul.f32 %v4410_v44, %v2834_v15  ;;  %v2849_v61 = vsub.f32 1.0, %v2848_v21  ;;  %v2878_v52 = vmul.f32 %v4416_v49, %v2819_v43  ;;  %vm2883_vm9 = vweird.f32 %v4416_v49 }
 0x855   : > { %v2836_v45 = vadd.f32 %v4410_v44, %v2835_v53  ;;  %v2850_v22 = vmul.f32 %v4412_v39, %v2849_v61  ;;  %v2879_v48 = vsub.f32 1.0, %v2878_v52 }
 0x857   : > { %v2840_v26 = vsel %vm2839_vm10, %v4410_v44, %v2836_v45  ;;  %v2851_v38 = vadd.f32 %v4412_v39, %v2850_v22  ;;  %vm2869_vm10 = vmor %vm2867_vm12, %vm2868_vm11  ;;  %v2820_v44 = vrot.slane %v6166_v10, 4  ;;  %v2880_v47 = vmul.f32 %v4416_v49, %v2879_v48 }
 0x858   : > { %v2845_v5 = vsel %vm2842_vm14, %v2844_v12, %v2840_v26  ;;  %vm2872_vm14 = vcmp.eq.f32.partialorder %v2871_v29, 8.507059e+37  ;;  %v2886_v45 = vand.u32 2147483647, %v2819_v43  ;;  %v2889_v22 = vor.u32 1.1754944e-38, %v2888_v35 }
 0x859   : > { %v2846_v14 = vmul.f32 %v2845_v5, %v6081_v3  ;;  %v2855_v24 = vsel %vm2854_vm1, %v4412_v39, %v2851_v38  ;;  %v2864_v3 = vsub.f32 1.0, %v2863_v36  ;;  %4417 = vrcp.f32 %v2820_v44  ;;  %vm2884_vm1 = vmor %vm2882_vm15, %vm2883_vm9 }
 0x85a   : > { %v2860_v6 = vsel %vm2857_vm0, %v2859_v55, %v2855_v24  ;;  %v2881_v54 = vadd.f32 %v4416_v49, %v2880_v47  ;;  %vm2887_vm0 = vcmp.eq.f32.partialorder %v2886_v45, 8.507059e+37  ;;  %v2821_v5 = vrot.slane %v6166_v10, 5 }
 0x85b   : > { %v2952_v18 = vperm.slane %v2846_v14, 0  ;;  %v2861_v11 = vmul.f32 %v2860_v6, %v6077_v60  ;;  %v2865_v58 = vmul.f32 %v4414_v0, %v2864_v3  ;;  %v2903_v24 = vand.u32 2147483648, %v2820_v44 }
 0x85c   : > { %v2885_v12 = vsel %vm2884_vm1, %v4416_v49, %v2881_v54  ;;  %4419 = vrcp.f32 %v2821_v5  ;;  %vm2897_vm12 = vweird.f32 %v2820_v44  ;;  %v2901_v55 = vand.u32 2147483647, %v2820_v44 }
 0x85d   : > { %v2960_v4 = vmul.f32 %v2952_v18, %v5337_v37  ;;  %v2961_v1 = vmul.f32 %v2952_v18, %v5318_v62  ;;  %v2953_v20 = vperm.slane %v2861_v11, 0  ;;  %v2866_v19 = vadd.f32 %v4414_v0, %v2865_v58 }
 0x85e   : > { %v2904_v3 = vor.u32 1.1754944e-38, %v2903_v24  ;;  %v2918_v29 = vand.u32 2147483648, %v2821_v5  ;;  %vm2912_vm15 = vweird.f32 %v2821_v5  ;;  %v2916_v52 = vand.u32 2147483647, %v2821_v5 }
 0x85f   : > { %4099 = vmatmul.msk.f32.vlgmr.msrb.gmra.mxu1 %vm6563_vm2, %v2960_v4  ;;  %v2962_v13 = vmul.f32 %v2953_v20, %v5321_v8  ;;  %v2870_v46 = vsel %vm2869_vm10, %v4414_v0, %v2866_v19  ;;  %v2963_v39 = vmul.f32 %v2953_v20, %v5305_v42  ;;  %v4418_v53 = vpop.eup %4417  ;;  %v2823_v48 = vrot.slane %v6166_v10, 7 }
 0x860   : > { %v2875_v60 = vsel %vm2872_vm14, %v2874_v33, %v2870_v46  ;;  %v2893_v26 = vmul.f32 %v4418_v53, %v2820_v44  ;;  %vm2898_vm11 = vweird.f32 %v4418_v53  ;;  %vm2902_vm14 = vcmp.eq.f32.partialorder %v2901_v55, 8.507059e+37 }
 0x861   : > { %v2876_v15 = vmul.f32 %v2875_v60, %v6079_v23  ;;  %v2890_v23 = vsel %vm2887_vm0, %v2889_v22, %v2885_v12  ;;  %vm2899_vm10 = vmor %vm2897_vm12, %vm2898_vm11  ;;  %v2919_v44 = vor.u32 1.1754944e-38, %v2918_v29  ;;  %vm2917_vm0 = vcmp.eq.f32.partialorder %v2916_v52, 8.507059e+37 }
 0x862   : > { %v2894_v14 = vsub.f32 1.0, %v2893_v26  ;;  %v2891_v38 = vmul.f32 %v2890_v23, %v6083_v28  ;;  %v4420_v31 = vpop.eup %4419 }
 0x863   : > { %v2954_v21 = vperm.slane %v2876_v15, 0  ;;  %v2908_v43 = vmul.f32 %v4420_v31, %v2821_v5  ;;  %vm2913_vm9 = vweird.f32 %v4420_v31 }
 0x864   : > { %v2895_v0 = vmul.f32 %v4418_v53, %v2894_v14  ;;  %v2955_v30 = vperm.slane %v2891_v38, 0  ;;  %vm2914_vm1 = vmor %vm2912_vm15, %vm2913_vm9  ;;  %vm2942_vm15 = vweird.f32 %v2823_v48 }
 0x865   : > { %v2964_v61 = vmul.f32 %v2954_v21, %v5331_v40  ;;  %v2965_v18 = vmul.f32 %v2954_v21, %v5314_v32  ;;  %v2909_v11 = vsub.f32 1.0, %v2908_v43 }
 0x866   : > { %v2896_v4 = vadd.f32 %v4418_v53, %v2895_v0  ;;  %v2966_v36 = vmul.f32 %v2955_v30, %v5342_v51  ;;  %v2967_v58 = vmul.f32 %v2955_v30, %v5324_v34  ;;  %v2948_v30 = vand.u32 2147483648, %v2823_v48 }
 0x867   : > { %4100 = vmatmul.msk.f32.gmra.mxu1 %vm6563_vm2, %v2961_v1  ;;  %v2822_v1 = vrot.slane %v6166_v10, 6  ;;  %v2910_v19 = vmul.f32 %v4420_v31, %v2909_v11 }
 0x868   : > { %v2900_v6 = vsel %vm2899_vm10, %v4418_v53, %v2896_v4 }
 0x869   : > { %v2905_v28 = vsel %vm2902_vm14, %v2904_v3, %v2900_v6  ;;  %4421 = vrcp.f32 %v2822_v1  ;;  %v2911_v7 = vadd.f32 %v4420_v31, %v2910_v19  ;;  %vm2927_vm12 = vweird.f32 %v2822_v1 }
 0x86a   : > { %v2906_v20 = vmul.f32 %v2905_v28, %v6085_v25  ;;  %4423 = vrcp.f32 %v2823_v48  ;;  %v2931_v12 = vand.u32 2147483647, %v2822_v1 }
 0x86b   : > { %v2915_v33 = vsel %vm2914_vm1, %v4420_v31, %v2911_v7  ;;  %v2946_v31 = vand.u32 2147483647, %v2823_v48 }
 0x86c   : > { %v2956_v49 = vperm.slane %v2906_v20, 0  ;;  %v2920_v25 = vsel %vm2917_vm0, %v2919_v44, %v2915_v33  ;;  %vm2932_vm14 = vcmp.eq.f32.partialorder %v2931_v12, 8.507059e+37 }
 0x86d   : > { %v2921_v47 = vmul.f32 %v2920_v25, %v6089_v63  ;;  %vm2947_vm0 = vcmp.eq.f32.partialorder %v2946_v31, 8.507059e+37 }
 0x86e   : > { %v2968_v46 = vmul.f32 %v2956_v49, %v5352_v17  ;;  %v2969_v15 = vmul.f32 %v2956_v49, %v5334_v2 }
 0x86f   : > { %4101 = vmatmul.msk.f32.gmra.mxu1 %vm6563_vm2, %v2962_v13  ;;  %v4422_v13 = vpop.eup %4421  ;;  %v2957_v54 = vperm.slane %v2921_v47, 0 }
 0x870   : > { %v2923_v60 = vmul.f32 %v4422_v13, %v2822_v1  ;;  %vm2928_vm11 = vweird.f32 %v4422_v13  ;;  %v4424_v35 = vpop.eup %4423 }
 0x871   : > { %v2970_v45 = vmul.f32 %v2957_v54, %v5361_v57  ;;  %vm2929_vm10 = vmor %vm2927_vm12, %vm2928_vm11  ;;  %v2938_v26 = vmul.f32 %v4424_v35, %v2823_v48  ;;  %v2971_v5 = vmul.f32 %v2957_v54, %v5344_v56  ;;  %vm2943_vm9 = vweird.f32 %v4424_v35 }
 0x872   : > { %vm2944_vm1 = vmor %vm2942_vm15, %vm2943_vm9 }
 0x873   : > { %v2939_v23 = vsub.f32 1.0, %v2938_v26 }
 0x877   : > { %4102 = vmatmul.msk.f32.gmra.mxu1 %vm6563_vm2, %v2963_v39  ;;  %v2924_v39 = vsub.f32 1.0, %v2923_v60 }
 0x879   : > { %v2925_v21 = vmul.f32 %v4422_v13, %v2924_v39 }
 0x87b   : > { %v2926_v53 = vadd.f32 %v4422_v13, %v2925_v21 }
 0x87d   : > { %v2930_v10 = vsel %vm2929_vm10, %v4422_v13, %v2926_v53 }
 0x87f   : > { %4103 = vmatmul.msk.f32.gmra.mxu1 %vm6563_vm2, %v2964_v61  ;;  %v2933_v61 = vand.u32 2147483648, %v2822_v1 }
 0x881   : > { %v2934_v22 = vor.u32 1.1754944e-38, %v2933_v61 }
 0x883   : > { %v2935_v63 = vsel %vm2932_vm14, %v2934_v22, %v2930_v10 }
 0x884   : > { %v2936_v14 = vmul.f32 %v2935_v63, %v6093_v50 }
 0x886   : > { %v2958_v38 = vperm.slane %v2936_v14, 0 }
 0x887   : > { %4104 = vmatmul.msk.f32.gmra.mxu1 %vm6563_vm2, %v2965_v18  ;;  %v2940_v18 = vmul.f32 %v4424_v35, %v2939_v23 }
 0x888   : > { %v2972_v4 = vmul.f32 %v2958_v38, %v5382_v41  ;;  %v2973_v50 = vmul.f32 %v2958_v38, %v5389_v9 }
 0x889   : > { %v2941_v0 = vadd.f32 %v4424_v35, %v2940_v18 }
 0x88b   : > { %v2945_v24 = vsel %vm2944_vm1, %v4424_v35, %v2941_v0 }
 0x88f   : > { %4105 = vmatmul.msk.f32.gmra.mxu1 %vm6563_vm2, %v2966_v36  ;;  %v2949_v36 = vor.u32 1.1754944e-38, %v2948_v30 }
 0x891   : > { %v2950_v55 = vsel %vm2947_vm0, %v2949_v36, %v2945_v24 }
 0x892   : > { %v2951_v6 = vmul.f32 %v2950_v55, %v6108_v59 }
 0x894   : > { %v2959_v43 = vperm.slane %v2951_v6, 0 }
 0x896   : > { %v2974_v3 = vmul.f32 %v2959_v43, %v5435_v27  ;;  %v2975_v28 = vmul.f32 %v2959_v43, %v5443_v16 }
 0x897   : > { %4106 = vmatmul.msk.f32.gmra.mxu1 %vm6563_vm2, %v2967_v58 }
 0x89f   : > { %4107 = vmatmul.msk.f32.gmra.mxu1 %vm6563_vm2, %v2968_v46 }
 0x8a7   : > { %4108 = vmatmul.msk.f32.gmra.mxu1 %vm6563_vm2, %v2969_v15 }
 0x8af   : > { %4109 = vmatmul.msk.f32.gmra.mxu1 %vm6563_vm2, %v2970_v45 }
 0x8b7   : > { %4110 = vmatmul.msk.f32.gmra.mxu1 %vm6563_vm2, %v2971_v5 }
 0x8bf   : > { %4111 = vmatmul.msk.f32.gmra.mxu1 %vm6563_vm2, %v2972_v4 }
 0x8c7   : > { %4112 = vmatmul.msk.f32.gmra.mxu1 %vm6563_vm2, %v2973_v50 }
 0x8cf   : > { %4113 = vmatmul.msk.f32.gmra.mxu1 %vm6563_vm2, %v2974_v3 }
 0x8d7   : > { %4114 = vmatmul.msk.f32.gmra.mxu1 %vm6563_vm2, %v2975_v28 }
 0x8dc   : > { %v3041_v1 = vpop.f32.mrf.mxu1 }
 0x8dd   : > { %v3089_v11 = vmul.f32 1.442695, %v3041_v1 }
 0x8df   : > { %4425 = vpow2.f32 %v3089_v11 }
 0x8e4   : > { %v3044_v58 = vpop.f32.mrf.mxu1 }
 0x8e5   : > { %v6220_v20 = vpop.eup %4425  ;;  %v3091_v19 = vmul.f32 1.442695, %v3044_v58 }
 0x8e6   : > { %4116 = vmatmul.msk.f32.vlgmr.msrb.gmra.mxu2 %vm1281_vm13, %v6220_v20 }
 0x8e7   : > { %4427 = vpow2.f32 %v3091_v19 }
 0x8ec   : > { %v3047_v59 = vpop.f32.mrf.mxu1 }
 0x8ed   : > { %v6224_v49 = vpop.eup %4427  ;;  %v3093_v7 = vmul.f32 1.442695, %v3047_v59 }
 0x8ee   : > { %4117 = vmatmul.msk.f32.gmra.mxu2 %vm1281_vm13, %v6224_v49 }
 0x8ef   : > { %4429 = vpow2.f32 %v3093_v7 }
 0x8f4   : > { %v3050_v13 = vpop.f32.mrf.mxu1 }
 0x8f5   : > { %v6228_v29 = vpop.eup %4429  ;;  %v3095_v46 = vmul.f32 1.442695, %v3050_v13 }
 0x8f6   : > { %4118 = vmatmul.msk.f32.gmra.mxu2 %vm1281_vm13, %v6228_v29 }
 0x8f7   : > { %4431 = vpow2.f32 %v3095_v46 }
 0x8fc   : > { %v3053_v52 = vpop.f32.mrf.mxu1 }
 0x8fd   : > { %v6232_v33 = vpop.eup %4431  ;;  %v3097_v60 = vmul.f32 1.442695, %v3053_v52 }
 0x8fe   : > { %4119 = vmatmul.msk.f32.gmra.mxu2 %vm1281_vm13, %v6232_v33 }
 0x8ff   : > { %4433 = vpow2.f32 %v3097_v60 }
 0x904   : > { %v3056_v44 = vpop.f32.mrf.mxu1 }
 0x905   : > { %v6236_v25 = vpop.eup %4433  ;;  %v3099_v48 = vmul.f32 1.442695, %v3056_v44 }
 0x906   : > { %4120 = vmatmul.msk.f32.gmra.mxu2 %vm1281_vm13, %v6236_v25 }
 0x907   : > { %4435 = vpow2.f32 %v3099_v48 }
 0x90c   : > { %v3059_v39 = vpop.f32.mrf.mxu1 }
 0x90d   : > { %v6240_v15 = vpop.eup %4435  ;;  %v3101_v47 = vmul.f32 1.442695, %v3059_v39 }
 0x90e   : > { %4121 = vmatmul.msk.f32.gmra.mxu2 %vm1281_vm13, %v6240_v15 }
 0x90f   : > { %4437 = vpow2.f32 %v3101_v47 }
 0x914   : > { %v3062_v21 = vpop.f32.mrf.mxu1 }
 0x915   : > { %v6244_v54 = vpop.eup %4437  ;;  %v3103_v53 = vmul.f32 1.442695, %v3062_v21 }
 0x916   : > { %4122 = vmatmul.msk.f32.gmra.mxu2 %vm1281_vm13, %v6244_v54 }
 0x917   : > { %4439 = vpow2.f32 %v3103_v53 }
 0x91c   : > { %v3065_v35 = vpop.f32.mrf.mxu1 }
 0x91d   : > { %v6248_v61 = vpop.eup %4439  ;;  %v3105_v45 = vmul.f32 1.442695, %v3065_v35 }
 0x91e   : > { %4123 = vmatmul.msk.f32.gmra.mxu2 %vm1281_vm13, %v6248_v61 }
 0x91f   : > { %4441 = vpow2.f32 %v3105_v45 }
 0x924   : > { %v3068_v12 = vpop.f32.mrf.mxu1 }
 0x925   : > { %v6252_v10 = vpop.eup %4441  ;;  %v3107_v26 = vmul.f32 1.442695, %v3068_v12 }
 0x926   : > { %4124 = vmatmul.msk.f32.gmra.mxu2 %vm1281_vm13, %v6252_v10 }
 0x927   : > { %4443 = vpow2.f32 %v3107_v26 }
 0x92c   : > { %v3071_v22 = vpop.f32.mrf.mxu1 }
 0x92d   : > { %v6256_v63 = vpop.eup %4443  ;;  %v3109_v23 = vmul.f32 1.442695, %v3071_v22 }
 0x92e   : > { %4125 = vmatmul.msk.f32.gmra.mxu2 %vm1281_vm13, %v6256_v63 }
 0x92f   : > { %4445 = vpow2.f32 %v3109_v23 }
 0x934   : > { %v3074_v5 = vpop.f32.mrf.mxu1 }
 0x935   : > { %v6260_v14 = vpop.eup %4445  ;;  %v3111_v18 = vmul.f32 1.442695, %v3074_v5 }
 0x936   : > { %4126 = vmatmul.msk.f32.gmra.mxu2 %vm1281_vm13, %v6260_v14 }
 0x937   : > { %4447 = vpow2.f32 %v3111_v18 }
 0x93c   : > { %v3077_v38 = vpop.f32.mrf.mxu1 }
 0x93d   : > { %v6264_v0 = vpop.eup %4447  ;;  %v3113_v30 = vmul.f32 1.442695, %v3077_v38 }
 0x93e   : > { %4127 = vmatmul.msk.f32.gmra.mxu2 %vm1281_vm13, %v6264_v0 }
 0x93f   : > { %4449 = vpow2.f32 %v3113_v30 }
 0x944   : > { %v3080_v4 = vpop.f32.mrf.mxu1 }
 0x945   : > { %v6268_v31 = vpop.eup %4449  ;;  %v3115_v24 = vmul.f32 1.442695, %v3080_v4 }
 0x946   : > { %4128 = vmatmul.msk.f32.gmra.mxu2 %vm1281_vm13, %v6268_v31 }
 0x947   : > { %4451 = vpow2.f32 %v3115_v24 }
 0x94c   : > { %v3083_v36 = vpop.f32.mrf.mxu1 }
 0x94d   : > { %v6272_v55 = vpop.eup %4451  ;;  %v3117_v50 = vmul.f32 1.442695, %v3083_v36 }
 0x94e   : > { %4129 = vmatmul.msk.f32.gmra.mxu2 %vm1281_vm13, %v6272_v55 }
 0x94f   : > { %4453 = vpow2.f32 %v3117_v50 }
 0x954   : > { %v3086_v6 = vpop.f32.mrf.mxu1 }
 0x955   : > { %v6276_v43 = vpop.eup %4453  ;;  %v3119_v3 = vmul.f32 1.442695, %v3086_v6 }
 0x956   : > { %4130 = vmatmul.msk.f32.gmra.mxu2 %vm1281_vm13, %v6276_v43 }
 0x957   : > { %4455 = vpow2.f32 %v3119_v3 }
 0x95d   : > { %v6280_v28 = vpop.eup %4455 }
 0x95e   : > { %4131 = vmatmul.msk.f32.gmra.mxu2 %vm1281_vm13, %v6280_v28 }
 0x969   : > { %v3186_v1 = vpop.f32.mrf.mxu2 }
 0x96a   : > { %4457 = vrcp.f32 %v3186_v1  ;;  %v3245_v7 = vand.u32 2147483648, %v3186_v1  ;;  %v3243_v46 = vand.u32 2147483647, %v3186_v1  ;;  %vm3239_vm12 = vweird.f32 %v3186_v1 }
 0x96c   : > { %v3246_v44 = vor.u32 1.1754944e-38, %v3245_v7  ;;  %vm3244_vm14 = vcmp.eq.f32.partialorder %v3243_v46, 8.507059e+37 }
 0x970   : > { %v4458_v11 = vpop.eup %4457 }
 0x971   : > { %v3235_v58 = vmul.f32 %v4458_v11, %v3186_v1  ;;  %v3189_v19 = vpop.f32.mrf.mxu2  ;;  %vm3240_vm11 = vweird.f32 %v4458_v11 }
 0x972   : > { %4459 = vrcp.f32 %v3189_v19  ;;  %vm3241_vm10 = vmor %vm3239_vm12, %vm3240_vm11  ;;  %v3260_v12 = vand.u32 2147483648, %v3189_v19  ;;  %v3258_v26 = vand.u32 2147483647, %v3189_v19  ;;  %vm3254_vm15 = vweird.f32 %v3189_v19 }
 0x973   : > { %v3236_v59 = vsub.f32 1.0, %v3235_v58 }
 0x974   : > { %v3261_v5 = vor.u32 1.1754944e-38, %v3260_v12  ;;  %vm3259_vm0 = vcmp.eq.f32.partialorder %v3258_v26, 8.507059e+37 }
 0x975   : > { %v3237_v13 = vmul.f32 %v4458_v11, %v3236_v59 }
 0x977   : > { %v3238_v52 = vadd.f32 %v4458_v11, %v3237_v13 }
 0x978   : > { %v4460_v60 = vpop.eup %4459 }
 0x979   : > { %v3242_v48 = vsel %vm3241_vm10, %v4458_v11, %v3238_v52  ;;  %v3250_v39 = vmul.f32 %v4460_v60, %v3189_v19  ;;  %v3192_v47 = vpop.f32.mrf.mxu2  ;;  %vm3255_vm9 = vweird.f32 %v4460_v60 }
 0x97a   : > { %v3247_v21 = vsel %vm3244_vm14, %v3246_v44, %v3242_v48  ;;  %4461 = vrcp.f32 %v3192_v47  ;;  %vm3256_vm1 = vmor %vm3254_vm15, %vm3255_vm9  ;;  %v3275_v50 = vand.u32 2147483648, %v3192_v47  ;;  %v3273_v6 = vand.u32 2147483647, %v3192_v47 }
 0x97b   : > { %v3248_v53 = vmul.f32 %v6220_v20, %v3247_v21  ;;  %v3251_v35 = vsub.f32 1.0, %v3250_v39  ;;  %vm3269_vm12 = vweird.f32 %v3192_v47 }
 0x97c   : > { %v3276_v11 = vor.u32 1.1754944e-38, %v3275_v50  ;;  %vm3274_vm14 = vcmp.eq.f32.partialorder %v3273_v6, 8.507059e+37 }
 0x97d   : > { %v3252_v45 = vmul.f32 %v4460_v60, %v3251_v35  ;;  %4133 = vmatmul.msk.f32.vlgmr.msrb.gmra.mxu3 %vm1281_vm13, %v3248_v53 }
 0x97f   : > { %v3253_v22 = vadd.f32 %v4460_v60, %v3252_v45 }
 0x980   : > { %v4462_v23 = vpop.eup %4461 }
 0x981   : > { %v3265_v18 = vmul.f32 %v4462_v23, %v3192_v47  ;;  %v3195_v38 = vpop.f32.mrf.mxu2  ;;  %v3257_v30 = vsel %vm3256_vm1, %v4460_v60, %v3253_v22  ;;  %vm3270_vm11 = vweird.f32 %v4462_v23 }
 0x982   : > { %4463 = vrcp.f32 %v3195_v38  ;;  %v3262_v24 = vsel %vm3259_vm0, %v3261_v5, %v3257_v30  ;;  %vm3271_vm10 = vmor %vm3269_vm12, %vm3270_vm11  ;;  %v3290_v52 = vand.u32 2147483648, %v3195_v38  ;;  %v3288_v60 = vand.u32 2147483647, %v3195_v38 }
 0x983   : > { %v3266_v4 = vsub.f32 1.0, %v3265_v18  ;;  %v3263_v20 = vmul.f32 %v6224_v49, %v3262_v24  ;;  %vm3284_vm15 = vweird.f32 %v3195_v38 }
 0x984   : > { %v3291_v39 = vor.u32 1.1754944e-38, %v3290_v52  ;;  %vm3289_vm0 = vcmp.eq.f32.partialorder %v3288_v60, 8.507059e+37 }
 0x985   : > { %v3267_v36 = vmul.f32 %v4462_v23, %v3266_v4  ;;  %4134 = vmatmul.msk.f32.gmra.mxu3 %vm1281_vm13, %v3263_v20 }
 0x987   : > { %v3268_v3 = vadd.f32 %v4462_v23, %v3267_v36 }
 0x988   : > { %v4464_v1 = vpop.eup %4463 }
 0x989   : > { %v3280_v58 = vmul.f32 %v4464_v1, %v3195_v38  ;;  %v3198_v19 = vpop.f32.mrf.mxu2  ;;  %v3272_v59 = vsel %vm3271_vm10, %v4462_v23, %v3268_v3  ;;  %vm3285_vm9 = vweird.f32 %v4464_v1 }
 0x98a   : > { %4465 = vrcp.f32 %v3198_v19  ;;  %v3277_v13 = vsel %vm3274_vm14, %v3276_v11, %v3272_v59  ;;  %vm3286_vm1 = vmor %vm3284_vm15, %vm3285_vm9  ;;  %v3305_v26 = vand.u32 2147483648, %v3198_v19  ;;  %v3303_v22 = vand.u32 2147483647, %v3198_v19 }
 0x98b   : > { %v3281_v7 = vsub.f32 1.0, %v3280_v58  ;;  %v3278_v49 = vmul.f32 %v6228_v29, %v3277_v13  ;;  %vm3299_vm12 = vweird.f32 %v3198_v19 }
 0x98c   : > { %v3306_v18 = vor.u32 1.1754944e-38, %v3305_v26  ;;  %vm3304_vm14 = vcmp.eq.f32.partialorder %v3303_v22, 8.507059e+37 }
 0x98d   : > { %v3282_v46 = vmul.f32 %v4464_v1, %v3281_v7  ;;  %4135 = vmatmul.msk.f32.gmra.mxu3 %vm1281_vm13, %v3278_v49 }
 0x98f   : > { %v3283_v44 = vadd.f32 %v4464_v1, %v3282_v46 }
 0x990   : > { %v4466_v48 = vpop.eup %4465 }
 0x991   : > { %v3295_v47 = vmul.f32 %v4466_v48, %v3198_v19  ;;  %v3201_v21 = vpop.f32.mrf.mxu2  ;;  %v3287_v53 = vsel %vm3286_vm1, %v4464_v1, %v3283_v44  ;;  %vm3300_vm11 = vweird.f32 %v4466_v48 }
 0x992   : > { %4467 = vrcp.f32 %v3201_v21  ;;  %v3292_v45 = vsel %vm3289_vm0, %v3291_v39, %v3287_v53  ;;  %vm3301_vm10 = vmor %vm3299_vm12, %vm3300_vm11  ;;  %v3320_v50 = vand.u32 2147483648, %v3201_v21  ;;  %v3318_v6 = vand.u32 2147483647, %v3201_v21 }
 0x993   : > { %v3296_v35 = vsub.f32 1.0, %v3295_v47  ;;  %v3293_v29 = vmul.f32 %v6232_v33, %v3292_v45  ;;  %vm3314_vm15 = vweird.f32 %v3201_v21 }
 0x994   : > { %v3321_v11 = vor.u32 1.1754944e-38, %v3320_v50  ;;  %vm3319_vm0 = vcmp.eq.f32.partialorder %v3318_v6, 8.507059e+37 }
 0x995   : > { %v3297_v12 = vmul.f32 %v4466_v48, %v3296_v35  ;;  %4136 = vmatmul.msk.f32.gmra.mxu3 %vm1281_vm13, %v3293_v29 }
 0x997   : > { %v3298_v23 = vadd.f32 %v4466_v48, %v3297_v12 }
 0x998   : > { %v4468_v5 = vpop.eup %4467 }
 0x999   : > { %v3310_v38 = vmul.f32 %v4468_v5, %v3201_v21  ;;  %v3204_v30 = vpop.f32.mrf.mxu2  ;;  %v3302_v4 = vsel %vm3301_vm10, %v4466_v48, %v3298_v23  ;;  %vm3315_vm9 = vweird.f32 %v4468_v5 }
 0x99a   : > { %4469 = vrcp.f32 %v3204_v30  ;;  %v3307_v20 = vsel %vm3304_vm14, %v3306_v18, %v3302_v4  ;;  %vm3316_vm1 = vmor %vm3314_vm15, %vm3315_vm9  ;;  %v3335_v46 = vand.u32 2147483648, %v3204_v30  ;;  %v3333_v52 = vand.u32 2147483647, %v3204_v30 }
 0x99b   : > { %v3311_v24 = vsub.f32 1.0, %v3310_v38  ;;  %v3308_v33 = vmul.f32 %v6236_v25, %v3307_v20  ;;  %vm3329_vm12 = vweird.f32 %v3204_v30 }
 0x99c   : > { %v3336_v48 = vor.u32 1.1754944e-38, %v3335_v46  ;;  %vm3334_vm14 = vcmp.eq.f32.partialorder %v3333_v52, 8.507059e+37 }
 0x99d   : > { %v3312_v36 = vmul.f32 %v4468_v5, %v3311_v24  ;;  %4137 = vmatmul.msk.f32.gmra.mxu3 %vm1281_vm13, %v3308_v33 }
 0x99f   : > { %v3313_v3 = vadd.f32 %v4468_v5, %v3312_v36 }
 0x9a0   : > { %v4470_v1 = vpop.eup %4469 }
 0x9a1   : > { %v3325_v58 = vmul.f32 %v4470_v1, %v3204_v30  ;;  %v3207_v19 = vpop.f32.mrf.mxu2  ;;  %v3317_v59 = vsel %vm3316_vm1, %v4468_v5, %v3313_v3  ;;  %vm3330_vm11 = vweird.f32 %v4470_v1 }
 0x9a2   : > { %4471 = vrcp.f32 %v3207_v19  ;;  %v3322_v13 = vsel %vm3319_vm0, %v3321_v11, %v3317_v59  ;;  %vm3331_vm10 = vmor %vm3329_vm12, %vm3330_vm11  ;;  %v3350_v29 = vand.u32 2147483648, %v3207_v19  ;;  %v3348_v12 = vand.u32 2147483647, %v3207_v19 }
 0x9a3   : > { %v3326_v7 = vsub.f32 1.0, %v3325_v58  ;;  %v3323_v25 = vmul.f32 %v6240_v15, %v3322_v13  ;;  %vm3344_vm15 = vweird.f32 %v3207_v19 }
 0x9a4   : > { %v3351_v23 = vor.u32 1.1754944e-38, %v3350_v29  ;;  %vm3349_vm0 = vcmp.eq.f32.partialorder %v3348_v12, 8.507059e+37 }
 0x9a5   : > { %v3327_v49 = vmul.f32 %v4470_v1, %v3326_v7  ;;  %4138 = vmatmul.msk.f32.gmra.mxu3 %vm1281_vm13, %v3323_v25 }
 0x9a7   : > { %v3328_v60 = vadd.f32 %v4470_v1, %v3327_v49 }
 0x9a8   : > { %v4472_v44 = vpop.eup %4471 }
 0x9a9   : > { %v3340_v39 = vmul.f32 %v4472_v44, %v3207_v19  ;;  %v3210_v47 = vpop.f32.mrf.mxu2  ;;  %v3332_v21 = vsel %vm3331_vm10, %v4470_v1, %v3328_v60  ;;  %vm3345_vm9 = vweird.f32 %v4472_v44 }
 0x9aa   : > { %4473 = vrcp.f32 %v3210_v47  ;;  %v3337_v35 = vsel %vm3334_vm14, %v3336_v48, %v3332_v21  ;;  %vm3346_vm1 = vmor %vm3344_vm15, %vm3345_vm9  ;;  %v3365_v20 = vand.u32 2147483648, %v3210_v47  ;;  %v3363_v33 = vand.u32 2147483647, %v3210_v47 }
 0x9ab   : > { %v3341_v53 = vsub.f32 1.0, %v3340_v39  ;;  %v3338_v15 = vmul.f32 %v6244_v54, %v3337_v35  ;;  %vm3359_vm12 = vweird.f32 %v3210_v47 }
 0x9ac   : > { %v3366_v6 = vor.u32 1.1754944e-38, %v3365_v20  ;;  %vm3364_vm14 = vcmp.eq.f32.partialorder %v3363_v33, 8.507059e+37 }
 0x9ad   : > { %v3342_v45 = vmul.f32 %v4472_v44, %v3341_v53  ;;  %4139 = vmatmul.msk.f32.gmra.mxu3 %vm1281_vm13, %v3338_v15 }
 0x9af   : > { %v3343_v26 = vadd.f32 %v4472_v44, %v3342_v45 }
 0x9b0   : > { %v4474_v22 = vpop.eup %4473 }
 0x9b1   : > { %v3355_v5 = vmul.f32 %v4474_v22, %v3210_v47  ;;  %v3213_v18 = vpop.f32.mrf.mxu2  ;;  %v3347_v38 = vsel %vm3346_vm1, %v4472_v44, %v3343_v26  ;;  %vm3360_vm11 = vweird.f32 %v4474_v22 }
 0x9b2   : > { %4475 = vrcp.f32 %v3213_v18  ;;  %v3352_v4 = vsel %vm3349_vm0, %v3351_v23, %v3347_v38  ;;  %vm3361_vm10 = vmor %vm3359_vm12, %vm3360_vm11  ;;  %v3380_v7 = vand.u32 2147483648, %v3213_v18  ;;  %v3378_v13 = vand.u32 2147483647, %v3213_v18 }
 0x9b3   : > { %v3356_v30 = vsub.f32 1.0, %v3355_v5  ;;  %v3353_v54 = vmul.f32 %v6248_v61, %v3352_v4  ;;  %vm3374_vm15 = vweird.f32 %v3213_v18 }
 0x9b4   : > { %v3381_v46 = vor.u32 1.1754944e-38, %v3380_v7  ;;  %vm3379_vm0 = vcmp.eq.f32.partialorder %v3378_v13, 8.507059e+37 }
 0x9b5   : > { %v3357_v24 = vmul.f32 %v4474_v22, %v3356_v30  ;;  %4140 = vmatmul.msk.f32.gmra.mxu3 %vm1281_vm13, %v3353_v54 }
 0x9b7   : > { %v3358_v36 = vadd.f32 %v4474_v22, %v3357_v24 }
 0x9b8   : > { %v4476_v50 = vpop.eup %4475 }
 0x9b9   : > { %v3370_v3 = vmul.f32 %v4476_v50, %v3213_v18  ;;  %v3216_v1 = vpop.f32.mrf.mxu2  ;;  %v3362_v11 = vsel %vm3361_vm10, %v4474_v22, %v3358_v36  ;;  %vm3375_vm9 = vweird.f32 %v4476_v50 }
 0x9ba   : > { %4477 = vrcp.f32 %v3216_v1  ;;  %v3367_v19 = vsel %vm3364_vm14, %v3366_v6, %v3362_v11  ;;  %vm3376_vm1 = vmor %vm3374_vm15, %vm3375_vm9  ;;  %v3395_v21 = vand.u32 2147483648, %v3216_v1  ;;  %v3393_v53 = vand.u32 2147483647, %v3216_v1 }
 0x9bb   : > { %v3371_v58 = vsub.f32 1.0, %v3370_v3  ;;  %v3368_v61 = vmul.f32 %v6252_v10, %v3367_v19  ;;  %vm3389_vm12 = vweird.f32 %v3216_v1 }
 0x9bc   : > { %v3396_v45 = vor.u32 1.1754944e-38, %v3395_v21  ;;  %vm3394_vm14 = vcmp.eq.f32.partialorder %v3393_v53, 8.507059e+37 }
 0x9bd   : > { %v3372_v59 = vmul.f32 %v4476_v50, %v3371_v58  ;;  %4141 = vmatmul.msk.f32.gmra.mxu3 %vm1281_vm13, %v3368_v61 }
 0x9bf   : > { %v3373_v25 = vadd.f32 %v4476_v50, %v3372_v59 }
 0x9c0   : > { %v4478_v49 = vpop.eup %4477 }
 0x9c1   : > { %v3385_v52 = vmul.f32 %v4478_v49, %v3216_v1  ;;  %v3219_v60 = vpop.f32.mrf.mxu2  ;;  %v3377_v44 = vsel %vm3376_vm1, %v4476_v50, %v3373_v25  ;;  %vm3390_vm11 = vweird.f32 %v4478_v49 }
 0x9c2   : > { %4479 = vrcp.f32 %v3219_v60  ;;  %v3382_v39 = vsel %vm3379_vm0, %v3381_v46, %v3377_v44  ;;  %vm3391_vm10 = vmor %vm3389_vm12, %vm3390_vm11  ;;  %v3410_v18 = vand.u32 2147483648, %v3219_v60  ;;  %v3408_v38 = vand.u32 2147483647, %v3219_v60 }
 0x9c3   : > { %v3386_v48 = vsub.f32 1.0, %v3385_v52  ;;  %v3383_v10 = vmul.f32 %v6256_v63, %v3382_v39  ;;  %vm3404_vm15 = vweird.f32 %v3219_v60 }
 0x9c4   : > { %v3411_v54 = vor.u32 1.1754944e-38, %v3410_v18  ;;  %vm3409_vm0 = vcmp.eq.f32.partialorder %v3408_v38, 8.507059e+37 }
 0x9c5   : > { %v3387_v47 = vmul.f32 %v4478_v49, %v3386_v48  ;;  %4142 = vmatmul.msk.f32.gmra.mxu3 %vm1281_vm13, %v3383_v10 }
 0x9c7   : > { %v3388_v35 = vadd.f32 %v4478_v49, %v3387_v47 }
 0x9c8   : > { %v4480_v15 = vpop.eup %4479 }
 0x9c9   : > { %v3400_v29 = vmul.f32 %v4480_v15, %v3219_v60  ;;  %v3222_v12 = vpop.f32.mrf.mxu2  ;;  %v3392_v26 = vsel %vm3391_vm10, %v4478_v49, %v3388_v35  ;;  %vm3405_vm9 = vweird.f32 %v4480_v15 }
 0x9ca   : > { %4481 = vrcp.f32 %v3222_v12  ;;  %v3397_v23 = vsel %vm3394_vm14, %v3396_v45, %v3392_v26  ;;  %vm3406_vm1 = vmor %vm3404_vm15, %vm3405_vm9  ;;  %v3425_v3 = vand.u32 2147483648, %v3222_v12  ;;  %v3423_v1 = vand.u32 2147483647, %v3222_v12 }
 0x9cb   : > { %v3401_v22 = vsub.f32 1.0, %v3400_v29  ;;  %v3398_v63 = vmul.f32 %v6260_v14, %v3397_v23  ;;  %vm3419_vm12 = vweird.f32 %v3222_v12 }
 0x9cc   : > { %v3426_v19 = vor.u32 1.1754944e-38, %v3425_v3  ;;  %vm3424_vm14 = vcmp.eq.f32.partialorder %v3423_v1, 8.507059e+37 }
 0x9cd   : > { %v3402_v5 = vmul.f32 %v4480_v15, %v3401_v22  ;;  %4143 = vmatmul.msk.f32.gmra.mxu3 %vm1281_vm13, %v3398_v63 }
 0x9cf   : > { %v3403_v30 = vadd.f32 %v4480_v15, %v3402_v5 }
 0x9d0   : > { %v4482_v4 = vpop.eup %4481 }
 0x9d1   : > { %v3415_v24 = vmul.f32 %v4482_v4, %v3222_v12  ;;  %v3225_v20 = vpop.f32.mrf.mxu2  ;;  %v3407_v33 = vsel %vm3406_vm1, %v4480_v15, %v3403_v30  ;;  %vm3420_vm11 = vweird.f32 %v4482_v4 }
 0x9d2   : > { %4483 = vrcp.f32 %v3225_v20  ;;  %v3412_v50 = vsel %vm3409_vm0, %v3411_v54, %v3407_v33  ;;  %vm3421_vm10 = vmor %vm3419_vm12, %vm3420_vm11  ;;  %v3440_v46 = vand.u32 2147483648, %v3225_v20  ;;  %v3438_v52 = vand.u32 2147483647, %v3225_v20 }
 0x9d3   : > { %v3416_v36 = vsub.f32 1.0, %v3415_v24  ;;  %v3413_v14 = vmul.f32 %v6264_v0, %v3412_v50  ;;  %vm3434_vm15 = vweird.f32 %v3225_v20 }
 0x9d4   : > { %v3441_v48 = vor.u32 1.1754944e-38, %v3440_v46  ;;  %vm3439_vm0 = vcmp.eq.f32.partialorder %v3438_v52, 8.507059e+37 }
 0x9d5   : > { %v3417_v6 = vmul.f32 %v4482_v4, %v3416_v36  ;;  %4144 = vmatmul.msk.f32.gmra.mxu3 %vm1281_vm13, %v3413_v14 }
 0x9d7   : > { %v3418_v11 = vadd.f32 %v4482_v4, %v3417_v6 }
 0x9d8   : > { %v4484_v58 = vpop.eup %4483 }
 0x9d9   : > { %v3430_v61 = vmul.f32 %v4484_v58, %v3225_v20  ;;  %v3228_v59 = vpop.f32.mrf.mxu2  ;;  %v3422_v7 = vsel %vm3421_vm10, %v4482_v4, %v3418_v11  ;;  %vm3435_vm9 = vweird.f32 %v4484_v58 }
 0x9da   : > { %4485 = vrcp.f32 %v3228_v59  ;;  %v3427_v25 = vsel %vm3424_vm14, %v3426_v19, %v3422_v7  ;;  %vm3436_vm1 = vmor %vm3434_vm15, %vm3435_vm9  ;;  %v3455_v35 = vand.u32 2147483648, %v3228_v59  ;;  %v3453_v45 = vand.u32 2147483647, %v3228_v59 }
 0x9db   : > { %v3431_v13 = vsub.f32 1.0, %v3430_v61  ;;  %v3428_v0 = vmul.f32 %v6268_v31, %v3427_v25  ;;  %vm3449_vm12 = vweird.f32 %v3228_v59 }
 0x9dc   : > { %v3456_v26 = vor.u32 1.1754944e-38, %v3455_v35  ;;  %vm3454_vm14 = vcmp.eq.f32.partialorder %v3453_v45, 8.507059e+37 }
 0x9dd   : > { %v3432_v49 = vmul.f32 %v4484_v58, %v3431_v13  ;;  %4145 = vmatmul.msk.f32.gmra.mxu3 %vm1281_vm13, %v3428_v0 }
 0x9df   : > { %v3433_v60 = vadd.f32 %v4484_v58, %v3432_v49 }
 0x9e0   : > { %v4486_v44 = vpop.eup %4485 }
 0x9e1   : > { %v3445_v39 = vmul.f32 %v4486_v44, %v3228_v59  ;;  %v3231_v10 = vpop.f32.mrf.mxu2  ;;  %v3437_v47 = vsel %vm3436_vm1, %v4484_v58, %v3433_v60  ;;  %vm3450_vm11 = vweird.f32 %v4486_v44 }
 0x9e2   : > { %4487 = vrcp.f32 %v3231_v10  ;;  %v3442_v53 = vsel %vm3439_vm0, %v3441_v48, %v3437_v47  ;;  %vm3451_vm10 = vmor %vm3449_vm12, %vm3450_vm11  ;;  %v3470_v38 = vand.u32 2147483648, %v3231_v10  ;;  %vm3464_vm15 = vweird.f32 %v3231_v10 }
 0x9e3   : > { %v3446_v21 = vsub.f32 1.0, %v3445_v39  ;;  %v3443_v31 = vmul.f32 %v6272_v55, %v3442_v53  ;;  %v3468_v55 = vand.u32 2147483647, %v3231_v10 }
 0x9e4   : > { %v3471_v54 = vor.u32 1.1754944e-38, %v3470_v38 }
 0x9e5   : > { %v3447_v15 = vmul.f32 %v4486_v44, %v3446_v21  ;;  %4146 = vmatmul.msk.f32.gmra.mxu3 %vm1281_vm13, %v3443_v31  ;;  %vm3469_vm0 = vcmp.eq.f32.partialorder %v3468_v55, 8.507059e+37 }
 0x9e7   : > { %v3448_v29 = vadd.f32 %v4486_v44, %v3447_v15 }
 0x9e8   : > { %v4488_v12 = vpop.eup %4487 }
 0x9e9   : > { %v3460_v22 = vmul.f32 %v4488_v12, %v3231_v10  ;;  %v3452_v23 = vsel %vm3451_vm10, %v4486_v44, %v3448_v29  ;;  %vm3465_vm9 = vweird.f32 %v4488_v12 }
 0x9ea   : > { %v3457_v63 = vsel %vm3454_vm14, %v3456_v26, %v3452_v23  ;;  %vm3466_vm1 = vmor %vm3464_vm15, %vm3465_vm9 }
 0x9eb   : > { %v3461_v5 = vsub.f32 1.0, %v3460_v22  ;;  %v3458_v18 = vmul.f32 %v6276_v43, %v3457_v63 }
 0x9ed   : > { %v3462_v30 = vmul.f32 %v4488_v12, %v3461_v5  ;;  %4147 = vmatmul.msk.f32.gmra.mxu3 %vm1281_vm13, %v3458_v18 }
 0x9ef   : > { %v3463_v4 = vadd.f32 %v4488_v12, %v3462_v30 }
 0x9f1   : > { %v3467_v24 = vsel %vm3466_vm1, %v4488_v12, %v3463_v4 }
 0x9f2   : > { %v3472_v20 = vsel %vm3469_vm0, %v3471_v54, %v3467_v24 }
 0x9f3   : > { %v3473_v33 = vmul.f32 %v6280_v28, %v3472_v20 }
 0x9f5   : > { %4148 = vmatmul.msk.f32.gmra.mxu3 %vm1281_vm13, %v3473_v33  ;;  %vm6593_vm13 = vcmask 1047559  }
 0xa00   : > { %v3539_v36 = vpop.f32.mrf.mxu3 }
 0xa01   : > { %v3587_v43 = vmul.f32 %v3539_v36, %v5337_v37 }
 0xa03   : > { %v3603_v6 = vsel %vm6563_vm2, %v3587_v43, 0.0 }
 0xa08   : > { %v3542_v50 = vpop.f32.mrf.mxu3 }
 0xa09   : > { %v3588_v14 = vmul.f32 %v3542_v50, %v5318_v62 }
 0xa0b   : > { %v3604_v3 = vsel %vm6563_vm2, %v3588_v14, 0.0 }
 0xa0c   : > { %v3605_v1 = vadd.f32 %v3604_v3, %v3603_v6 }
 0xa0e   : > { %v3606_v5 = vrot.slane %v3605_v1, 4 }
 0xa10   : > { %v3545_v11 = vpop.f32.mrf.mxu3  ;;  %v3607_v24 = vadd.f32 %v3606_v5, %v3605_v1 }
 0xa11   : > { %v3589_v58 = vmul.f32 %v3545_v11, %v5321_v8 }
 0xa12   : > { %v3608_v6 = vrot.slane %v3607_v24, 2 }
 0xa13   : > { %v3612_v28 = vsel %vm6563_vm2, %v3589_v58, 0.0 }
 0xa18   : > { %v3548_v19 = vpop.f32.mrf.mxu3 }
 0xa19   : > { %v3590_v61 = vmul.f32 %v3548_v19, %v5305_v42 }
 0xa1b   : > { %v3613_v59 = vsel %vm6563_vm2, %v3590_v61, 0.0 }
 0xa1c   : > { %v3614_v7 = vadd.f32 %v3613_v59, %v3612_v28 }
 0xa1e   : > { %v3615_v26 = vrot.slane %v3614_v7, 4 }
 0xa20   : > { %v3551_v37 = vpop.f32.mrf.mxu3  ;;  %v3616_v30 = vadd.f32 %v3615_v26, %v3614_v7  ;;  %v3609_v7 = vadd.f32 %v3608_v6, %v3607_v24 }
 0xa21   : > { %v3591_v13 = vmul.f32 %v3551_v37, %v5331_v40 }
 0xa23   : > { %v3621_v0 = vsel %vm6563_vm2, %v3591_v13, 0.0 }
 0xa28   : > { %v3554_v62 = vpop.f32.mrf.mxu3 }
 0xa29   : > { %v3592_v25 = vmul.f32 %v3554_v62, %v5314_v32 }
 0xa2b   : > { %v3622_v49 = vsel %vm6563_vm2, %v3592_v25, 0.0 }
 0xa2c   : > { %v3623_v46 = vadd.f32 %v3622_v49, %v3621_v0 }
 0xa30   : > { %v3557_v8 = vpop.f32.mrf.mxu3 }
 0xa31   : > { %v3593_v40 = vmul.f32 %v3557_v8, %v5342_v51 }
 0xa33   : > { %v3630_v15 = vsel %vm6563_vm2, %v3593_v40, 0.0 }
 0xa38   : > { %v3560_v52 = vpop.f32.mrf.mxu3 }
 0xa39   : > { %v3594_v10 = vmul.f32 %v3560_v52, %v5324_v34 }
 0xa3b   : > { %v3631_v53 = vsel %vm6563_vm2, %v3594_v10, 0.0 }
 0xa3c   : > { %v3632_v29 = vadd.f32 %v3631_v53, %v3630_v15 }
 0xa3e   : > { %v3633_v18 = vrot.slane %v3632_v29, 4 }
 0xa40   : > { %v3563_v60 = vpop.f32.mrf.mxu3  ;;  %v3634_v20 = vadd.f32 %v3633_v18, %v3632_v29 }
 0xa41   : > { %v3595_v21 = vmul.f32 %v3563_v60, %v5352_v17  ;;  %v3610_v60 = vrot.slane %v3609_v7, 1 }
 0xa42   : > { %v3635_v3 = vrot.slane %v3634_v20, 2 }
 0xa44   : > { %v3636_v37 = vadd.f32 %v3635_v3, %v3634_v20 }
 0xa48   : > { %v3566_v42 = vpop.f32.mrf.mxu3 }
 0xa49   : > { %v3596_v47 = vmul.f32 %v3566_v42, %v5334_v2  ;;  %v3639_v2 = vsel %vm6563_vm2, %v3595_v21, 0.0  ;;  %v3637_v42 = vrot.slane %v3636_v37, 1 }
 0xa4b   : > { %v3640_v31 = vsel %vm6563_vm2, %v3596_v47, 0.0 }
 0xa4c   : > { %v3641_v12 = vadd.f32 %v3640_v31, %v3639_v2 }
 0xa50   : > { %v3569_v44 = vpop.f32.mrf.mxu3 }
 0xa51   : > { %v3597_v35 = vmul.f32 %v3569_v44, %v5361_v57  ;;  %v3624_v57 = vrot.slane %v3623_v46, 4 }
 0xa53   : > { %v3625_v4 = vadd.f32 %v3624_v57, %v3623_v46 }
 0xa55   : > { %v3626_v50 = vrot.slane %v3625_v4, 2 }
 0xa57   : > { %v3627_v61 = vadd.f32 %v3626_v50, %v3625_v4 }
 0xa58   : > { %v3572_v48 = vpop.f32.mrf.mxu3 }
 0xa59   : > { %v3598_v32 = vmul.f32 %v3572_v48, %v5344_v56  ;;  %v3648_v56 = vsel %vm6563_vm2, %v3597_v35, 0.0  ;;  %v3628_v49 = vrot.slane %v3627_v61, 1 }
 0xa5b   : > { %v3649_v45 = vsel %vm6563_vm2, %v3598_v32, 0.0  ;;  %v6350_v47 = vadd.f32 %v3628_v49, %v3627_v61  ;;  %v6354_v32 = vadd.f32 %v3637_v42, %v3636_v37 }
 0xa5c   : > { %v3650_v22 = vadd.f32 %v3649_v45, %v3648_v56 }
 0xa5d   : > { %v3677_v45 = vmul.f32 %v6350_v47, %v6350_v47  ;;  %v3678_v2 = vmul.f32 %v6354_v32, %v6354_v32 }
 0xa5e   : > { %v3651_v55 = vrot.slane %v3650_v22, 4 }
 0xa60   : > { %v3575_v39 = vpop.f32.mrf.mxu3  ;;  %v3652_v43 = vadd.f32 %v3651_v55, %v3650_v22 }
 0xa61   : > { %v3599_v34 = vmul.f32 %v3575_v39, %v5382_v41  ;;  %v3642_v41 = vrot.slane %v3641_v12, 4 }
 0xa62   : > { %v3653_v19 = vrot.slane %v3652_v43, 2 }
 0xa63   : > { %v3657_v23 = vsel %vm6563_vm2, %v3599_v34, 0.0  ;;  %v3643_v36 = vadd.f32 %v3642_v41, %v3641_v12 }
 0xa64   : > { %v3654_v0 = vadd.f32 %v3653_v19, %v3652_v43 }
 0xa65   : > { %v3644_v11 = vrot.slane %v3643_v36, 2 }
 0xa67   : > { %v3645_v1 = vadd.f32 %v3644_v11, %v3643_v36 }
 0xa68   : > { %v3578_v51 = vpop.f32.mrf.mxu3 }
 0xa69   : > { %v3600_v17 = vmul.f32 %v3578_v51, %v5389_v9  ;;  %v3617_v9 = vrot.slane %v3616_v30, 2  ;;  %v3646_v48 = vrot.slane %v3645_v1, 1 }
 0xa6b   : > { %v3658_v63 = vsel %vm6563_vm2, %v3600_v17, 0.0  ;;  %v3618_v58 = vadd.f32 %v3617_v9, %v3616_v30  ;;  %v6356_v53 = vadd.f32 %v3646_v48, %v3645_v1 }
 0xa6c   : > { %v3659_v38 = vadd.f32 %v3658_v63, %v3657_v23 }
 0xa6d   : > { %v3619_v25 = vrot.slane %v3618_v58, 1  ;;  %v3679_v12 = vmul.f32 %v6356_v53, %v6356_v53 }
 0xa6e   : > { %v3660_v54 = vrot.slane %v3659_v38, 4 }
 0xa6f   : > { %v6348_v39 = vadd.f32 %v3619_v25, %v3618_v58 }
 0xa70   : > { %v3581_v33 = vpop.f32.mrf.mxu3  ;;  %v3661_v14 = vadd.f32 %v3660_v54, %v3659_v38 }
 0xa71   : > { %v3601_v59 = vmul.f32 %v3581_v33, %v5435_v27  ;;  %v3655_v27 = vrot.slane %v3654_v0, 1  ;;  %v3676_v35 = vmul.f32 %v6348_v39, %v6348_v39 }
 0xa72   : > { %v3662_v28 = vrot.slane %v3661_v14, 2 }
 0xa73   : > { %v3666_v8 = vsel %vm6563_vm2, %v3601_v59, 0.0  ;;  %v6360_v31 = vadd.f32 %v3655_v27, %v3654_v0 }
 0xa74   : > { %v3663_v46 = vadd.f32 %v3662_v28, %v3661_v14 }
 0xa75   : > { %v3680_v17 = vmul.f32 %v6360_v31, %v6360_v31 }
 0xa76   : > { %v3664_v40 = vrot.slane %v3663_v46, 1 }
 0xa78   : > { %v3584_v13 = vpop.f32.mrf.mxu3  ;;  %v6364_v34 = vadd.f32 %v3664_v40, %v3663_v46 }
 0xa79   : > { %v3602_v62 = vmul.f32 %v3584_v13, %v5443_v16  ;;  %v6352_v16 = vadd.f32 %v3610_v60, %v3609_v7 }
 0xa7a   : > { %v3681_v57 = vmul.f32 %v6364_v34, %v6364_v34 }
 0xa7b   : > { %v3667_v52 = vsel %vm6563_vm2, %v3602_v62, 0.0  ;;  %v3675_v29 = vmul.f32 %v6352_v16, %v6352_v16 }
 0xa7c   : > { %v3668_v44 = vadd.f32 %v3667_v52, %v3666_v8 }
 0xa7d   : > { %v3691_v56 = vsel %vm921_vm3, %v3676_v35, %v3675_v29 }
 0xa7e   : > { %v3669_v10 = vrot.slane %v3668_v44, 4  ;;  %v3692_v22 = vsel %vm923_vm4, %v3677_v45, %v3691_v56 }
 0xa7f   : > { %v3693_v23 = vsel %vm6567_vm5, %v3678_v2, %v3692_v22 }
 0xa80   : > { %v3670_v21 = vadd.f32 %v3669_v10, %v3668_v44  ;;  %v3694_v5 = vsel %vm6566_vm6, %v3679_v12, %v3693_v23 }
 0xa81   : > { %v3695_v38 = vsel %vm6565_vm7, %v3680_v17, %v3694_v5 }
 0xa82   : > { %v3671_v15 = vrot.slane %v3670_v21, 2  ;;  %v3696_v41 = vsel %vm6564_vm8, %v3681_v57, %v3695_v38 }
 0xa84   : > { %v3672_v51 = vadd.f32 %v3671_v15, %v3670_v21 }
 0xa86   : > { %v3673_v26 = vrot.slane %v3672_v51, 1 }
 0xa88   : > { %v6379_v63 = vadd.f32 %v3673_v26, %v3672_v51 }
 0xa8a   : > { %v3682_v18 = vmul.f32 %v6379_v63, %v6379_v63 }
 0xa8c   : > { %v3697_v30 = vsel %vm6593_vm13, %v3682_v18, %v3696_v41 }
 0xa8d   : > { %4150 = vmatmul.msk.f32.vlgmr.msra.gmra.mxu1 %vm6563_vm2, %v3697_v30 }
 0xb0a   : > { %v3717_v55 = vpop.f32.mrf.mxu1 }
 0xb0b   : > { %v3718_v4 = vadd.f32 1e-07, %v3717_v55 }
 0xb0d   : > { %4489 = vrsqrt.f32 %v3718_v4  ;;  %vm3727_vm11 = vcmp.eq.f32.partialorder %v3718_v4, inf  ;;  %v3730_v50 = vand.u32 2147483648, %v3718_v4  ;;  %vm3729_vm12 = vcmp.eq.f32.partialorder %v3718_v4, 0.0 }
 0xb13   : > { %v4490_v54 = vpop.eup %4489 }
 0xb14   : > { %v3721_v24 = vmul.f32 %v4490_v54, %v3718_v4 }
 0xb16   : > { %v3722_v20 = vmul.f32 %v4490_v54, %v3721_v24 }
 0xb18   : > { %v3723_v33 = vmul.f32 0.5, %v3722_v20 }
 0xb1a   : > { %v3724_v36 = vsub.f32 1.5, %v3723_v33 }
 0xb1c   : > { %v3725_v9 = vmul.f32 %v4490_v54, %v3724_v36 }
 0xb1e   : > { %v3726_v43 = vmul.f32 %v3725_v9, %v3718_v4 }
 0xb20   : > { %v3728_v14 = vsel %vm3727_vm11, %v3718_v4, %v3726_v43 }
 0xb21   : > { %v3731_v6 = vsel %vm3729_vm12, %v3730_v50, %v3728_v14 }
 0xb22   : > { %4491 = vrcp.f32 %v3731_v6  ;;  %v3733_v3 = vrot.slane %v3731_v6, 1  ;;  %v6388_v11 = vrot.slane %v3731_v6, 2  ;;  %v6390_v58 = vrot.slane %v3731_v6, 3 }
 0xb23   : > { %v6392_v19 = vrot.slane %v3731_v6, 4  ;;  %v3759_v61 = vand.u32 2147483648, %v3731_v6  ;;  %v6398_v37 = vrot.slane %v3731_v6, 5  ;;  %v6400_v13 = vrot.slane %v3731_v6, 6 }
 0xb24   : > { %4493 = vrcp.f32 %v3733_v3  ;;  %v3772_v28 = vand.u32 2147483647, %v3733_v3  ;;  %v3774_v59 = vand.u32 2147483648, %v3733_v3  ;;  %v6402_v1 = vrot.slane %v3731_v6, 7 }
 0xb25   : > { %4495 = vrcp.f32 %v6388_v11  ;;  %v3787_v62 = vand.u32 2147483647, %v6388_v11  ;;  %vm3753_vm10 = vweird.f32 %v3731_v6  ;;  %v3757_v0 = vand.u32 2147483647, %v3731_v6 }
 0xb26   : > { %4497 = vrcp.f32 %v6390_v58  ;;  %v6407_v46 = vor.u32 1.1754944e-38, %v3759_v61  ;;  %vm3768_vm14 = vweird.f32 %v3733_v3  ;;  %vm3783_vm9 = vweird.f32 %v6388_v11 }
 0xb27   : > { %4499 = vrcp.f32 %v6392_v19  ;;  %v3789_v8 = vand.u32 2147483648, %v6388_v11  ;;  %vm6411_vm15 = vcmp.eq.f32.partialorder %v3772_v28, 8.507059e+37  ;;  %v3775_v48 = vor.u32 1.1754944e-38, %v3774_v59 }
 0xb28   : > { %v6396_v7 = vpop.eup %4491  ;;  %vm6416_vm1 = vcmp.eq.f32.partialorder %v3787_v62, 8.507059e+37  ;;  %vm3798_vm0 = vweird.f32 %v6390_v58  ;;  %4501 = vrcp.f32 %v6398_v37  ;;  %v3802_v15 = vand.u32 2147483647, %v6390_v58 }
 0xb29   : > { %v3749_v25 = vmul.f32 %v6396_v7, %v3731_v6  ;;  %v3804_v45 = vand.u32 2147483648, %v6390_v58  ;;  %vm3754_vm13 = vweird.f32 %v6396_v7  ;;  %vm6426_vm11 = vcmp.eq.f32.partialorder %v3757_v0, 8.507059e+37 }
 0xb2a   : > { %v4494_v49 = vpop.eup %4493  ;;  %v3790_v51 = vor.u32 1.1754944e-38, %v3789_v8  ;;  %4503 = vrcp.f32 %v6400_v13  ;;  %vm6438_vm8 = vmor %vm3753_vm10, %vm3754_vm13  ;;  %vm6442_vm7 = vcmp.eq.f32.partialorder %v3802_v15, 8.507059e+37  ;;  %v3817_v30 = vand.u32 2147483647, %v6392_v19 }
 0xb2b   : > { %v4496_v52 = vpop.eup %4495  ;;  %v3750_v60 = vsub.f32 1.0, %v3749_v25  ;;  %v3764_v42 = vmul.f32 %v4494_v49, %v3733_v3  ;;  %vm3769_vm12 = vweird.f32 %v4494_v49  ;;  %v3805_v41 = vor.u32 1.1754944e-38, %v3804_v45 }
 0xb2c   : > { %v3779_v27 = vmul.f32 %v4496_v52, %v6388_v11  ;;  %v4498_v40 = vpop.eup %4497  ;;  %vm3784_vm2 = vweird.f32 %v4496_v52  ;;  %vm3770_vm6 = vmor %vm3768_vm14, %vm3769_vm12  ;;  %v3819_v36 = vand.u32 2147483648, %v6392_v19  ;;  %vm6466_vm14 = vcmp.eq.f32.partialorder %v3817_v30, 8.507059e+37 }
 0xb2d   : > { %v3751_v21 = vmul.f32 %v6396_v7, %v3750_v60  ;;  %v3765_v35 = vsub.f32 1.0, %v3764_v42  ;;  %v3794_v12 = vmul.f32 %v4498_v40, %v6390_v58  ;;  %v6431_v56 = vpop.eup %4499  ;;  %vm3799_vm5 = vweird.f32 %v4498_v40  ;;  %vm3785_vm10 = vmor %vm3783_vm9, %vm3784_vm2 }
 0xb2e   : > { %v3780_v2 = vsub.f32 1.0, %v3779_v27  ;;  %v3809_v23 = vmul.f32 %v6431_v56, %v6392_v19  ;;  %v4502_v55 = vpop.eup %4501  ;;  %vm3813_vm2 = vweird.f32 %v6392_v19  ;;  %v3820_v0 = vor.u32 1.1754944e-38, %v3819_v36 }
 0xb2f   : > { %v3752_v17 = vadd.f32 %v6396_v7, %v3751_v21  ;;  %v3766_v26 = vmul.f32 %v4494_v49, %v3765_v35  ;;  %v3795_v57 = vsub.f32 1.0, %v3794_v12  ;;  %v3824_v9 = vmul.f32 %v4502_v55, %v6398_v37 }
 0xb30   : > { %v3781_v22 = vmul.f32 %v4496_v52, %v3780_v2  ;;  %v3810_v24 = vsub.f32 1.0, %v3809_v23  ;;  %v4504_v3 = vpop.eup %4503  ;;  %vm3829_vm9 = vweird.f32 %v4502_v55  ;;  %4505 = vrcp.f32 %v6402_v1 }
 0xb31   : > { %v3767_v18 = vadd.f32 %v4494_v49, %v3766_v26  ;;  %v3796_v54 = vmul.f32 %v4498_v40, %v3795_v57  ;;  %v3756_v20 = vsel %vm6438_vm8, %v6396_v7, %v3752_v17  ;;  %vm3814_vm8 = vweird.f32 %v6431_v56 }
 0xb32   : > { %v3782_v4 = vadd.f32 %v4496_v52, %v3781_v22  ;;  %v3811_v6 = vmul.f32 %v6431_v56, %v3810_v24  ;;  %v3825_v11 = vsub.f32 1.0, %v3824_v9  ;;  %v3839_v62 = vmul.f32 %v4504_v3, %v6400_v13 }
 0xb33   : > { %v3771_v33 = vsel %vm3770_vm6, %v4494_v49, %v3767_v18  ;;  %v3797_v14 = vadd.f32 %v4498_v40, %v3796_v54  ;;  %vm3800_vm6 = vmor %vm3798_vm0, %vm3799_vm5  ;;  %v3761_v25 = vsel %vm6426_vm11, %v6407_v46, %v3756_v20  ;;  %v3832_v44 = vand.u32 2147483647, %v6398_v37 }
 0xb34   : > { %v3776_v43 = vsel %vm6411_vm15, %v3775_v48, %v3771_v33  ;;  %v3786_v50 = vsel %vm3785_vm10, %v4496_v52, %v3782_v4  ;;  %v3812_v59 = vadd.f32 %v6431_v56, %v3811_v6  ;;  %v3826_v19 = vmul.f32 %v4502_v55, %v3825_v11  ;;  %vm6478_vm5 = vmor %vm3813_vm2, %vm3814_vm8 }
 0xb35   : > { %v3791_v61 = vsel %vm6416_vm1, %v3790_v51, %v3786_v50  ;;  %v3801_v28 = vsel %vm3800_vm6, %v4498_v40, %v3797_v14  ;;  %v3777_v58 = vmul.f32 %v3776_v43, %v6348_v39  ;;  %v3840_v60 = vsub.f32 1.0, %v3839_v62 }
 0xb36   : > { %v3792_v49 = vmul.f32 %v3791_v61, %v6350_v47  ;;  %v3806_v8 = vsel %vm6442_vm7, %v3805_v41, %v3801_v28  ;;  %v3816_v42 = vsel %vm6478_vm5, %v6431_v56, %v3812_v59  ;;  %v3827_v46 = vadd.f32 %v4502_v55, %v3826_v19  ;;  %v4506_v2 = vpop.eup %4505 }
 0xb37   : > { %v3834_v39 = vand.u32 2147483648, %v6398_v37  ;;  %v3762_v47 = vmul.f32 %v3761_v25, %v6352_v16  ;;  %vm3828_vm15 = vweird.f32 %v6398_v37  ;;  %v3841_v48 = vmul.f32 %v4504_v3, %v3840_v60 }
 0xb38   : > { %v3807_v27 = vmul.f32 %v3806_v8, %v6354_v32  ;;  %vm6491_vm7 = vmor %vm3828_vm15, %vm3829_vm9  ;;  %vm3844_vm1 = vweird.f32 %v4504_v3  ;;  %v3849_v40 = vand.u32 2147483648, %v6400_v13  ;;  %v3876_v21 = vrot.slane %v3777_v58, 7 }
 0xb39   : > { %v3821_v35 = vsel %vm6466_vm14, %v3820_v0, %v3816_v42  ;;  %v3831_v16 = vsel %vm6491_vm7, %v4502_v55, %v3827_v46  ;;  %v3842_v15 = vadd.f32 %v4504_v3, %v3841_v48  ;;  %v3878_v37 = vrot.slane %v3792_v49, 6 }
 0xb3a   : > { %v3835_v45 = vor.u32 1.1754944e-38, %v3834_v39  ;;  %vm3843_vm0 = vweird.f32 %v6400_v13  ;;  %v3847_v32 = vand.u32 2147483647, %v6400_v13  ;;  %v3877_v29 = vsel %vm921_vm3, %v3876_v21, %v3762_v47 }
 0xb3b   : > { %vm3833_vm13 = vcmp.eq.f32.partialorder %v3832_v44, 8.507059e+37  ;;  %vm3845_vm11 = vmor %vm3843_vm0, %vm3844_vm1  ;;  %v3822_v51 = vmul.f32 %v3821_v35, %v6356_v53  ;;  %v3879_v17 = vsel %vm923_vm4, %v3878_v37, %v3877_v29  ;;  %v3850_v26 = vor.u32 1.1754944e-38, %v3849_v40 }
 0xb3c   : > { %v3836_v12 = vsel %vm3833_vm13, %v3835_v45, %v3831_v16  ;;  %v3846_v56 = vsel %vm3845_vm11, %v4504_v3, %v3842_v15  ;;  %v3854_v22 = vmul.f32 %v4506_v2, %v6402_v1  ;;  %v3880_v57 = vrot.slane %v3807_v27, 5 }
 0xb3d   : > { %vm3848_vm12 = vcmp.eq.f32.partialorder %v3847_v32, 8.507059e+37  ;;  %v3837_v13 = vmul.f32 %v3836_v12, %v6360_v31  ;;  %vm6610_vm3 = vcmask 1043459   ;;  %v3864_v38 = vand.u32 2147483648, %v6402_v1 }
 0xb3e   : > { %v3851_v23 = vsel %vm3848_vm12, %v3850_v26, %v3846_v56  ;;  %v3855_v5 = vsub.f32 1.0, %v3854_v22  ;;  %v3881_v18 = vsel %vm6610_vm3, %v3880_v57, %v3879_v17  ;;  %v3882_v53 = vrot.slane %v3822_v51, 4 }
 0xb3f   : > { %vm3859_vm4 = vweird.f32 %v4506_v2  ;;  %v3862_v30 = vand.u32 2147483647, %v6402_v1  ;;  %v3852_v55 = vmul.f32 %v3851_v23, %v6364_v34  ;;  %vm6611_vm10 = vcmask 1044484  }
 0xb40   : > { %v3856_v41 = vmul.f32 %v4506_v2, %v3855_v5  ;;  %v3883_v4 = vsel %vm6611_vm10, %v3882_v53, %v3881_v18  ;;  %vm3858_vm6 = vweird.f32 %v6402_v1  ;;  %v3884_v31 = vrot.slane %v3837_v13, 3 }
 0xb41   : > { %vm3860_vm2 = vmor %vm3858_vm6, %vm3859_vm4  ;;  %v3865_v24 = vor.u32 1.1754944e-38, %v3864_v38  ;;  %vm3863_vm8 = vcmp.eq.f32.partialorder %v3862_v30, 8.507059e+37  ;;  %vm6612_vm14 = vcmask 1045509   ;;  %v3886_v9 = vrot.slane %v3852_v55, 2 }
 0xb42   : > { %v3857_v54 = vadd.f32 %v4506_v2, %v3856_v41  ;;  %v3885_v33 = vsel %vm6612_vm14, %v3884_v31, %v3883_v4  ;;  %vm6613_vm5 = vcmask 1046534   ;;  %vm6614_vm9 = vcmask 1047559  }
 0xb43   : > { %v3887_v1 = vsel %vm6613_vm5, %v3886_v9, %v3885_v33  ;;  %vm6615_vm15 = vcmask 1022976  }
 0xb44   : > { %v3861_v20 = vsel %vm3860_vm2, %v4506_v2, %v3857_v54 }
 0xb45   : > { %v3866_v36 = vsel %vm3863_vm8, %v3865_v24, %v3861_v20 }
 0xb46   : > { %v3867_v34 = vmul.f32 %v3866_v36, %v6379_v63 }
 0xb48   : > { %v3888_v43 = vrot.slane %v3867_v34, 1 }
 0xb4a   : > { %v3889_v50 = vsel %vm6614_vm9, %v3888_v43, %v3887_v1 }
 0xb4b   : > { %3891 = vst.msk [vmem:[%s247_s25] sm:$0xff] %vm6615_vm15, %v3889_v50 }
 0xb4c   : > { %4566 = shalt.err (!%p4563_p3)
}
 0xb4d   : > { %4204 = dma.vmem_to_hbm [thread:$0]  (%p4676_p5), %s3906_s18, 128, %s3908_s14, %s3893_s29  }
 0xb4e PF: > { %p4210_p4 = scmp.ge.s32.totalorder %s4601_s24, 2  ;;  %s3919_s16 = sand.u32 1, %s4589_s21  }
 0xb4f   : > { %s3920_s9 = scalar_lea.sflag [#allocation3], %s3919_s16 }
 0xb50   : > { %p4207_p7 = pnand %p4210_p4, %p4680_p6 }
 0xb52   : > { %p4208_p8 = pneg %p4207_p7 }
 0xb54   : > { %4584 = dma.done.wait (%p4208_p8), %s3920_s9, 128  }
 0xb55   : > { %4586 = vsyncadd (%p4208_p8), %s3920_s9, 4294967168  ;;  %p16_p9 = scmp.ge.s32.totalorder %s4663_s27, 5   ;;  %s6616_s21 = smov %s4593_s22 }
 0xb56   : > { %s6617_s22 = smov %s4597_s23  ;;  %s6618_s23 = smov %s4674_s30 }
 0xb57   : > { %s6619_s24 = smov %s4663_s27  ;;  %18 = sbr.rel (!%p16_p9) target bundleno = 3 (0x3), region = 79 }
 0xb5c   :  { %3926 = vsyncpa [#allocation3], 1 }
 0xb5d   :  { %3928 = vsyncpa [#allocation3 + $0x1], 1 }

</bundles_post_ra>
